<compile_context>
chip_gen: v7x
topology: tpu7x:2x2x1
jax: 0.10.0
libtpu: 0.0.40
codegen_flags: <defaults>
</compile_context>

<pallas_src>
import functools

import jax
import jax.numpy as jnp
from jax import lax
from jax.experimental import pallas as pl
from jax.experimental.pallas import tpu as pltpu


# ---------------------------------------------------------------------------
# in-kernel helpers
# ---------------------------------------------------------------------------
def _conv3x3_flat(f_flat, w_ref, out_len, pitch, cout):
    """3x3 conv over a row-major-flattened zero-padded (rows, pitch, Cin) buffer.

    f_flat : (rows*pitch, Cin) bf16 value.  Tap (kh, kw) of flat output element
             m reads f_flat[m + kh*pitch + kw]  (guard columns are discarded by
             the caller).
    w_ref  : (9, Cin, Cout) ref, kh-major / kw-minor, BN scale pre-folded.
    Returns a (out_len, Cout) float32 accumulator.
    """
    acc = jnp.zeros((out_len, cout), jnp.float32)
    for kh in range(3):
        for kw in range(3):
            off = kh * pitch + kw
            acc = acc + jnp.dot(f_flat[off:off + out_len, :],
                                w_ref[kh * 3 + kw],
                                preferred_element_type=jnp.float32)
    return acc


def _basic_block_kernel(x_ref, w1_ref, b1_ref, w2_ref, b2_ref, mask_ref,
                        o_ref, p1_ref, p2_ref, *, H, W, C, TH):
    # x_ref   : (1, H, W, C)          f32  full image (resident across row tiles)
    # w*_ref  : (9, C, C)             bf16 conv weights, BN scale folded in
    # b*_ref  : (1, C)                f32  folded BN bias
    # mask_ref: ((TH+2)*(W+2), 1)     f32  1.0 on valid columns of the flat band
    # o_ref   : (1, TH, W, C)         f32  output row tile
    # p1_ref  : (TH+5, W+2, C)        bf16 zero-padded x band (+ slack row)
    # p2_ref  : ((TH+3)*(W+2), C)     bf16 zero-padded conv1-output band (flat)
    P = W + 2                       # padded row pitch
    R = H // TH                     # number of row tiles
    LB = (TH + 2) * P               # flat length of conv1-output band (w/ halo)
    LO = TH * P                     # flat length of conv2 output tile
    r = pl.program_id(1)

    # ---- stage 0: zero-padded x band (image rows r*TH-2 .. r*TH+TH+1) -------
    p1_ref[...] = jnp.zeros_like(p1_ref)
    if R == 1:
        p1_ref[2:H + 2, 1:W + 1, :] = x_ref[0].astype(jnp.bfloat16)
    else:
        @pl.when(r == 0)
        def _():
            p1_ref[2:TH + 4, 1:W + 1, :] = (
                x_ref[0, 0:TH + 2, :, :].astype(jnp.bfloat16))

        @pl.when(r == R - 1)
        def _():
            p1_ref[0:TH + 2, 1:W + 1, :] = (
                x_ref[0, H - (TH + 2):H, :, :].astype(jnp.bfloat16))

        if R > 2:
            @pl.when(jnp.logical_and(r > 0, r < R - 1))
            def _():
                p1_ref[0:TH + 4, 1:W + 1, :] = (
                    x_ref[0, pl.ds(r * TH - 2, TH + 4), :, :]
                    .astype(jnp.bfloat16))

    # ---- conv1 + bn1 bias + relu over the band (TH+2 rows incl. halo) -------
    f1 = p1_ref[...].reshape((TH + 5) * P, C)
    t = _conv3x3_flat(f1, w1_ref, LB, P, C)
    t = jnp.maximum(t + b1_ref[...], 0.0) * mask_ref[...]   # zero guard columns

    # ---- scatter t into the zero-padded conv2 input buffer ------------------
    p2_ref[...] = jnp.zeros_like(p2_ref)
    p2_ref[pl.ds(1, LB), :] = t.astype(jnp.bfloat16)
    # band rows that lie outside the image must act as conv2's zero padding
    if R == 1:
        p2_ref[pl.ds(0, P), :] = jnp.zeros((P, C), jnp.bfloat16)
        p2_ref[pl.ds((TH + 1) * P, P), :] = jnp.zeros((P, C), jnp.bfloat16)
    else:
        @pl.when(r == 0)
        def _():
            p2_ref[pl.ds(0, P), :] = jnp.zeros((P, C), jnp.bfloat16)

        @pl.when(r == R - 1)
        def _():
            p2_ref[pl.ds((TH + 1) * P, P), :] = jnp.zeros((P, C), jnp.bfloat16)

    # ---- conv2 + bn2 bias + residual + relu ----------------------------------
    f2 = p2_ref[...]
    y = _conv3x3_flat(f2, w2_ref, LO, P, C) + b2_ref[...]
    y = y.reshape(TH, P, C)[:, :W, :]                 # drop guard columns
    res = x_ref[0, pl.ds(r * TH, TH), :, :]           # 'pre_res' residual (f32)
    o_ref[0] = jnp.maximum(y + res, 0.0).astype(o_ref.dtype)


# ---------------------------------------------------------------------------
# wrapper
# ---------------------------------------------------------------------------
def _fold_bn(gamma, beta, mean, var, eps=1e-5):
    scale = gamma / jnp.sqrt(var + eps)
    return scale, beta - mean * scale


def _pick_row_tile(H):
    """Largest multiple-of-8 divisor of H (<= 64); fall back to whole image."""
    best = H
    for t in range(8, min(H, 64) + 1, 8):
        if H % t == 0:
            best = t
    return best


def basic_block_forward(x_nchw, params, *, row_tile=None):
    """BasicBlock forward (bn_pos='pre_res', stride=1, no downsample)."""
    N, C, H, W = x_nchw.shape
    assert params["w1"].shape == (3, 3, C, C), "inplanes must equal planes"
    TH = _pick_row_tile(H) if row_tile is None else int(row_tile)
    assert H % TH == 0, "row_tile must divide H"
    R = H // TH
    P = W + 2
    LB = (TH + 2) * P

    x = jnp.transpose(x_nchw, (0, 2, 3, 1))          # NCHW -> NHWC (no padding)

    s1, b1 = _fold_bn(params["bn1_gamma"], params["bn1_beta"],
                      params["bn1_mean"], params["bn1_var"])
    s2, b2 = _fold_bn(params["bn2_gamma"], params["bn2_beta"],
                      params["bn2_mean"], params["bn2_var"])

    # BN scale folded into the weights; bf16 operands for the MXU.
    w1 = (params["w1"] * s1).reshape(9, C, C).astype(jnp.bfloat16)
    w2 = (params["w2"] * s2).reshape(9, C, C).astype(jnp.bfloat16)
    b1 = b1.reshape(1, C).astype(jnp.float32)
    b2 = b2.reshape(1, C).astype(jnp.float32)

    # 1.0 on the valid columns of the flattened (TH+2, W+2) conv1-output band.
    mask = (jnp.arange(LB, dtype=jnp.int32) % P < W)
    mask = mask.astype(jnp.float32).reshape(LB, 1)

    kernel = functools.partial(_basic_block_kernel, H=H, W=W, C=C, TH=TH)

    out = pl.pallas_call(
        kernel,
        out_shape=jax.ShapeDtypeStruct((N, H, W, C), jnp.float32),
        grid_spec=pltpu.PrefetchScalarGridSpec(
            num_scalar_prefetch=0,
            grid=(N, R),
            in_specs=[
                # x stays resident across the row-tile axis (same block index).
                pl.BlockSpec((1, H, W, C), lambda n, r: (n, 0, 0, 0)),
                pl.BlockSpec((9, C, C), lambda n, r: (0, 0, 0)),
                pl.BlockSpec((1, C), lambda n, r: (0, 0)),
                pl.BlockSpec((9, C, C), lambda n, r: (0, 0, 0)),
                pl.BlockSpec((1, C), lambda n, r: (0, 0)),
                pl.BlockSpec((LB, 1), lambda n, r: (0, 0)),
            ],
            out_specs=pl.BlockSpec((1, TH, W, C), lambda n, r: (n, r, 0, 0)),
            scratch_shapes=[
                pltpu.VMEM((TH + 5, P, C), jnp.bfloat16),     # padded x band
                pltpu.VMEM(((TH + 3) * P, C), jnp.bfloat16),  # padded conv1 out
            ],
        ),
        compiler_params=pltpu.CompilerParams(
            dimension_semantics=("parallel", "parallel"),
            vmem_limit_bytes=48 * 1024 * 1024,   # headroom on v7x's 64 MiB VMEM
        ),
    )(x, w1, b1, w2, b2, mask)

    return jnp.transpose(out, (0, 3, 1, 2))          # NHWC -> NCHW


# ---------------------------------------------------------------------------
# pure-JAX reference (for correctness checks)
# ---------------------------------------------------------------------------
def _ref_forward(x_nchw, params, match_bf16=True, eps=1e-5):
    x = jnp.transpose(x_nchw, (0, 2, 3, 1))
    s1, b1 = _fold_bn(params["bn1_gamma"], params["bn1_beta"],
                      params["bn1_mean"], params["bn1_var"], eps)
    s2, b2 = _fold_bn(params["bn2_gamma"], params["bn2_beta"],
                      params["bn2_mean"], params["bn2_var"], eps)
    w1 = params["w1"] * s1
    w2 = params["w2"] * s2
    if match_bf16:
        w1 = w1.astype(jnp.bfloat16)
        w2 = w2.astype(jnp.bfloat16)
    dn = lax.conv_dimension_numbers(x.shape, w1.shape, ("NHWC", "HWIO", "NHWC"))

    def conv(inp, w):
        if match_bf16:
            inp = inp.astype(jnp.bfloat16)
        return lax.conv_general_dilated(
            inp, w, (1, 1), ((1, 1), (1, 1)),
            dimension_numbers=dn, preferred_element_type=jnp.float32)

    t = jnp.maximum(conv(x, w1) + b1, 0.0)
    y = jnp.maximum(conv(t, w2) + b2 + x, 0.0)
    return jnp.transpose(y, (0, 3, 1, 2))


def _check(out, ref_bf16, ref_f32, tag):
    assert out.shape == ref_bf16.shape
    max_err = float(jnp.max(jnp.abs(out - ref_bf16)))
    rel_b = float(jnp.linalg.norm(out - ref_bf16) / jnp.linalg.norm(ref_bf16))
    rel_f = float(jnp.linalg.norm(out - ref_f32) / jnp.linalg.norm(ref_f32))
    assert max_err < 5e-2, f"{tag}: max error too large ({max_err})"
    assert rel_b < 5e-3, f"{tag}: mismatch vs bf16-matched reference ({rel_b})"
    assert rel_f < 2e-2, f"{tag}: mismatch vs f32 reference ({rel_f})"


# ---------------------------------------------------------------------------
if __name__ == "__main__":
    key = jax.random.PRNGKey(0)
    N, C, H, W = 2, 4, 16, 16          # inplanes == planes == 4, stride == 1
    ks = jax.random.split(key, 12)
    fan_in = 3 * 3 * C
    std = (2.0 / fan_in) ** 0.5
    params = {
        "w1": jax.random.normal(ks[0], (3, 3, C, C), jnp.float32) * std,
        "w2": jax.random.normal(ks[1], (3, 3, C, C), jnp.float32) * std,
        "bn1_gamma": 1.0 + 0.1 * jax.random.normal(ks[2], (C,), jnp.float32),
        "bn1_beta": 0.1 * jax.random.normal(ks[3], (C,), jnp.float32),
        "bn1_mean": 0.1 * jax.random.normal(ks[4], (C,), jnp.float32),
        "bn1_var": jnp.abs(jax.random.normal(ks[5], (C,), jnp.float32)) + 0.5,
        "bn2_gamma": 1.0 + 0.1 * jax.random.normal(ks[6], (C,), jnp.float32),
        "bn2_beta": 0.1 * jax.random.normal(ks[7], (C,), jnp.float32),
        "bn2_mean": 0.1 * jax.random.normal(ks[8], (C,), jnp.float32),
        "bn2_var": jnp.abs(jax.random.normal(ks[9], (C,), jnp.float32)) + 0.5,
    }

    x = jax.random.normal(ks[10], (N, C, H, W), jnp.float32)
    ref_b = jax.block_until_ready(_ref_forward(x, params, match_bf16=True))
    ref_f = jax.block_until_ready(_ref_forward(x, params, match_bf16=False))

    # row-tiled path: 2 row tiles per image (exercises both edge tiles)
    out = jax.block_until_ready(basic_block_forward(x, params, row_tile=8))
    _check(out, ref_b, ref_f, "row_tile=8")

    # single-tile path (TH == H)
    out1 = jax.block_until_ready(basic_block_forward(x, params))
    _check(out1, ref_b, ref_f, "single tile")

    # interior-tile path (3 row tiles)
    x3 = jax.random.normal(ks[11], (1, C, 24, 24), jnp.float32)
    ref3_b = jax.block_until_ready(_ref_forward(x3, params, match_bf16=True))
    ref3_f = jax.block_until_ready(_ref_forward(x3, params, match_bf16=False))
    out3 = jax.block_until_ready(basic_block_forward(x3, params, row_tile=8))
    _check(out3, ref3_b, ref3_f, "3 row tiles")

    print("KERNEL_OK")
</pallas_src>

<mosaic_0001>
module attributes {stable_mosaic.version = 11 : i64} {
  func.func @_basic_block_kernel(%arg0: i32, %arg1: i32, %arg2: memref<1x16x16x4xf32, #tpu.memory_space<vmem>>, %arg3: memref<9x4x4xbf16, #tpu.memory_space<vmem>>, %arg4: memref<1x4xf32, #tpu.memory_space<vmem>>, %arg5: memref<9x4x4xbf16, #tpu.memory_space<vmem>>, %arg6: memref<1x4xf32, #tpu.memory_space<vmem>>, %arg7: memref<180x1xf32, #tpu.memory_space<vmem>>, %arg8: memref<1x8x16x4xf32, #tpu.memory_space<vmem>>, %arg9: memref<13x18x4xbf16, #tpu.memory_space<vmem>>, %arg10: memref<198x4xbf16, #tpu.memory_space<vmem>>) attributes {dimension_semantics = [#tpu.dimension_semantics<parallel>, #tpu.dimension_semantics<parallel>], iteration_bounds = array<i64: 2, 2>, scalar_prefetch = 0 : i64, scratch_operands = 2 : i64, tpu.core_type = #tpu.core_type<tc>, window_params = [{transform_indices = @transform_0, window_bounds = array<i64: 1, 16, 16, 4>}, {pipeline_mode = #tpu.pipeline_mode<synchronous>, transform_indices = @transform_1, window_bounds = array<i64: 9, 4, 4>}, {pipeline_mode = #tpu.pipeline_mode<synchronous>, transform_indices = @transform_2, window_bounds = array<i64: 1, 4>}, {pipeline_mode = #tpu.pipeline_mode<synchronous>, transform_indices = @transform_3, window_bounds = array<i64: 9, 4, 4>}, {pipeline_mode = #tpu.pipeline_mode<synchronous>, transform_indices = @transform_4, window_bounds = array<i64: 1, 4>}, {pipeline_mode = #tpu.pipeline_mode<synchronous>, transform_indices = @transform_5, window_bounds = array<i64: 180, 1>}, {transform_indices = @transform_6, window_bounds = array<i64: 1, 8, 16, 4>}]} {
    %cst = arith.constant 0.000000e+00 : bf16
    %0 = vector.broadcast %cst : bf16 to vector<13x18x4xbf16>
    %c0 = arith.constant 0 : index
    %c0_0 = arith.constant 0 : index
    %c0_1 = arith.constant 0 : index
    %1 = vector.load %arg9[%c0, %c0_0, %c0_1] : memref<13x18x4xbf16, #tpu.memory_space<vmem>>, vector<13x18x4xbf16>
    tpu.vector_store %arg9[%c0, %c0_0, %c0_1], %0 {strides = array<i32>} : memref<13x18x4xbf16, #tpu.memory_space<vmem>>, vector<13x18x4xbf16>,
    %c0_i32 = arith.constant 0 : i32
    %2 = arith.cmpi eq, %arg1, %c0_i32 : i32
    %3 = arith.extui %2 : i1 to i32
    %c0_i32_2 = arith.constant 0 : i32
    %4 = arith.cmpi ne, %3, %c0_i32_2 : i32
    scf.if %4 {
      %c0_99 = arith.constant 0 : index
      %c0_100 = arith.constant 0 : index
      %c0_101 = arith.constant 0 : index
      %c0_102 = arith.constant 0 : index
      %136 = vector.load %arg2[%c0_99, %c0_100, %c0_101, %c0_102] : memref<1x16x16x4xf32, #tpu.memory_space<vmem>>, vector<1x10x16x4xf32>
      %137 = vector.shape_cast %136 : vector<1x10x16x4xf32> to vector<10x16x4xf32>
      %138 = arith.truncf %137 : vector<10x16x4xf32> to vector<10x16x4xbf16>
      %c2_103 = arith.constant 2 : index
      %c1_104 = arith.constant 1 : index
      %c0_105 = arith.constant 0 : index
      %139 = vector.load %arg9[%c2_103, %c1_104, %c0_105] : memref<13x18x4xbf16, #tpu.memory_space<vmem>>, vector<10x16x4xbf16>
      tpu.vector_store %arg9[%c2_103, %c1_104, %c0_105], %138 {strides = array<i32>} : memref<13x18x4xbf16, #tpu.memory_space<vmem>>, vector<10x16x4xbf16>,
    } else {
    }
    %c1_i32 = arith.constant 1 : i32
    %5 = arith.cmpi eq, %arg1, %c1_i32 : i32
    %6 = arith.extui %5 : i1 to i32
    %c0_i32_3 = arith.constant 0 : i32
    %7 = arith.cmpi ne, %6, %c0_i32_3 : i32
    scf.if %7 {
      %c0_99 = arith.constant 0 : index
      %c6_100 = arith.constant 6 : index
      %c0_101 = arith.constant 0 : index
      %c0_102 = arith.constant 0 : index
      %136 = vector.load %arg2[%c0_99, %c6_100, %c0_101, %c0_102] : memref<1x16x16x4xf32, #tpu.memory_space<vmem>>, vector<1x10x16x4xf32>
      %137 = vector.shape_cast %136 : vector<1x10x16x4xf32> to vector<10x16x4xf32>
      %138 = arith.truncf %137 : vector<10x16x4xf32> to vector<10x16x4xbf16>
      %c0_103 = arith.constant 0 : index
      %c1_104 = arith.constant 1 : index
      %c0_105 = arith.constant 0 : index
      %139 = vector.load %arg9[%c0_103, %c1_104, %c0_105] : memref<13x18x4xbf16, #tpu.memory_space<vmem>>, vector<10x16x4xbf16>
      tpu.vector_store %arg9[%c0_103, %c1_104, %c0_105], %138 {strides = array<i32>} : memref<13x18x4xbf16, #tpu.memory_space<vmem>>, vector<10x16x4xbf16>,
    } else {
    }
    %c0_4 = arith.constant 0 : index
    %c0_5 = arith.constant 0 : index
    %c0_6 = arith.constant 0 : index
    %8 = vector.load %arg9[%c0_4, %c0_5, %c0_6] : memref<13x18x4xbf16, #tpu.memory_space<vmem>>, vector<13x18x4xbf16>
    %9 = vector.shape_cast %8 : vector<13x18x4xbf16> to vector<234x4xbf16>
    %cst_7 = arith.constant 0.000000e+00 : f32
    %10 = vector.broadcast %cst_7 : f32 to vector<180x4xf32>
    %11 = vector.extract_strided_slice %9 {offsets = [0, 0], sizes = [180, 4], strides = [1, 1]} : vector<234x4xbf16> to vector<180x4xbf16>
    %c0_8 = arith.constant 0 : index
    %c0_9 = arith.constant 0 : index
    %c0_10 = arith.constant 0 : index
    %12 = vector.load %arg3[%c0_8, %c0_9, %c0_10] : memref<9x4x4xbf16, #tpu.memory_space<vmem>>, vector<1x4x4xbf16>
    %13 = vector.shape_cast %12 : vector<1x4x4xbf16> to vector<4x4xbf16>
    %cst_11 = arith.constant dense<0.000000e+00> : vector<180x4xf32>
    %14 = tpu.matmul %11, %13, %cst_11 {dimension_numbers = #tpu.dot_dimension_numbers<[1], [0], [0], [1], [0, 0, 1, 1], [], []>} : vector<180x4xbf16>, vector<4x4xbf16>, vector<180x4xf32> -> vector<180x4xf32>
    %15 = arith.addf %10, %14 : vector<180x4xf32>
    %16 = vector.extract_strided_slice %9 {offsets = [1, 0], sizes = [180, 4], strides = [1, 1]} : vector<234x4xbf16> to vector<180x4xbf16>
    %c1 = arith.constant 1 : index
    %c0_12 = arith.constant 0 : index
    %c0_13 = arith.constant 0 : index
    %17 = vector.load %arg3[%c1, %c0_12, %c0_13] : memref<9x4x4xbf16, #tpu.memory_space<vmem>>, vector<1x4x4xbf16>
    %18 = vector.shape_cast %17 : vector<1x4x4xbf16> to vector<4x4xbf16>
    %cst_14 = arith.constant dense<0.000000e+00> : vector<180x4xf32>
    %19 = tpu.matmul %16, %18, %cst_14 {dimension_numbers = #tpu.dot_dimension_numbers<[1], [0], [0], [1], [0, 0, 1, 1], [], []>} : vector<180x4xbf16>, vector<4x4xbf16>, vector<180x4xf32> -> vector<180x4xf32>
    %20 = arith.addf %15, %19 : vector<180x4xf32>
    %21 = vector.extract_strided_slice %9 {offsets = [2, 0], sizes = [180, 4], strides = [1, 1]} : vector<234x4xbf16> to vector<180x4xbf16>
    %c2 = arith.constant 2 : index
    %c0_15 = arith.constant 0 : index
    %c0_16 = arith.constant 0 : index
    %22 = vector.load %arg3[%c2, %c0_15, %c0_16] : memref<9x4x4xbf16, #tpu.memory_space<vmem>>, vector<1x4x4xbf16>
    %23 = vector.shape_cast %22 : vector<1x4x4xbf16> to vector<4x4xbf16>
    %cst_17 = arith.constant dense<0.000000e+00> : vector<180x4xf32>
    %24 = tpu.matmul %21, %23, %cst_17 {dimension_numbers = #tpu.dot_dimension_numbers<[1], [0], [0], [1], [0, 0, 1, 1], [], []>} : vector<180x4xbf16>, vector<4x4xbf16>, vector<180x4xf32> -> vector<180x4xf32>
    %25 = arith.addf %20, %24 : vector<180x4xf32>
    %26 = vector.extract_strided_slice %9 {offsets = [18, 0], sizes = [180, 4], strides = [1, 1]} : vector<234x4xbf16> to vector<180x4xbf16>
    %c3 = arith.constant 3 : index
    %c0_18 = arith.constant 0 : index
    %c0_19 = arith.constant 0 : index
    %27 = vector.load %arg3[%c3, %c0_18, %c0_19] : memref<9x4x4xbf16, #tpu.memory_space<vmem>>, vector<1x4x4xbf16>
    %28 = vector.shape_cast %27 : vector<1x4x4xbf16> to vector<4x4xbf16>
    %cst_20 = arith.constant dense<0.000000e+00> : vector<180x4xf32>
    %29 = tpu.matmul %26, %28, %cst_20 {dimension_numbers = #tpu.dot_dimension_numbers<[1], [0], [0], [1], [0, 0, 1, 1], [], []>} : vector<180x4xbf16>, vector<4x4xbf16>, vector<180x4xf32> -> vector<180x4xf32>
    %30 = arith.addf %25, %29 : vector<180x4xf32>
    %31 = vector.extract_strided_slice %9 {offsets = [19, 0], sizes = [180, 4], strides = [1, 1]} : vector<234x4xbf16> to vector<180x4xbf16>
    %c4 = arith.constant 4 : index
    %c0_21 = arith.constant 0 : index
    %c0_22 = arith.constant 0 : index
    %32 = vector.load %arg3[%c4, %c0_21, %c0_22] : memref<9x4x4xbf16, #tpu.memory_space<vmem>>, vector<1x4x4xbf16>
    %33 = vector.shape_cast %32 : vector<1x4x4xbf16> to vector<4x4xbf16>
    %cst_23 = arith.constant dense<0.000000e+00> : vector<180x4xf32>
    %34 = tpu.matmul %31, %33, %cst_23 {dimension_numbers = #tpu.dot_dimension_numbers<[1], [0], [0], [1], [0, 0, 1, 1], [], []>} : vector<180x4xbf16>, vector<4x4xbf16>, vector<180x4xf32> -> vector<180x4xf32>
    %35 = arith.addf %30, %34 : vector<180x4xf32>
    %36 = vector.extract_strided_slice %9 {offsets = [20, 0], sizes = [180, 4], strides = [1, 1]} : vector<234x4xbf16> to vector<180x4xbf16>
    %c5 = arith.constant 5 : index
    %c0_24 = arith.constant 0 : index
    %c0_25 = arith.constant 0 : index
    %37 = vector.load %arg3[%c5, %c0_24, %c0_25] : memref<9x4x4xbf16, #tpu.memory_space<vmem>>, vector<1x4x4xbf16>
    %38 = vector.shape_cast %37 : vector<1x4x4xbf16> to vector<4x4xbf16>
    %cst_26 = arith.constant dense<0.000000e+00> : vector<180x4xf32>
    %39 = tpu.matmul %36, %38, %cst_26 {dimension_numbers = #tpu.dot_dimension_numbers<[1], [0], [0], [1], [0, 0, 1, 1], [], []>} : vector<180x4xbf16>, vector<4x4xbf16>, vector<180x4xf32> -> vector<180x4xf32>
    %40 = arith.addf %35, %39 : vector<180x4xf32>
    %41 = vector.extract_strided_slice %9 {offsets = [36, 0], sizes = [180, 4], strides = [1, 1]} : vector<234x4xbf16> to vector<180x4xbf16>
    %c6 = arith.constant 6 : index
    %c0_27 = arith.constant 0 : index
    %c0_28 = arith.constant 0 : index
    %42 = vector.load %arg3[%c6, %c0_27, %c0_28] : memref<9x4x4xbf16, #tpu.memory_space<vmem>>, vector<1x4x4xbf16>
    %43 = vector.shape_cast %42 : vector<1x4x4xbf16> to vector<4x4xbf16>
    %cst_29 = arith.constant dense<0.000000e+00> : vector<180x4xf32>
    %44 = tpu.matmul %41, %43, %cst_29 {dimension_numbers = #tpu.dot_dimension_numbers<[1], [0], [0], [1], [0, 0, 1, 1], [], []>} : vector<180x4xbf16>, vector<4x4xbf16>, vector<180x4xf32> -> vector<180x4xf32>
    %45 = arith.addf %40, %44 : vector<180x4xf32>
    %46 = vector.extract_strided_slice %9 {offsets = [37, 0], sizes = [180, 4], strides = [1, 1]} : vector<234x4xbf16> to vector<180x4xbf16>
    %c7 = arith.constant 7 : index
    %c0_30 = arith.constant 0 : index
    %c0_31 = arith.constant 0 : index
    %47 = vector.load %arg3[%c7, %c0_30, %c0_31] : memref<9x4x4xbf16, #tpu.memory_space<vmem>>, vector<1x4x4xbf16>
    %48 = vector.shape_cast %47 : vector<1x4x4xbf16> to vector<4x4xbf16>
    %cst_32 = arith.constant dense<0.000000e+00> : vector<180x4xf32>
    %49 = tpu.matmul %46, %48, %cst_32 {dimension_numbers = #tpu.dot_dimension_numbers<[1], [0], [0], [1], [0, 0, 1, 1], [], []>} : vector<180x4xbf16>, vector<4x4xbf16>, vector<180x4xf32> -> vector<180x4xf32>
    %50 = arith.addf %45, %49 : vector<180x4xf32>
    %51 = vector.extract_strided_slice %9 {offsets = [38, 0], sizes = [180, 4], strides = [1, 1]} : vector<234x4xbf16> to vector<180x4xbf16>
    %c8 = arith.constant 8 : index
    %c0_33 = arith.constant 0 : index
    %c0_34 = arith.constant 0 : index
    %52 = vector.load %arg3[%c8, %c0_33, %c0_34] : memref<9x4x4xbf16, #tpu.memory_space<vmem>>, vector<1x4x4xbf16>
    %53 = vector.shape_cast %52 : vector<1x4x4xbf16> to vector<4x4xbf16>
    %cst_35 = arith.constant dense<0.000000e+00> : vector<180x4xf32>
    %54 = tpu.matmul %51, %53, %cst_35 {dimension_numbers = #tpu.dot_dimension_numbers<[1], [0], [0], [1], [0, 0, 1, 1], [], []>} : vector<180x4xbf16>, vector<4x4xbf16>, vector<180x4xf32> -> vector<180x4xf32>
    %55 = arith.addf %50, %54 : vector<180x4xf32>
    %c0_36 = arith.constant 0 : index
    %c0_37 = arith.constant 0 : index
    %56 = vector.load %arg4[%c0_36, %c0_37] : memref<1x4xf32, #tpu.memory_space<vmem>>, vector<1x4xf32>
    %57 = vector.broadcast %56 : vector<1x4xf32> to vector<180x4xf32>
    %58 = arith.addf %55, %57 : vector<180x4xf32>
    %cst_38 = arith.constant 0.000000e+00 : f32
    %59 = vector.broadcast %cst_38 : f32 to vector<180x4xf32>
    %60 = arith.maximumf %58, %59 : vector<180x4xf32>
    %c0_39 = arith.constant 0 : index
    %c0_40 = arith.constant 0 : index
    %61 = vector.load %arg7[%c0_39, %c0_40] : memref<180x1xf32, #tpu.memory_space<vmem>>, vector<180x1xf32>
    %62 = vector.broadcast %61 : vector<180x1xf32> to vector<180x4xf32>
    %63 = arith.mulf %60, %62 : vector<180x4xf32>
    %cst_41 = arith.constant 0.000000e+00 : bf16
    %64 = vector.broadcast %cst_41 : bf16 to vector<198x4xbf16>
    %c0_42 = arith.constant 0 : index
    %c0_43 = arith.constant 0 : index
    %65 = vector.load %arg10[%c0_42, %c0_43] : memref<198x4xbf16, #tpu.memory_space<vmem>>, vector<198x4xbf16>
    tpu.vector_store %arg10[%c0_42, %c0_43], %64 {strides = array<i32>} : memref<198x4xbf16, #tpu.memory_space<vmem>>, vector<198x4xbf16>,
    %66 = arith.truncf %63 : vector<180x4xf32> to vector<180x4xbf16>
    %c1_44 = arith.constant 1 : index
    %c0_45 = arith.constant 0 : index
    %67 = vector.load %arg10[%c1_44, %c0_45] : memref<198x4xbf16, #tpu.memory_space<vmem>>, vector<180x4xbf16>
    tpu.vector_store %arg10[%c1_44, %c0_45], %66 {strides = array<i32>} : memref<198x4xbf16, #tpu.memory_space<vmem>>, vector<180x4xbf16>,
    %c0_i32_46 = arith.constant 0 : i32
    %68 = arith.cmpi eq, %arg1, %c0_i32_46 : i32
    %69 = arith.extui %68 : i1 to i32
    %c0_i32_47 = arith.constant 0 : i32
    %70 = arith.cmpi ne, %69, %c0_i32_47 : i32
    scf.if %70 {
      %cst_99 = arith.constant 0.000000e+00 : bf16
      %136 = vector.broadcast %cst_99 : bf16 to vector<18x4xbf16>
      %c0_100 = arith.constant 0 : index
      %c0_101 = arith.constant 0 : index
      %137 = vector.load %arg10[%c0_100, %c0_101] : memref<198x4xbf16, #tpu.memory_space<vmem>>, vector<18x4xbf16>
      tpu.vector_store %arg10[%c0_100, %c0_101], %136 {strides = array<i32>} : memref<198x4xbf16, #tpu.memory_space<vmem>>, vector<18x4xbf16>,
    } else {
    }
    %c1_i32_48 = arith.constant 1 : i32
    %71 = arith.cmpi eq, %arg1, %c1_i32_48 : i32
    %72 = arith.extui %71 : i1 to i32
    %c0_i32_49 = arith.constant 0 : i32
    %73 = arith.cmpi ne, %72, %c0_i32_49 : i32
    scf.if %73 {
      %cst_99 = arith.constant 0.000000e+00 : bf16
      %136 = vector.broadcast %cst_99 : bf16 to vector<18x4xbf16>
      %c162 = arith.constant 162 : index
      %c0_100 = arith.constant 0 : index
      %137 = vector.load %arg10[%c162, %c0_100] : memref<198x4xbf16, #tpu.memory_space<vmem>>, vector<18x4xbf16>
      tpu.vector_store %arg10[%c162, %c0_100], %136 {strides = array<i32>} : memref<198x4xbf16, #tpu.memory_space<vmem>>, vector<18x4xbf16>,
    } else {
    }
    %c0_50 = arith.constant 0 : index
    %c0_51 = arith.constant 0 : index
    %74 = vector.load %arg10[%c0_50, %c0_51] : memref<198x4xbf16, #tpu.memory_space<vmem>>, vector<198x4xbf16>
    %cst_52 = arith.constant 0.000000e+00 : f32
    %75 = vector.broadcast %cst_52 : f32 to vector<144x4xf32>
    %76 = vector.extract_strided_slice %74 {offsets = [0, 0], sizes = [144, 4], strides = [1, 1]} : vector<198x4xbf16> to vector<144x4xbf16>
    %c0_53 = arith.constant 0 : index
    %c0_54 = arith.constant 0 : index
    %c0_55 = arith.constant 0 : index
    %77 = vector.load %arg5[%c0_53, %c0_54, %c0_55] : memref<9x4x4xbf16, #tpu.memory_space<vmem>>, vector<1x4x4xbf16>
    %78 = vector.shape_cast %77 : vector<1x4x4xbf16> to vector<4x4xbf16>
    %cst_56 = arith.constant dense<0.000000e+00> : vector<144x4xf32>
    %79 = tpu.matmul %76, %78, %cst_56 {dimension_numbers = #tpu.dot_dimension_numbers<[1], [0], [0], [1], [0, 0, 1, 1], [], []>} : vector<144x4xbf16>, vector<4x4xbf16>, vector<144x4xf32> -> vector<144x4xf32>
    %80 = arith.addf %75, %79 : vector<144x4xf32>
    %81 = vector.extract_strided_slice %74 {offsets = [1, 0], sizes = [144, 4], strides = [1, 1]} : vector<198x4xbf16> to vector<144x4xbf16>
    %c1_57 = arith.constant 1 : index
    %c0_58 = arith.constant 0 : index
    %c0_59 = arith.constant 0 : index
    %82 = vector.load %arg5[%c1_57, %c0_58, %c0_59] : memref<9x4x4xbf16, #tpu.memory_space<vmem>>, vector<1x4x4xbf16>
    %83 = vector.shape_cast %82 : vector<1x4x4xbf16> to vector<4x4xbf16>
    %cst_60 = arith.constant dense<0.000000e+00> : vector<144x4xf32>
    %84 = tpu.matmul %81, %83, %cst_60 {dimension_numbers = #tpu.dot_dimension_numbers<[1], [0], [0], [1], [0, 0, 1, 1], [], []>} : vector<144x4xbf16>, vector<4x4xbf16>, vector<144x4xf32> -> vector<144x4xf32>
    %85 = arith.addf %80, %84 : vector<144x4xf32>
    %86 = vector.extract_strided_slice %74 {offsets = [2, 0], sizes = [144, 4], strides = [1, 1]} : vector<198x4xbf16> to vector<144x4xbf16>
    %c2_61 = arith.constant 2 : index
    %c0_62 = arith.constant 0 : index
    %c0_63 = arith.constant 0 : index
    %87 = vector.load %arg5[%c2_61, %c0_62, %c0_63] : memref<9x4x4xbf16, #tpu.memory_space<vmem>>, vector<1x4x4xbf16>
    %88 = vector.shape_cast %87 : vector<1x4x4xbf16> to vector<4x4xbf16>
    %cst_64 = arith.constant dense<0.000000e+00> : vector<144x4xf32>
    %89 = tpu.matmul %86, %88, %cst_64 {dimension_numbers = #tpu.dot_dimension_numbers<[1], [0], [0], [1], [0, 0, 1, 1], [], []>} : vector<144x4xbf16>, vector<4x4xbf16>, vector<144x4xf32> -> vector<144x4xf32>
    %90 = arith.addf %85, %89 : vector<144x4xf32>
    %91 = vector.extract_strided_slice %74 {offsets = [18, 0], sizes = [144, 4], strides = [1, 1]} : vector<198x4xbf16> to vector<144x4xbf16>
    %c3_65 = arith.constant 3 : index
    %c0_66 = arith.constant 0 : index
    %c0_67 = arith.constant 0 : index
    %92 = vector.load %arg5[%c3_65, %c0_66, %c0_67] : memref<9x4x4xbf16, #tpu.memory_space<vmem>>, vector<1x4x4xbf16>
    %93 = vector.shape_cast %92 : vector<1x4x4xbf16> to vector<4x4xbf16>
    %cst_68 = arith.constant dense<0.000000e+00> : vector<144x4xf32>
    %94 = tpu.matmul %91, %93, %cst_68 {dimension_numbers = #tpu.dot_dimension_numbers<[1], [0], [0], [1], [0, 0, 1, 1], [], []>} : vector<144x4xbf16>, vector<4x4xbf16>, vector<144x4xf32> -> vector<144x4xf32>
    %95 = arith.addf %90, %94 : vector<144x4xf32>
    %96 = vector.extract_strided_slice %74 {offsets = [19, 0], sizes = [144, 4], strides = [1, 1]} : vector<198x4xbf16> to vector<144x4xbf16>
    %c4_69 = arith.constant 4 : index
    %c0_70 = arith.constant 0 : index
    %c0_71 = arith.constant 0 : index
    %97 = vector.load %arg5[%c4_69, %c0_70, %c0_71] : memref<9x4x4xbf16, #tpu.memory_space<vmem>>, vector<1x4x4xbf16>
    %98 = vector.shape_cast %97 : vector<1x4x4xbf16> to vector<4x4xbf16>
    %cst_72 = arith.constant dense<0.000000e+00> : vector<144x4xf32>
    %99 = tpu.matmul %96, %98, %cst_72 {dimension_numbers = #tpu.dot_dimension_numbers<[1], [0], [0], [1], [0, 0, 1, 1], [], []>} : vector<144x4xbf16>, vector<4x4xbf16>, vector<144x4xf32> -> vector<144x4xf32>
    %100 = arith.addf %95, %99 : vector<144x4xf32>
    %101 = vector.extract_strided_slice %74 {offsets = [20, 0], sizes = [144, 4], strides = [1, 1]} : vector<198x4xbf16> to vector<144x4xbf16>
    %c5_73 = arith.constant 5 : index
    %c0_74 = arith.constant 0 : index
    %c0_75 = arith.constant 0 : index
    %102 = vector.load %arg5[%c5_73, %c0_74, %c0_75] : memref<9x4x4xbf16, #tpu.memory_space<vmem>>, vector<1x4x4xbf16>
    %103 = vector.shape_cast %102 : vector<1x4x4xbf16> to vector<4x4xbf16>
    %cst_76 = arith.constant dense<0.000000e+00> : vector<144x4xf32>
    %104 = tpu.matmul %101, %103, %cst_76 {dimension_numbers = #tpu.dot_dimension_numbers<[1], [0], [0], [1], [0, 0, 1, 1], [], []>} : vector<144x4xbf16>, vector<4x4xbf16>, vector<144x4xf32> -> vector<144x4xf32>
    %105 = arith.addf %100, %104 : vector<144x4xf32>
    %106 = vector.extract_strided_slice %74 {offsets = [36, 0], sizes = [144, 4], strides = [1, 1]} : vector<198x4xbf16> to vector<144x4xbf16>
    %c6_77 = arith.constant 6 : index
    %c0_78 = arith.constant 0 : index
    %c0_79 = arith.constant 0 : index
    %107 = vector.load %arg5[%c6_77, %c0_78, %c0_79] : memref<9x4x4xbf16, #tpu.memory_space<vmem>>, vector<1x4x4xbf16>
    %108 = vector.shape_cast %107 : vector<1x4x4xbf16> to vector<4x4xbf16>
    %cst_80 = arith.constant dense<0.000000e+00> : vector<144x4xf32>
    %109 = tpu.matmul %106, %108, %cst_80 {dimension_numbers = #tpu.dot_dimension_numbers<[1], [0], [0], [1], [0, 0, 1, 1], [], []>} : vector<144x4xbf16>, vector<4x4xbf16>, vector<144x4xf32> -> vector<144x4xf32>
    %110 = arith.addf %105, %109 : vector<144x4xf32>
    %111 = vector.extract_strided_slice %74 {offsets = [37, 0], sizes = [144, 4], strides = [1, 1]} : vector<198x4xbf16> to vector<144x4xbf16>
    %c7_81 = arith.constant 7 : index
    %c0_82 = arith.constant 0 : index
    %c0_83 = arith.constant 0 : index
    %112 = vector.load %arg5[%c7_81, %c0_82, %c0_83] : memref<9x4x4xbf16, #tpu.memory_space<vmem>>, vector<1x4x4xbf16>
    %113 = vector.shape_cast %112 : vector<1x4x4xbf16> to vector<4x4xbf16>
    %cst_84 = arith.constant dense<0.000000e+00> : vector<144x4xf32>
    %114 = tpu.matmul %111, %113, %cst_84 {dimension_numbers = #tpu.dot_dimension_numbers<[1], [0], [0], [1], [0, 0, 1, 1], [], []>} : vector<144x4xbf16>, vector<4x4xbf16>, vector<144x4xf32> -> vector<144x4xf32>
    %115 = arith.addf %110, %114 : vector<144x4xf32>
    %116 = vector.extract_strided_slice %74 {offsets = [38, 0], sizes = [144, 4], strides = [1, 1]} : vector<198x4xbf16> to vector<144x4xbf16>
    %c8_85 = arith.constant 8 : index
    %c0_86 = arith.constant 0 : index
    %c0_87 = arith.constant 0 : index
    %117 = vector.load %arg5[%c8_85, %c0_86, %c0_87] : memref<9x4x4xbf16, #tpu.memory_space<vmem>>, vector<1x4x4xbf16>
    %118 = vector.shape_cast %117 : vector<1x4x4xbf16> to vector<4x4xbf16>
    %cst_88 = arith.constant dense<0.000000e+00> : vector<144x4xf32>
    %119 = tpu.matmul %116, %118, %cst_88 {dimension_numbers = #tpu.dot_dimension_numbers<[1], [0], [0], [1], [0, 0, 1, 1], [], []>} : vector<144x4xbf16>, vector<4x4xbf16>, vector<144x4xf32> -> vector<144x4xf32>
    %120 = arith.addf %115, %119 : vector<144x4xf32>
    %c0_89 = arith.constant 0 : index
    %c0_90 = arith.constant 0 : index
    %121 = vector.load %arg6[%c0_89, %c0_90] : memref<1x4xf32, #tpu.memory_space<vmem>>, vector<1x4xf32>
    %122 = vector.broadcast %121 : vector<1x4xf32> to vector<144x4xf32>
    %123 = arith.addf %120, %122 : vector<144x4xf32>
    %124 = vector.shape_cast %123 : vector<144x4xf32> to vector<8x18x4xf32>
    %125 = vector.extract_strided_slice %124 {offsets = [0, 0, 0], sizes = [8, 16, 4], strides = [1, 1, 1]} : vector<8x18x4xf32> to vector<8x16x4xf32>
    %c8_i32 = arith.constant 8 : i32
    %126 = arith.muli %arg1, %c8_i32 : i32
    %c0_91 = arith.constant 0 : index
    %127 = arith.index_cast %126 : i32 to index
    %c0_92 = arith.constant 0 : index
    %c0_93 = arith.constant 0 : index
    %128 = vector.load %arg2[%c0_91, %127, %c0_92, %c0_93] : memref<1x16x16x4xf32, #tpu.memory_space<vmem>>, vector<1x8x16x4xf32>
    %129 = vector.shape_cast %128 : vector<1x8x16x4xf32> to vector<8x16x4xf32>
    %130 = arith.addf %125, %129 : vector<8x16x4xf32>
    %cst_94 = arith.constant 0.000000e+00 : f32
    %131 = vector.broadcast %cst_94 : f32 to vector<8x16x4xf32>
    %132 = arith.maximumf %130, %131 : vector<8x16x4xf32>
    %c0_95 = arith.constant 0 : index
    %c0_96 = arith.constant 0 : index
    %c0_97 = arith.constant 0 : index
    %c0_98 = arith.constant 0 : index
    %133 = vector.load %arg8[%c0_95, %c0_96, %c0_97, %c0_98] : memref<1x8x16x4xf32, #tpu.memory_space<vmem>>, vector<1x8x16x4xf32>
    %134 = vector.shape_cast %133 : vector<1x8x16x4xf32> to vector<8x16x4xf32>
    %135 = vector.shape_cast %132 : vector<8x16x4xf32> to vector<1x8x16x4xf32>
    tpu.vector_store %arg8[%c0_95, %c0_96, %c0_97, %c0_98], %135 {strides = array<i32>} : memref<1x8x16x4xf32, #tpu.memory_space<vmem>>, vector<1x8x16x4xf32>,
    return
  }
  func.func @transform_0(%arg0: i32, %arg1: i32) -> (i32, i32, i32, i32) {
    %c0_i32 = arith.constant 0 : i32
    %c0_i32_0 = arith.constant 0 : i32
    %c0_i32_1 = arith.constant 0 : i32
    %c0_i32_2 = arith.constant 0 : i32
    return %arg0, %c0_i32, %c0_i32_0, %c0_i32_1 : i32, i32, i32, i32
  }
  func.func @transform_1(%arg0: i32, %arg1: i32) -> (i32, i32, i32) {
    %c0_i32 = arith.constant 0 : i32
    %c0_i32_0 = arith.constant 0 : i32
    %c0_i32_1 = arith.constant 0 : i32
    %c0_i32_2 = arith.constant 0 : i32
    return %c0_i32, %c0_i32_0, %c0_i32_1 : i32, i32, i32
  }
  func.func @transform_2(%arg0: i32, %arg1: i32) -> (i32, i32) {
    %c0_i32 = arith.constant 0 : i32
    %c0_i32_0 = arith.constant 0 : i32
    %c0_i32_1 = arith.constant 0 : i32
    return %c0_i32, %c0_i32_0 : i32, i32
  }
  func.func @transform_3(%arg0: i32, %arg1: i32) -> (i32, i32, i32) {
    %c0_i32 = arith.constant 0 : i32
    %c0_i32_0 = arith.constant 0 : i32
    %c0_i32_1 = arith.constant 0 : i32
    %c0_i32_2 = arith.constant 0 : i32
    return %c0_i32, %c0_i32_0, %c0_i32_1 : i32, i32, i32
  }
  func.func @transform_4(%arg0: i32, %arg1: i32) -> (i32, i32) {
    %c0_i32 = arith.constant 0 : i32
    %c0_i32_0 = arith.constant 0 : i32
    %c0_i32_1 = arith.constant 0 : i32
    return %c0_i32, %c0_i32_0 : i32, i32
  }
  func.func @transform_5(%arg0: i32, %arg1: i32) -> (i32, i32) {
    %c0_i32 = arith.constant 0 : i32
    %c0_i32_0 = arith.constant 0 : i32
    %c0_i32_1 = arith.constant 0 : i32
    return %c0_i32, %c0_i32_0 : i32, i32
  }
  func.func @transform_6(%arg0: i32, %arg1: i32) -> (i32, i32, i32, i32) {
    %c0_i32 = arith.constant 0 : i32
    %c0_i32_0 = arith.constant 0 : i32
    %c0_i32_1 = arith.constant 0 : i32
    return %arg0, %arg1, %c0_i32, %c0_i32_0 : i32, i32, i32, i32
  }
}

</mosaic_0001>

<bundles_post_ra>
// kernel: tpu_custom_call.1
= control target key start
LH: loop header
LB: loop body
LE: loop exit
PB: predicated region body
PF: predicated region fallthrough
CT: control target
= control target key end

     0   :  { %s10633_s21 = smov 0   ;;  %s10635_s22 = smov 0   ;;  %s14191_s0 = inlined_call_operand.vmem [shape: f32[2,16,16,4], index: 0, kind: input, shape index: {}]   ;;  %s14192_s1 = inlined_call_operand.vmem [shape: bf16[9,4,4], index: 1, kind: input, shape index: {}]   ;;  %s14193_s2 = inlined_call_operand.vmem [shape: f32[1,4], index: 2, kind: input, shape index: {}]   ;;  %s14194_s3 = inlined_call_operand.vmem [shape: bf16[9,4,4], index: 3, kind: input, shape index: {}]   ;;  %s14195_s4 = inlined_call_operand.vmem [shape: f32[1,4], index: 4, kind: input, shape index: {}]   ;;  %s14196_s5 = inlined_call_operand.vmem [shape: f32[180,1], index: 5, kind: input, shape index: {}]   ;;  %s14197_s6 = inlined_call_operand.vmem [shape: f32[2,16,16,4], index: 6, kind: output, shape index: {}]  }
   0x1   :  { %s10637_s23 = smov 0   ;;  %s10639_s24 = smov 0  }
   0x2   :  { %s10641_s25 = smov 0  }
   0x3 LB: > { %s25_s26 = sadd.s32 1, %s10581_s23  ;;  %s28_s27 = sadd.s32 1, %s10585_s24  ;;  %s10589_s25 = sphi %s10641_s25, %s16_s25   ;;  %s10585_s24 = sphi %s10639_s24, %s14546_s24   ;;  %s10581_s23 = sphi %s10637_s23, %s14545_s23   ;;  %s10577_s22 = sphi %s10635_s22, %s14544_s22   ;;  %s10573_s21 = sphi %s10633_s21, %s14543_s21  }
   0x4   : > { %p26_p0 = scmp.ge.s32.totalorder %s25_s26, 2  ;;  %p9080_p1 = scmp.ge.s32.totalorder %s10589_s25, 1 }
   0x5   : > { %p226_p2 = scmp.lt.s32.totalorder %s10589_s25, 5 }
   0x6   : > { %s14548_s26 = smov (%p26_p0, %s25_s26), 0  ;;  %s14550_s27 = smov (!%p26_p0, %s28_s27), %s10585_s24 }
   0x7   : > { %p227_p3 = pnand %p9080_p1, %p226_p2  ;;  %p30_p4 = scmp.ge.s32.totalorder %s14550_s27, 2 }
   0x9   : > { %s14552_s27 = smov (%p30_p4, %s14550_s27), 0  ;;  %230 = sbr.rel (%p227_p3) target bundleno = 1564 (0x61c), region = 44 }
  0x10   : > { %p261_p5 = scmp.lt.s32.totalorder %s10577_s22, 1  ;;  %s9083_s28 = sshll.u32 %s10573_s21, 3  ;;  %vm278_vm0 = vcmask 27648   ;;  %vm281_vm1 = vcmask 24576   ;;  %v10591_v0 = vmov 0  }
  0x11   : > { %p10671_p6 = scmp.lt.s32.totalorder %s9083_s28, 15  ;;  %279 = vst.msk [vmem:[#allocation2] sm:$0xf] %vm278_vm0, %v10591_v0  ;;  %280 = vst.msk [vmem:[#allocation2 + $0x4] sm:$0xf] %vm278_vm0, %v10591_v0  ;;  %p9087_p7 = scmp.ne.s32.totalorder %s10573_s21, 0 }
  0x12   : > { %283 = vst.msk [vmem:[#allocation2 + $0xc] sm:$0xf] %vm278_vm0, %v10591_v0  ;;  %284 = vst.msk [vmem:[#allocation2 + $0x10] sm:$0xf] %vm278_vm0, %v10591_v0  ;;  %s14554_s22 = smov (!%p261_p5, %s10577_s22), 1 }
  0x13   : > { %286 = vst.msk [vmem:[#allocation2 + $0x18] sm:$0xf] %vm278_vm0, %v10591_v0  ;;  %287 = vst.msk [vmem:[#allocation2 + $0x1c] sm:$0xf] %vm278_vm0, %v10591_v0  ;;  %s14556_s28 = smov (!%p10671_p6, %s9083_s28), 15  ;;  %s9460_s30 = sshll.u32 %s14554_s22, 8 }
  0x14   : > { %289 = vst.msk [vmem:[#allocation2 + $0x24] sm:$0xf] %vm278_vm0, %v10591_v0  ;;  %290 = vst.msk [vmem:[#allocation2 + $0x28] sm:$0xf] %vm278_vm0, %v10591_v0  ;;  %s9085_s7 = sshll.u32 %s14554_s22, 5  ;;  %s10759_s10 = scalar_lea.vmem %s14191_s0, %s9460_s30 }
  0x15   : > { %292 = vst.msk [vmem:[#allocation2 + $0x30] sm:$0xf] %vm278_vm0, %v10591_v0  ;;  %293 = vst.msk [vmem:[#allocation2 + $0x34] sm:$0xf] %vm278_vm0, %v10591_v0  ;;  %s9084_s11 = sshll.u32 %s14556_s28, 1  ;;  %v323_v1 = vld [vmem:[%s10759_s10] sm:$0xff] (!%p9087_p7) }
  0x16   : > { %295 = vst.msk [vmem:[#allocation2 + $0x3c] sm:$0xf] %vm278_vm0, %v10591_v0  ;;  %296 = vst.msk [vmem:[#allocation2 + $0x40] sm:$0xf] %vm278_vm0, %v10591_v0  ;;  %s273_s12 = sadd.s32 %s9085_s7, %s9084_s11  ;;  %v324_v2 = vld [vmem:[%s10759_s10 + $0x8] sm:$0xff] (!%p9087_p7)  ;;  %v9461_v3 = vpack.c.bf16 (!%p9087_p7), %v323_v1, %v323_v1  ;;  %v325_v5 = vld [vmem:[%s10759_s10 + $0x10] sm:$0xff] (!%p9087_p7) }
  0x17   : > { %298 = vst.msk [vmem:[#allocation2 + $0x48] sm:$0xf] %vm278_vm0, %v10591_v0  ;;  %299 = vst.msk [vmem:[#allocation2 + $0x4c] sm:$0xf] %vm278_vm0, %v10591_v0  ;;  %s9086_s13 = sshll.u32 %s273_s12, 3  ;;  %v9462_v4 = vpack.c.bf16 (!%p9087_p7), %v324_v2, %v324_v2  ;;  %v326_v10 = vld [vmem:[%s10759_s10 + $0x18] sm:$0xff] (!%p9087_p7)  ;;  %v9463_v13 = vpack.c.bf16 (!%p9087_p7), %v325_v5, %v325_v5 }
  0x18   : > { %301 = vst.msk [vmem:[#allocation2 + $0x54] sm:$0xf] %vm278_vm0, %v10591_v0  ;;  %302 = vst.msk [vmem:[#allocation2 + $0x58] sm:$0xf] %vm278_vm0, %v10591_v0  ;;  %s10764_s16 = scalar_lea.vmem %s14197_s6, %s9086_s13  ;;  %vm608_vm2 = vsmask.f32 (!%p9087_p7), 7938  ;;  %v9464_v14 = vpack.c.bf16 (!%p9087_p7), %v326_v10, %v326_v10 }
  0x19   : > { %304 = vst.msk [vmem:[#allocation2 + $0x60] sm:$0xf] %vm278_vm0, %v10591_v0  ;;  %305 = vst.msk [vmem:[#allocation2 + $0x64] sm:$0xf] %vm278_vm0, %v10591_v0  ;;  %vm403_vm3 = vsmask.f32 (!%p9087_p7), 256 }
  0x1a   : > { %307 = vst.msk [vmem:[#allocation2 + $0x6c] sm:$0xf] %vm278_vm0, %v10591_v0  ;;  %308 = vst.msk [vmem:[#allocation2 + $0x70] sm:$0xf] %vm278_vm0, %v10591_v0  ;;  %vm404_vm4 = vsmask.f32 (!%p9087_p7), 4368 }
  0x1b   : > { %310 = vst.msk [vmem:[#allocation2 + $0x78] sm:$0xf] %vm278_vm0, %v10591_v0  ;;  %311 = vst.msk [vmem:[#allocation2 + $0x7c] sm:$0xf] %vm278_vm0, %v10591_v0  ;;  %v407_v6 = vshrl.u32 (!%p9087_p7), %v9461_v3, 16  ;;  %v410_v7 = vshll.u32 (!%p9087_p7), %v9461_v3, 16 }
  0x1c   : > { %313 = vst.msk [vmem:[#allocation2 + $0x84] sm:$0xf] %vm278_vm0, %v10591_v0  ;;  %314 = vst.msk [vmem:[#allocation2 + $0x88] sm:$0xf] %vm278_vm0, %v10591_v0  ;;  %v415_v8 = vshrl.u32 (!%p9087_p7), %v9462_v4, 16  ;;  %v418_v9 = vshll.u32 (!%p9087_p7), %v9462_v4, 16 }
  0x1d   : > { %316 = vst.msk [vmem:[#allocation2 + $0x90] sm:$0xf] %vm278_vm0, %v10591_v0  ;;  %322 = sbr.rel (%p9087_p7) target bundleno = 72 (0x48), region = 48  ;;  %v327_v11 = vld [vmem:[%s10759_s10 + $0x20] sm:$0xff] (!%p9087_p7)  ;;  %vm10775_vm5 = vmand (!%p9087_p7), %vm278_vm0, %vm608_vm2  ;;  %v328_v16 = vld [vmem:[%s10759_s10 + $0x28] sm:$0xff] (!%p9087_p7)  ;;  %v409_v17 = vrot.slane (!%p9087_p7), %v407_v6, 7 }
  0x1e   : > { %282 = vst.msk [vmem:[#allocation2 + $0x8] sm:$0x1] %vm281_vm1, %v10591_v0  ;;  %285 = vst.msk [vmem:[#allocation2 + $0x14] sm:$0x1] %vm281_vm1, %v10591_v0  ;;  %v9465_v15 = vpack.c.bf16 (!%p9087_p7), %v327_v11, %v327_v11  ;;  %v610_v18 = vld [vmem:[#allocation2 + $0x18] sm:$0xf] (!%p9087_p7)  ;;  %v9466_v21 = vpack.c.bf16 (!%p9087_p7), %v328_v16, %v328_v16 }
  0x1f   : > { %288 = vst.msk [vmem:[#allocation2 + $0x20] sm:$0x1] %vm281_vm1, %v10591_v0  ;;  %291 = vst.msk [vmem:[#allocation2 + $0x2c] sm:$0x1] %vm281_vm1, %v10591_v0  ;;  %v417_v20 = vrot.slane (!%p9087_p7), %v415_v8, 7  ;;  %v424_v24 = vshrl.u32 (!%p9087_p7), %v9463_v13, 16  ;;  %v412_v28 = vor.u32 (!%p9087_p7), %v410_v7, %v409_v17 }
  0x20   : > { %294 = vst.msk [vmem:[#allocation2 + $0x38] sm:$0x1] %vm281_vm1, %v10591_v0  ;;  %297 = vst.msk [vmem:[#allocation2 + $0x44] sm:$0x1] %vm281_vm1, %v10591_v0  ;;  %v427_v25 = vshll.u32 (!%p9087_p7), %v9463_v13, 16  ;;  %v432_v26 = vshrl.u32 (!%p9087_p7), %v9464_v14, 16 }
  0x21   : > { %300 = vst.msk [vmem:[#allocation2 + $0x50] sm:$0x1] %vm281_vm1, %v10591_v0  ;;  %303 = vst.msk [vmem:[#allocation2 + $0x5c] sm:$0x1] %vm281_vm1, %v10591_v0  ;;  %v435_v27 = vshll.u32 (!%p9087_p7), %v9464_v14, 16  ;;  %v413_v29 = vrot.slane (!%p9087_p7), %v409_v17, 4  ;;  %v420_v30 = vor.u32 (!%p9087_p7), %v418_v9, %v417_v20  ;;  %v611_v37 = vsel (!%p9087_p7), %vm10775_vm5, %v412_v28, %v610_v18 }
  0x22   : > { %306 = vst.msk [vmem:[#allocation2 + $0x68] sm:$0x1] %vm281_vm1, %v10591_v0  ;;  %309 = vst.msk [vmem:[#allocation2 + $0x74] sm:$0x1] %vm281_vm1, %v10591_v0  ;;  %v422_v31 = vrot.slane (!%p9087_p7), %v417_v20, 4  ;;  %v426_v32 = vrot.slane (!%p9087_p7), %v424_v24, 7 }
  0x23   : > { %312 = vst.msk [vmem:[#allocation2 + $0x80] sm:$0x1] %vm281_vm1, %v10591_v0  ;;  %315 = vst.msk [vmem:[#allocation2 + $0x8c] sm:$0x1] %vm281_vm1, %v10591_v0  ;;  %v434_v33 = vrot.slane (!%p9087_p7), %v432_v26, 7  ;;  %v441_v34 = vshrl.u32 (!%p9087_p7), %v9465_v15, 16 }
  0x24   : > { %vm10782_vm6 = vmor %vm403_vm3, %vm404_vm4  ;;  %v444_v35 = vshll.u32 %v9465_v15, 16  ;;  %v329_v36 = vld [vmem:[%s10759_s10 + $0x30] sm:$0xff]  ;;  %v619_v40 = vld [vmem:[#allocation2 + $0x24] sm:$0xf]  ;;  %v449_v42 = vshrl.u32 %v9466_v21, 16  ;;  %v429_v44 = vor.u32 %v427_v25, %v426_v32  ;;  %v430_v45 = vrot.slane %v426_v32, 4 }
  0x25   : > { %vm10788_vm7 = vmand %vm281_vm1, %vm403_vm3  ;;  %v421_v38 = vsel %vm10782_vm6, %v413_v29, %v420_v30  ;;  %v330_v43 = vld [vmem:[%s10759_s10 + $0x38] sm:$0xff]  ;;  %612 = vst [vmem:[#allocation2 + $0x18] sm:$0xf] %v611_v37  ;;  %v437_v46 = vor.u32 %v435_v27, %v434_v33  ;;  %v439_v47 = vrot.slane %v434_v33, 4  ;;  %v443_v48 = vrot.slane %v441_v34, 7  ;;  %v331_v58 = vld [vmem:[%s10759_s10 + $0x40] sm:$0xff] }
  0x26   : > { %v616_v23 = vld [vmem:[#allocation2 + $0x20] sm:$0x1]  ;;  %v623_v41 = vld [vmem:[#allocation2 + $0x2c] sm:$0x1]  ;;  %613 = vst.msk [vmem:[#allocation2 + $0x1c] sm:$0xf] %vm278_vm0, %v421_v38  ;;  %v9467_v51 = vpack.c.bf16 %v329_v36, %v329_v36  ;;  %v620_v52 = vsel %vm10775_vm5, %v429_v44, %v619_v40  ;;  %v9468_v57 = vpack.c.bf16 %v330_v43, %v330_v43  ;;  %v9469_v11 = vpack.c.bf16 %v331_v58, %v331_v58 }
  0x27   : > { %v617_v39 = vsel %vm10788_vm7, %v422_v31, %v616_v23  ;;  %v451_v49 = vrot.slane %v449_v42, 7  ;;  %v452_v50 = vshll.u32 %v9466_v21, 16  ;;  %v438_v53 = vsel %vm10782_vm6, %v430_v45, %v437_v46  ;;  %v626_v55 = vld [vmem:[#allocation2 + $0x30] sm:$0xf]  ;;  %v630_v56 = vld [vmem:[#allocation2 + $0x38] sm:$0x1] }
  0x28   : > { %618 = vst [vmem:[#allocation2 + $0x20] sm:$0x1] %v617_v39  ;;  %v624_v54 = vsel %vm10788_vm7, %v439_v47, %v623_v41  ;;  %621 = vst [vmem:[#allocation2 + $0x24] sm:$0xf] %v620_v52  ;;  %v446_v59 = vor.u32 %v444_v35, %v443_v48  ;;  %v447_v60 = vrot.slane %v443_v48, 4  ;;  %v332_v63 = vld [vmem:[%s10759_s10 + $0x48] sm:$0xff] }
  0x29   : > { %622 = vst.msk [vmem:[#allocation2 + $0x28] sm:$0xf] %vm278_vm0, %v438_v53  ;;  %625 = vst [vmem:[#allocation2 + $0x2c] sm:$0x1] %v624_v54  ;;  %v454_v61 = vor.u32 %v452_v50, %v451_v49  ;;  %v456_v62 = vrot.slane %v451_v49, 4  ;;  %v333_v1 = vld [vmem:[%s10759_s10 + $0x50] sm:$0xff]  ;;  %v9470_v15 = vpack.c.bf16 %v332_v63, %v332_v63 }
  0x2a   : > { %v458_v2 = vshrl.u32 %v9467_v51, 16  ;;  %v461_v3 = vshll.u32 %v9467_v51, 16  ;;  %v466_v4 = vshrl.u32 %v9468_v57, 16  ;;  %v469_v5 = vshll.u32 %v9468_v57, 16  ;;  %v334_v6 = vld [vmem:[%s10759_s10 + $0x58] sm:$0xff]  ;;  %v335_v7 = vld [vmem:[%s10759_s10 + $0x60] sm:$0xff] }
  0x2b   : > { %v627_v8 = vsel %vm10775_vm5, %v446_v59, %v626_v55  ;;  %v455_v9 = vsel %vm10782_vm6, %v447_v60, %v454_v61  ;;  %v631_v10 = vsel %vm10788_vm7, %v456_v62, %v630_v56  ;;  %v9471_v16 = vpack.c.bf16 %v333_v1, %v333_v1  ;;  %v633_v17 = vld [vmem:[#allocation2 + $0x3c] sm:$0xf]  ;;  %v637_v18 = vld [vmem:[#allocation2 + $0x44] sm:$0x1]  ;;  %v640_v36 = vld [vmem:[#allocation2 + $0x48] sm:$0xf] }
  0x2c   : > { %628 = vst [vmem:[#allocation2 + $0x30] sm:$0xf] %v627_v8  ;;  %629 = vst.msk [vmem:[#allocation2 + $0x34] sm:$0xf] %vm278_vm0, %v455_v9  ;;  %v460_v13 = vrot.slane %v458_v2, 7  ;;  %v468_v14 = vrot.slane %v466_v4, 7  ;;  %v9472_v23 = vpack.c.bf16 %v334_v6, %v334_v6  ;;  %v9473_v24 = vpack.c.bf16 %v335_v7, %v335_v7 }
  0x2d   : > { %632 = vst [vmem:[#allocation2 + $0x38] sm:$0x1] %v631_v10  ;;  %v475_v20 = vshrl.u32 %v9469_v11, 16  ;;  %v478_v21 = vshll.u32 %v9469_v11, 16  ;;  %v483_v30 = vshrl.u32 %v9470_v15, 16  ;;  %v486_v31 = vshll.u32 %v9470_v15, 16 }
  0x2e   : > { %v463_v25 = vor.u32 %v461_v3, %v460_v13  ;;  %v464_v26 = vrot.slane %v460_v13, 4  ;;  %v471_v27 = vor.u32 %v469_v5, %v468_v14  ;;  %v473_v28 = vrot.slane %v468_v14, 4  ;;  %v644_v37 = vld [vmem:[#allocation2 + $0x50] sm:$0x1]  ;;  %v647_v43 = vld [vmem:[#allocation2 + $0x54] sm:$0xf] }
  0x2f   : > { %v477_v29 = vrot.slane %v475_v20, 7  ;;  %v492_v32 = vshrl.u32 %v9471_v16, 16  ;;  %v495_v38 = vshll.u32 %v9471_v16, 16  ;;  %v485_v41 = vrot.slane %v483_v30, 7  ;;  %v336_v44 = vld [vmem:[%s10759_s10 + $0x68] sm:$0xff]  ;;  %v337_v49 = vld [vmem:[%s10759_s10 + $0x70] sm:$0xff] }
  0x30   : > { %v634_v33 = vsel %vm10775_vm5, %v463_v25, %v633_v17  ;;  %v472_v34 = vsel %vm10782_vm6, %v464_v26, %v471_v27  ;;  %v638_v35 = vsel %vm10788_vm7, %v473_v28, %v637_v18  ;;  %v500_v45 = vshrl.u32 %v9472_v23, 16  ;;  %v651_v61 = vld [vmem:[#allocation2 + $0x5c] sm:$0x1]  ;;  %v654_v62 = vld [vmem:[#allocation2 + $0x60] sm:$0xf]  ;;  %v340_v7 = vld [vmem:[%s10759_s10 + $0x88] sm:$0xff] }
  0x31   : > { %635 = vst [vmem:[#allocation2 + $0x3c] sm:$0xf] %v634_v33  ;;  %636 = vst.msk [vmem:[#allocation2 + $0x40] sm:$0xf] %vm278_vm0, %v472_v34  ;;  %v480_v39 = vor.u32 %v478_v21, %v477_v29  ;;  %v481_v40 = vrot.slane %v477_v29, 4  ;;  %v494_v42 = vrot.slane %v492_v32, 7  ;;  %v488_v51 = vor.u32 %v486_v31, %v485_v41 }
  0x32   : > { %639 = vst [vmem:[#allocation2 + $0x44] sm:$0x1] %v638_v35  ;;  %v503_v46 = vshll.u32 %v9472_v23, 16  ;;  %v509_v47 = vshrl.u32 %v9473_v24, 16  ;;  %v512_v48 = vshll.u32 %v9473_v24, 16  ;;  %v490_v52 = vrot.slane %v485_v41, 4 }
  0x33   : > { %v641_v50 = vsel %vm10775_vm5, %v480_v39, %v640_v36  ;;  %v497_v53 = vor.u32 %v495_v38, %v494_v42  ;;  %v498_v54 = vrot.slane %v494_v42, 4  ;;  %v502_v55 = vrot.slane %v500_v45, 7  ;;  %v338_v1 = vld [vmem:[%s10759_s10 + $0x78] sm:$0xff]  ;;  %v339_v6 = vld [vmem:[%s10759_s10 + $0x80] sm:$0xff]  ;;  %v341_v13 = vld [vmem:[%s10759_s10 + $0x90] sm:$0xff] }
  0x34   : > { %642 = vst [vmem:[#allocation2 + $0x48] sm:$0xf] %v641_v50  ;;  %v511_v56 = vrot.slane %v509_v47, 7  ;;  %v9474_v57 = vpack.c.bf16 %v336_v44, %v336_v44  ;;  %v489_v58 = vsel %vm10782_vm6, %v481_v40, %v488_v51  ;;  %v645_v59 = vsel %vm10788_vm7, %v490_v52, %v644_v37  ;;  %v342_v14 = vld [vmem:[%s10759_s10 + $0x98] sm:$0xff]  ;;  %v658_v25 = vld [vmem:[#allocation2 + $0x68] sm:$0x1] }
  0x35   : > { %v648_v60 = vsel %vm10775_vm5, %v497_v53, %v647_v43  ;;  %v9475_v63 = vpack.c.bf16 %v337_v49, %v337_v49  ;;  %643 = vst.msk [vmem:[#allocation2 + $0x4c] sm:$0xf] %vm278_vm0, %v489_v58  ;;  %646 = vst [vmem:[#allocation2 + $0x50] sm:$0x1] %v645_v59  ;;  %v505_v2 = vor.u32 %v503_v46, %v502_v55  ;;  %v507_v3 = vrot.slane %v502_v55, 4 }
  0x36   : > { %649 = vst [vmem:[#allocation2 + $0x54] sm:$0xf] %v648_v60  ;;  %v514_v4 = vor.u32 %v512_v48, %v511_v56  ;;  %v515_v5 = vrot.slane %v511_v56, 4  ;;  %v517_v8 = vshrl.u32 %v9474_v57, 16  ;;  %v520_v9 = vshll.u32 %v9474_v57, 16 }
  0x37   : > { %v526_v10 = vshrl.u32 %v9475_v63, 16  ;;  %v529_v11 = vshll.u32 %v9475_v63, 16  ;;  %v506_v15 = vsel %vm10782_vm6, %v498_v54, %v505_v2  ;;  %v652_v16 = vsel %vm10788_vm7, %v507_v3, %v651_v61  ;;  %v661_v26 = vld [vmem:[#allocation2 + $0x6c] sm:$0xf]  ;;  %v665_v42 = vld [vmem:[#allocation2 + $0x74] sm:$0x1] }
  0x38   : > { %v655_v17 = vsel %vm10775_vm5, %v514_v4, %v654_v62  ;;  %v9476_v18 = vpack.c.bf16 %v338_v1, %v338_v1  ;;  %650 = vst.msk [vmem:[#allocation2 + $0x58] sm:$0xf] %vm278_vm0, %v506_v15  ;;  %653 = vst [vmem:[#allocation2 + $0x5c] sm:$0x1] %v652_v16  ;;  %v519_v20 = vrot.slane %v517_v8, 7  ;;  %v9477_v23 = vpack.c.bf16 %v339_v6, %v339_v6 }
  0x39   : > { %656 = vst [vmem:[#allocation2 + $0x60] sm:$0xf] %v655_v17  ;;  %v528_v21 = vrot.slane %v526_v10, 7  ;;  %v9478_v24 = vpack.c.bf16 %v340_v7, %v340_v7  ;;  %v9479_v29 = vpack.c.bf16 %v341_v13, %v341_v13  ;;  %v9480_v30 = vpack.c.bf16 %v342_v14, %v342_v14  ;;  %v668_v48 = vld [vmem:[#allocation2 + $0x78] sm:$0xf] }
  0x3a   : > { %v534_v27 = vshrl.u32 %v9476_v18, 16  ;;  %v537_v28 = vshll.u32 %v9476_v18, 16  ;;  %v522_v31 = vor.u32 %v520_v9, %v519_v20  ;;  %v524_v32 = vrot.slane %v519_v20, 4  ;;  %v672_v57 = vld [vmem:[#allocation2 + $0x80] sm:$0x1] }
  0x3b   : > { %v531_v33 = vor.u32 %v529_v11, %v528_v21  ;;  %v532_v34 = vrot.slane %v528_v21, 4  ;;  %v543_v36 = vshrl.u32 %v9477_v23, 16  ;;  %v546_v37 = vshll.u32 %v9477_v23, 16  ;;  %v675_v63 = vld [vmem:[#allocation2 + $0x84] sm:$0xf] }
  0x3c   : > { %v536_v35 = vrot.slane %v534_v27, 7  ;;  %v551_v38 = vshrl.u32 %v9478_v24, 16  ;;  %v523_v39 = vsel %vm10782_vm6, %v515_v5, %v522_v31  ;;  %v659_v40 = vsel %vm10788_vm7, %v524_v32, %v658_v25  ;;  %v679_v5 = vld [vmem:[#allocation2 + $0x8c] sm:$0x1] }
  0x3d   : > { %v662_v41 = vsel %vm10775_vm5, %v531_v33, %v661_v26  ;;  %v554_v43 = vshll.u32 %v9478_v24, 16  ;;  %657 = vst.msk [vmem:[#allocation2 + $0x64] sm:$0xf] %vm278_vm0, %v523_v39  ;;  %660 = vst [vmem:[#allocation2 + $0x68] sm:$0x1] %v659_v40  ;;  %v545_v46 = vrot.slane %v543_v36, 7 }
  0x3e   : > { %663 = vst [vmem:[#allocation2 + $0x6c] sm:$0xf] %v662_v41  ;;  %v539_v44 = vor.u32 %v537_v28, %v536_v35  ;;  %v541_v45 = vrot.slane %v536_v35, 4  ;;  %v553_v47 = vrot.slane %v551_v38, 7  ;;  %v560_v49 = vshrl.u32 %v9479_v29, 16 }
  0x3f   : > { %v563_v50 = vshll.u32 %v9479_v29, 16  ;;  %v568_v51 = vshrl.u32 %v9480_v30, 16  ;;  %v571_v52 = vshll.u32 %v9480_v30, 16  ;;  %v548_v55 = vor.u32 %v546_v37, %v545_v46 }
  0x40   : > { %v540_v53 = vsel %vm10782_vm6, %v532_v34, %v539_v44  ;;  %v666_v54 = vsel %vm10788_vm7, %v541_v45, %v665_v42  ;;  %v549_v56 = vrot.slane %v545_v46, 4  ;;  %v556_v58 = vor.u32 %v554_v43, %v553_v47 }
  0x41   : > { %664 = vst.msk [vmem:[#allocation2 + $0x70] sm:$0xf] %vm278_vm0, %v540_v53  ;;  %667 = vst [vmem:[#allocation2 + $0x74] sm:$0x1] %v666_v54  ;;  %v558_v59 = vrot.slane %v553_v47, 4  ;;  %v562_v60 = vrot.slane %v560_v49, 7  ;;  %v669_v62 = vsel %vm10775_vm5, %v548_v55, %v668_v48 }
  0x42   : > { %v570_v61 = vrot.slane %v568_v51, 7  ;;  %670 = vst [vmem:[#allocation2 + $0x78] sm:$0xf] %v669_v62  ;;  %v557_v1 = vsel %vm10782_vm6, %v549_v56, %v556_v58 }
  0x43   : > { %v673_v2 = vsel %vm10788_vm7, %v558_v59, %v672_v57  ;;  %v565_v3 = vor.u32 %v563_v50, %v562_v60  ;;  %v566_v4 = vrot.slane %v562_v60, 4  ;;  %671 = vst.msk [vmem:[#allocation2 + $0x7c] sm:$0xf] %vm278_vm0, %v557_v1 }
  0x44   : > { %674 = vst [vmem:[#allocation2 + $0x80] sm:$0x1] %v673_v2  ;;  %v573_v6 = vor.u32 %v571_v52, %v570_v61  ;;  %v575_v7 = vrot.slane %v570_v61, 4 }
  0x45   : > { %v676_v8 = vsel %vm10775_vm5, %v565_v3, %v675_v63 }
  0x46   : > { %677 = vst [vmem:[#allocation2 + $0x84] sm:$0xf] %v676_v8  ;;  %v574_v9 = vsel %vm10782_vm6, %v566_v4, %v573_v6  ;;  %v680_v10 = vsel %vm10788_vm7, %v575_v7, %v679_v5 }
  0x47   : > { %678 = vst.msk [vmem:[#allocation2 + $0x88] sm:$0xf] %vm278_vm0, %v574_v9  ;;  %681 = vst [vmem:[#allocation2 + $0x8c] sm:$0x1] %v680_v10 }
  0x48 PF: > { %p9108_p8 = scmp.ne.s32.totalorder %s10573_s21, 1 }
  0x49   : > { %v9109_v12 = vld [vmem:[%s10759_s10 + $0x60] sm:$0xff] (!%p9108_p8)  ;;  %v9110_v19 = vld [vmem:[%s10759_s10 + $0x68] sm:$0xff] (!%p9108_p8)  ;;  %vm971_vm8 = vsmask.f32 (!%p9108_p8), 7938  ;;  %vm767_vm9 = vsmask.f32 (!%p9108_p8), 256 }
  0x4a   : > { %685 = sbr.rel (%p9108_p8) target bundleno = 117 (0x75), region = 52  ;;  %v9481_v11 = vpack.c.bf16 (!%p9108_p8), %v9109_v12, %v9109_v12  ;;  %v9482_v22 = vpack.c.bf16 (!%p9108_p8), %v9110_v19, %v9110_v19  ;;  %vm768_vm10 = vsmask.f32 (!%p9108_p8), 4368  ;;  %v9111_v13 = vld [vmem:[%s10759_s10 + $0x70] sm:$0xff] (!%p9108_p8)  ;;  %v9112_v18 = vld [vmem:[%s10759_s10 + $0x78] sm:$0xff] (!%p9108_p8)  ;;  %v9113_v20 = vld [vmem:[%s10759_s10 + $0x80] sm:$0xff] (!%p9108_p8) }
  0x4b   : > { %vm10885_vm11 = vmand (!%p9108_p8), %vm278_vm0, %vm971_vm8  ;;  %v9483_v23 = vpack.c.bf16 (!%p9108_p8), %v9111_v13, %v9111_v13  ;;  %v9484_v24 = vpack.c.bf16 (!%p9108_p8), %v9112_v18, %v9112_v18  ;;  %v9485_v25 = vpack.c.bf16 (!%p9108_p8), %v9113_v20, %v9113_v20  ;;  %v9114_v26 = vld [vmem:[%s10759_s10 + $0x88] sm:$0xff] (!%p9108_p8)  ;;  %v973_v28 = vld [vmem:[#allocation2] sm:$0xf] (!%p9108_p8) }
  0x4c   : > { %v771_v14 = vshrl.u32 (!%p9108_p8), %v9481_v11, 16  ;;  %v774_v15 = vshll.u32 (!%p9108_p8), %v9481_v11, 16  ;;  %v779_v16 = vshrl.u32 (!%p9108_p8), %v9482_v22, 16  ;;  %v782_v17 = vshll.u32 (!%p9108_p8), %v9482_v22, 16  ;;  %vm10892_vm12 = vmor (!%p9108_p8), %vm767_vm9, %vm768_vm10  ;;  %v979_v33 = vld [vmem:[#allocation2 + $0x8] sm:$0x1] (!%p9108_p8) }
  0x4d   : > { %v9486_v31 = vpack.c.bf16 (!%p9108_p8), %v9114_v26, %v9114_v26  ;;  %vm10898_vm13 = vmand (!%p9108_p8), %vm281_vm1, %vm767_vm9  ;;  %v788_v34 = vshrl.u32 (!%p9108_p8), %v9483_v23, 16  ;;  %v791_v35 = vshll.u32 (!%p9108_p8), %v9483_v23, 16  ;;  %v796_v36 = vshrl.u32 (!%p9108_p8), %v9484_v24, 16  ;;  %v9115_v46 = vld [vmem:[%s10759_s10 + $0x90] sm:$0xff] (!%p9108_p8)  ;;  %v982_v50 = vld [vmem:[#allocation2 + $0xc] sm:$0xf] (!%p9108_p8) }
  0x4e   : > { %v773_v27 = vrot.slane (!%p9108_p8), %v771_v14, 7  ;;  %v781_v30 = vrot.slane (!%p9108_p8), %v779_v16, 7  ;;  %v799_v37 = vshll.u32 (!%p9108_p8), %v9484_v24, 16  ;;  %v805_v44 = vshrl.u32 (!%p9108_p8), %v9485_v25, 16  ;;  %v986_v51 = vld [vmem:[#allocation2 + $0x14] sm:$0x1] (!%p9108_p8) }
  0x4f   : > { %v790_v42 = vrot.slane (!%p9108_p8), %v788_v34, 7  ;;  %v798_v43 = vrot.slane (!%p9108_p8), %v796_v36, 7  ;;  %v808_v45 = vshll.u32 (!%p9108_p8), %v9485_v25, 16  ;;  %v813_v52 = vshrl.u32 (!%p9108_p8), %v9486_v31, 16  ;;  %v9116_v53 = vld [vmem:[%s10759_s10 + $0x98] sm:$0xff] (!%p9108_p8)  ;;  %v9117_v5 = vld [vmem:[%s10759_s10 + $0xa0] sm:$0xff] (!%p9108_p8) }
  0x50   : > { %v776_v38 = vor.u32 (!%p9108_p8), %v774_v15, %v773_v27  ;;  %v777_v39 = vrot.slane (!%p9108_p8), %v773_v27, 4  ;;  %v784_v40 = vor.u32 (!%p9108_p8), %v782_v17, %v781_v30  ;;  %v786_v41 = vrot.slane (!%p9108_p8), %v781_v30, 4  ;;  %v989_v2 = vld [vmem:[#allocation2 + $0x18] sm:$0xf] (!%p9108_p8)  ;;  %v993_v3 = vld [vmem:[#allocation2 + $0x20] sm:$0x1] (!%p9108_p8) }
  0x51   : > { %v793_v54 = vor.u32 %v791_v35, %v790_v42  ;;  %v794_v55 = vrot.slane %v790_v42, 4  ;;  %v801_v56 = vor.u32 %v799_v37, %v798_v43  ;;  %v803_v57 = vrot.slane %v798_v43, 4  ;;  %v9118_v10 = vld [vmem:[%s10759_s10 + $0xa8] sm:$0xff]  ;;  %v9119_v12 = vld [vmem:[%s10759_s10 + $0xb0] sm:$0xff]  ;;  %v9120_v14 = vld [vmem:[%s10759_s10 + $0xb8] sm:$0xff] }
  0x52   : > { %v974_v47 = vsel %vm10885_vm11, %v776_v38, %v973_v28  ;;  %v785_v48 = vsel %vm10892_vm12, %v777_v39, %v784_v40  ;;  %v980_v49 = vsel %vm10898_vm13, %v786_v41, %v979_v33  ;;  %v807_v58 = vrot.slane %v805_v44, 7  ;;  %v9121_v15 = vld [vmem:[%s10759_s10 + $0xc0] sm:$0xff]  ;;  %v1000_v28 = vld [vmem:[#allocation2 + $0x2c] sm:$0x1] }
  0x53   : > { %975 = vst [vmem:[#allocation2] sm:$0xf] %v974_v47  ;;  %976 = vst.msk [vmem:[#allocation2 + $0x4] sm:$0xf] %vm278_vm0, %v785_v48  ;;  %v815_v59 = vrot.slane %v813_v52, 7  ;;  %v816_v60 = vshll.u32 %v9486_v31, 16  ;;  %v9487_v61 = vpack.c.bf16 %v9115_v46, %v9115_v46  ;;  %v983_v62 = vsel %vm10885_vm11, %v793_v54, %v982_v50 }
  0x54   : > { %981 = vst [vmem:[#allocation2 + $0x8] sm:$0x1] %v980_v49  ;;  %v802_v63 = vsel %vm10892_vm12, %v794_v55, %v801_v56  ;;  %v987_v1 = vsel %vm10898_vm13, %v803_v57, %v986_v51  ;;  %v9488_v4 = vpack.c.bf16 %v9116_v53, %v9116_v53  ;;  %984 = vst [vmem:[#allocation2 + $0xc] sm:$0xf] %v983_v62  ;;  %v811_v7 = vrot.slane %v807_v58, 4  ;;  %v9122_v54 = vld [vmem:[%s10759_s10 + $0xc8] sm:$0xff] }
  0x55   : > { %985 = vst.msk [vmem:[#allocation2 + $0x10] sm:$0xf] %vm278_vm0, %v802_v63  ;;  %988 = vst [vmem:[#allocation2 + $0x14] sm:$0x1] %v987_v1  ;;  %v810_v6 = vor.u32 %v808_v45, %v807_v58  ;;  %v818_v8 = vor.u32 %v816_v60, %v815_v59  ;;  %v820_v9 = vrot.slane %v815_v59, 4  ;;  %v822_v19 = vshrl.u32 %v9487_v61, 16 }
  0x56   : > { %v825_v11 = vshll.u32 %v9487_v61, 16  ;;  %v830_v22 = vshrl.u32 %v9488_v4, 16  ;;  %v833_v13 = vshll.u32 %v9488_v4, 16  ;;  %v9489_v20 = vpack.c.bf16 %v9117_v5, %v9117_v5  ;;  %v996_v27 = vld [vmem:[#allocation2 + $0x24] sm:$0xf]  ;;  %v9123_v59 = vld [vmem:[%s10759_s10 + $0xd0] sm:$0xff] }
  0x57   : > { %v990_v16 = vsel %vm10885_vm11, %v810_v6, %v989_v2  ;;  %v819_v17 = vsel %vm10892_vm12, %v811_v7, %v818_v8  ;;  %v994_v18 = vsel %vm10898_vm13, %v820_v9, %v993_v3  ;;  %v824_v23 = vrot.slane %v822_v19, 7  ;;  %v1003_v46 = vld [vmem:[#allocation2 + $0x30] sm:$0xf]  ;;  %v1007_v47 = vld [vmem:[#allocation2 + $0x38] sm:$0x1] }
  0x58   : > { %991 = vst [vmem:[#allocation2 + $0x18] sm:$0xf] %v990_v16  ;;  %992 = vst.msk [vmem:[#allocation2 + $0x1c] sm:$0xf] %vm278_vm0, %v819_v17  ;;  %v832_v24 = vrot.slane %v830_v22, 7  ;;  %v9490_v25 = vpack.c.bf16 %v9118_v10, %v9118_v10  ;;  %v9491_v26 = vpack.c.bf16 %v9119_v12, %v9119_v12  ;;  %v839_v30 = vshrl.u32 %v9489_v20, 16 }
  0x59   : > { %995 = vst [vmem:[#allocation2 + $0x20] sm:$0x1] %v994_v18  ;;  %v842_v31 = vshll.u32 %v9489_v20, 16  ;;  %v9492_v33 = vpack.c.bf16 %v9120_v14, %v9120_v14  ;;  %v9493_v34 = vpack.c.bf16 %v9121_v15, %v9121_v15  ;;  %v827_v35 = vor.u32 %v825_v11, %v824_v23  ;;  %v1010_v53 = vld [vmem:[#allocation2 + $0x3c] sm:$0xf]  ;;  %v9125_v14 = vld [vmem:[%s10759_s10 + $0xe0] sm:$0xff] }
  0x5a   : > { %v828_v36 = vrot.slane %v824_v23, 4  ;;  %v835_v37 = vor.u32 %v833_v13, %v832_v24  ;;  %v837_v38 = vrot.slane %v832_v24, 4  ;;  %v841_v39 = vrot.slane %v839_v30, 7  ;;  %v1014_v8 = vld [vmem:[#allocation2 + $0x44] sm:$0x1]  ;;  %v9124_v12 = vld [vmem:[%s10759_s10 + $0xd8] sm:$0xff] }
  0x5b   : > { %v847_v40 = vshrl.u32 %v9490_v25, 16  ;;  %v850_v41 = vshll.u32 %v9490_v25, 16  ;;  %v856_v42 = vshrl.u32 %v9491_v26, 16  ;;  %v997_v43 = vsel %vm10885_vm11, %v827_v35, %v996_v27  ;;  %v1017_v9 = vld [vmem:[#allocation2 + $0x48] sm:$0xf]  ;;  %v9127_v23 = vld [vmem:[%s10759_s10 + $0xf0] sm:$0xff] }
  0x5c   : > { %v836_v44 = vsel %vm10892_vm12, %v828_v36, %v835_v37  ;;  %v1001_v45 = vsel %vm10898_vm13, %v837_v38, %v1000_v28  ;;  %v859_v48 = vshll.u32 %v9491_v26, 16  ;;  %998 = vst [vmem:[#allocation2 + $0x24] sm:$0xf] %v997_v43  ;;  %v844_v49 = vor.u32 %v842_v31, %v841_v39  ;;  %v9126_v15 = vld [vmem:[%s10759_s10 + $0xe8] sm:$0xff]  ;;  %v9128_v24 = vld [vmem:[%s10759_s10 + $0xf8] sm:$0xff] }
  0x5d   : > { %999 = vst.msk [vmem:[#allocation2 + $0x28] sm:$0xf] %vm278_vm0, %v836_v44  ;;  %1002 = vst [vmem:[#allocation2 + $0x2c] sm:$0x1] %v1001_v45  ;;  %v845_v50 = vrot.slane %v841_v39, 4  ;;  %v849_v51 = vrot.slane %v847_v40, 7  ;;  %v9494_v4 = vpack.c.bf16 %v9122_v54, %v9122_v54  ;;  %v9495_v10 = vpack.c.bf16 %v9123_v59, %v9123_v59 }
  0x5e   : > { %v858_v52 = vrot.slane %v856_v42, 7  ;;  %v864_v55 = vshrl.u32 %v9492_v33, 16  ;;  %v867_v56 = vshll.u32 %v9492_v33, 16  ;;  %v873_v57 = vshrl.u32 %v9493_v34, 16  ;;  %v1021_v35 = vld [vmem:[#allocation2 + $0x50] sm:$0x1] }
  0x5f   : > { %v876_v58 = vshll.u32 %v9493_v34, 16  ;;  %v1004_v60 = vsel %vm10885_vm11, %v844_v49, %v1003_v46  ;;  %v852_v61 = vor.u32 %v850_v41, %v849_v51  ;;  %v854_v62 = vrot.slane %v849_v51, 4  ;;  %v1024_v36 = vld [vmem:[#allocation2 + $0x54] sm:$0xf] }
  0x60   : > { %v861_v63 = vor.u32 %v859_v48, %v858_v52  ;;  %1005 = vst [vmem:[#allocation2 + $0x30] sm:$0xf] %v1004_v60  ;;  %v862_v1 = vrot.slane %v858_v52, 4  ;;  %v866_v2 = vrot.slane %v864_v55, 7  ;;  %v875_v3 = vrot.slane %v873_v57, 7 }
  0x61   : > { %v853_v5 = vsel %vm10892_vm12, %v845_v50, %v852_v61  ;;  %v1008_v6 = vsel %vm10898_vm13, %v854_v62, %v1007_v47  ;;  %v881_v16 = vshrl.u32 %v9494_v4, 16  ;;  %v884_v17 = vshll.u32 %v9494_v4, 16  ;;  %v1028_v52 = vld [vmem:[#allocation2 + $0x5c] sm:$0x1]  ;;  %v1035_v4 = vld [vmem:[#allocation2 + $0x68] sm:$0x1] }
  0x62   : > { %v1011_v7 = vsel %vm10885_vm11, %v861_v63, %v1010_v53  ;;  %1006 = vst.msk [vmem:[#allocation2 + $0x34] sm:$0xf] %vm278_vm0, %v853_v5  ;;  %1009 = vst [vmem:[#allocation2 + $0x38] sm:$0x1] %v1008_v6  ;;  %v869_v19 = vor.u32 %v867_v56, %v866_v2  ;;  %v871_v11 = vrot.slane %v866_v2, 4  ;;  %v878_v22 = vor.u32 %v876_v58, %v875_v3 }
  0x63   : > { %1012 = vst [vmem:[#allocation2 + $0x3c] sm:$0xf] %v1011_v7  ;;  %v879_v13 = vrot.slane %v875_v3, 4  ;;  %v890_v18 = vshrl.u32 %v9495_v10, 16  ;;  %v893_v20 = vshll.u32 %v9495_v10, 16  ;;  %v9496_v28 = vpack.c.bf16 %v9124_v12, %v9124_v12 }
  0x64   : > { %v870_v25 = vsel %vm10892_vm12, %v862_v1, %v869_v19  ;;  %v1015_v26 = vsel %vm10898_vm13, %v871_v11, %v1014_v8  ;;  %v1018_v27 = vsel %vm10885_vm11, %v878_v22, %v1017_v9  ;;  %v883_v30 = vrot.slane %v881_v16, 7  ;;  %v1031_v58 = vld [vmem:[#allocation2 + $0x60] sm:$0xf]  ;;  %v1038_v10 = vld [vmem:[#allocation2 + $0x6c] sm:$0xf] }
  0x65   : > { %1013 = vst.msk [vmem:[#allocation2 + $0x40] sm:$0xf] %vm278_vm0, %v870_v25  ;;  %1016 = vst [vmem:[#allocation2 + $0x44] sm:$0x1] %v1015_v26  ;;  %v892_v31 = vrot.slane %v890_v18, 7  ;;  %v9497_v33 = vpack.c.bf16 %v9125_v14, %v9125_v14  ;;  %v9498_v34 = vpack.c.bf16 %v9126_v15, %v9126_v15  ;;  %v898_v37 = vshrl.u32 %v9496_v28, 16 }
  0x66   : > { %1019 = vst [vmem:[#allocation2 + $0x48] sm:$0xf] %v1018_v27  ;;  %v901_v38 = vshll.u32 %v9496_v28, 16  ;;  %v9499_v39 = vpack.c.bf16 %v9127_v23, %v9127_v23  ;;  %v9500_v40 = vpack.c.bf16 %v9128_v24, %v9128_v24  ;;  %v886_v41 = vor.u32 %v884_v17, %v883_v30 }
  0x67   : > { %v888_v42 = vrot.slane %v883_v30, 4  ;;  %v895_v43 = vor.u32 %v893_v20, %v892_v31  ;;  %v896_v44 = vrot.slane %v892_v31, 4  ;;  %v900_v45 = vrot.slane %v898_v37, 7 }
  0x68   : > { %v907_v46 = vshrl.u32 %v9497_v33, 16  ;;  %v910_v47 = vshll.u32 %v9497_v33, 16  ;;  %v915_v48 = vshrl.u32 %v9498_v34, 16  ;;  %v887_v49 = vsel %vm10892_vm12, %v879_v13, %v886_v41  ;;  %v1042_v13 = vld [vmem:[#allocation2 + $0x74] sm:$0x1] }
  0x69   : > { %v1022_v50 = vsel %vm10898_vm13, %v888_v42, %v1021_v35  ;;  %v1025_v51 = vsel %vm10885_vm11, %v895_v43, %v1024_v36  ;;  %v918_v53 = vshll.u32 %v9498_v34, 16  ;;  %1020 = vst.msk [vmem:[#allocation2 + $0x4c] sm:$0xf] %vm278_vm0, %v887_v49  ;;  %v903_v54 = vor.u32 %v901_v38, %v900_v45 }
  0x6a   : > { %1023 = vst [vmem:[#allocation2 + $0x50] sm:$0x1] %v1022_v50  ;;  %1026 = vst [vmem:[#allocation2 + $0x54] sm:$0xf] %v1025_v51  ;;  %v905_v55 = vrot.slane %v900_v45, 4  ;;  %v909_v56 = vrot.slane %v907_v46, 7 }
  0x6b   : > { %v917_v57 = vrot.slane %v915_v48, 7  ;;  %v924_v59 = vshrl.u32 %v9499_v39, 16  ;;  %v927_v60 = vshll.u32 %v9499_v39, 16  ;;  %v932_v61 = vshrl.u32 %v9500_v40, 16 }
  0x6c   : > { %v935_v62 = vshll.u32 %v9500_v40, 16  ;;  %v904_v63 = vsel %vm10892_vm12, %v896_v44, %v903_v54  ;;  %v1029_v1 = vsel %vm10898_vm13, %v905_v55, %v1028_v52  ;;  %v912_v2 = vor.u32 %v910_v47, %v909_v56 }
  0x6d   : > { %v913_v3 = vrot.slane %v909_v56, 4  ;;  %1027 = vst.msk [vmem:[#allocation2 + $0x58] sm:$0xf] %vm278_vm0, %v904_v63  ;;  %1030 = vst [vmem:[#allocation2 + $0x5c] sm:$0x1] %v1029_v1  ;;  %v920_v5 = vor.u32 %v918_v53, %v917_v57  ;;  %v922_v6 = vrot.slane %v917_v57, 4 }
  0x6e   : > { %v926_v7 = vrot.slane %v924_v59, 7  ;;  %v934_v8 = vrot.slane %v932_v61, 7  ;;  %v1032_v9 = vsel %vm10885_vm11, %v912_v2, %v1031_v58 }
  0x6f   : > { %1033 = vst [vmem:[#allocation2 + $0x60] sm:$0xf] %v1032_v9  ;;  %v921_v12 = vsel %vm10892_vm12, %v913_v3, %v920_v5  ;;  %v1036_v19 = vsel %vm10898_vm13, %v922_v6, %v1035_v4 }
  0x70   : > { %v929_v11 = vor.u32 %v927_v60, %v926_v7  ;;  %v930_v22 = vrot.slane %v926_v7, 4  ;;  %1034 = vst.msk [vmem:[#allocation2 + $0x64] sm:$0xf] %vm278_vm0, %v921_v12  ;;  %1037 = vst [vmem:[#allocation2 + $0x68] sm:$0x1] %v1036_v19  ;;  %v937_v14 = vor.u32 %v935_v62, %v934_v8  ;;  %v939_v15 = vrot.slane %v934_v8, 4 }
  0x72   : > { %v1039_v16 = vsel %vm10885_vm11, %v929_v11, %v1038_v10  ;;  %v938_v17 = vsel %vm10892_vm12, %v930_v22, %v937_v14  ;;  %v1043_v18 = vsel %vm10898_vm13, %v939_v15, %v1042_v13 }
  0x73   : > { %1040 = vst [vmem:[#allocation2 + $0x6c] sm:$0xf] %v1039_v16  ;;  %1041 = vst.msk [vmem:[#allocation2 + $0x70] sm:$0xf] %vm278_vm0, %v938_v17 }
  0x74   : > { %1044 = vst [vmem:[#allocation2 + $0x74] sm:$0x1] %v1043_v18 }
  0x75 PF: > { %v9186_v20 = vld [vmem:[%s14192_s1 + $0x2] sm:$0x3]  ;;  %vm2575_vm14 = vcmask 1041408   ;;  %v1130_v23 = vlaneseq  ;;  %10527 = vset.pattern.permute.xlu0 %v10591_v0  ;;  %10528 = vset.pattern.permute.xlu1 %v10591_v0  ;;  %5700 = vst.msk [vmem:[#allocation3] sm:$0xf] %vm278_vm0, %v10591_v0  ;;  %vm2538_vm2 = vcmask 31744  }
  0x76   : > { %5703 = vst.msk [vmem:[#allocation3 + $0xc] sm:$0xf] %vm278_vm0, %v10591_v0  ;;  %5701 = vst.msk [vmem:[#allocation3 + $0x4] sm:$0xf] %vm278_vm0, %v10591_v0  ;;  %10470 = vmatprep.subr.msk.bf16.mxu0 %vm2575_vm14, %v9186_v20  ;;  %v2577_v21 = vsel %vm2575_vm14, %v9186_v20, 0  ;;  %10471 = vmatprep.subr.msk.bf16.mxu1 %vm2575_vm14, %v9186_v20  ;;  %vm5724_vm3 = vcmask 26624  }
  0x77   : > { %5702 = vst.msk [vmem:[#allocation3 + $0x8] sm:$0xf] %vm278_vm0, %v10591_v0  ;;  %5704 = vst.msk [vmem:[#allocation3 + $0x10] sm:$0xf] %vm278_vm0, %v10591_v0  ;;  %v10592_v32 = vmov 1966171168   ;;  %9733 = vmatpush3.bf16.msra.mxu0 %v2577_v21  ;;  %10309 = vmatpush3.bf16.msra.mxu1 %v2577_v21 }
  0x78   : > { %5707 = vst.msk [vmem:[#allocation3 + $0x1c] sm:$0xf] %vm278_vm0, %v10591_v0  ;;  %5705 = vst.msk [vmem:[#allocation3 + $0x14] sm:$0xf] %vm278_vm0, %v10591_v0  ;;  %v1128_v24 = vunpack.c.l.s4 %v10592_v32  ;;  %v11040_v26 = vshrl.u32 %v1130_v23, 7 }
  0x79   : > { %5706 = vst.msk [vmem:[#allocation3 + $0x18] sm:$0xf] %vm278_vm0, %v10591_v0  ;;  %5708 = vst.msk [vmem:[#allocation3 + $0x20] sm:$0xf] %vm278_vm0, %v10591_v0  ;;  %vm2442_vm15 = vsmask.f32 7424 }
  0x7a   : > { %5711 = vst.msk [vmem:[#allocation3 + $0x2c] sm:$0xf] %vm278_vm0, %v10591_v0  ;;  %5709 = vst.msk [vmem:[#allocation3 + $0x24] sm:$0xf] %vm278_vm0, %v10591_v0  ;;  %v1129_v30 = vunpack.c.0.s8 %v1128_v24  ;;  %vm6028_vm4 = vsmask.f32 7938 }
  0x7b   : > { %5710 = vst.msk [vmem:[#allocation3 + $0x28] sm:$0xf] %vm278_vm0, %v10591_v0  ;;  %5712 = vst.msk [vmem:[#allocation3 + $0x30] sm:$0xf] %vm278_vm0, %v10591_v0  ;;  %vm5796_vm5 = vsmask.f32 256 }
  0x7c   : > { %5715 = vst.msk [vmem:[#allocation3 + $0x3c] sm:$0xf] %vm278_vm0, %v10591_v0  ;;  %5713 = vst.msk [vmem:[#allocation3 + $0x34] sm:$0xf] %vm278_vm0, %v10591_v0  ;;  %v11046_v35 = vsub.s32 %v1129_v30, %v11040_v26  ;;  %vm5797_vm6 = vsmask.f32 4368 }
  0x7d   : > { %5714 = vst.msk [vmem:[#allocation3 + $0x38] sm:$0xf] %vm278_vm0, %v10591_v0  ;;  %5716 = vst.msk [vmem:[#allocation3 + $0x40] sm:$0xf] %vm278_vm0, %v10591_v0  ;;  %vm6055_vm9 = vsmask.f32 2304 }
  0x7e   : > { %5719 = vst.msk [vmem:[#allocation3 + $0x4c] sm:$0xf] %vm278_vm0, %v10591_v0  ;;  %5717 = vst.msk [vmem:[#allocation3 + $0x44] sm:$0xf] %vm278_vm0, %v10591_v0 }
  0x7f   : > { %5718 = vst.msk [vmem:[#allocation3 + $0x48] sm:$0xf] %vm278_vm0, %v10591_v0  ;;  %5720 = vst.msk [vmem:[#allocation3 + $0x50] sm:$0xf] %vm278_vm0, %v10591_v0 }
  0x80   : > { %5721 = vst.msk [vmem:[#allocation3 + $0x54] sm:$0xf] %vm278_vm0, %v10591_v0  ;;  %5722 = vst.msk [vmem:[#allocation3 + $0x58] sm:$0xf] %vm278_vm0, %v10591_v0  ;;  %v1877_v0 = vld [vmem:[%s14192_s1] sm:$0x3] }
  0x81   : > { %v9149_v29 = vld.sshfl [vmem:[#allocation2] sm:$0x33 pattern:$0x75316420]  ;;  %14302 = vst [vmem:[#allocation4_spill] sm:$0xff] %v11040_v26  ;;  %10472 = vmatprep.subr.msk.bf16.mxu0 %vm2575_vm14, %v1877_v0  ;;  %v11133_v23 = vsel %vm2575_vm14, %v1877_v0, 0  ;;  %vm12579_vm7 = vmand %vm278_vm0, %vm6028_vm4 }
  0x82   : > { %v9150_v25 = vld.sshfl [vmem:[#allocation2 + $0x4] sm:$0x33 pattern:$0x75316420]  ;;  %v1126_v28 = vcombine.high %v9149_v29, %v9149_v29  ;;  %v11050_v38 = vrot.slane %v9149_v29, %v11046_v35  ;;  %vm12587_vm8 = vmor %vm5796_vm5, %vm5797_vm6 }
  0x83   : > { %v9151_v27 = vld.sshfl [vmem:[#allocation2 + $0x8] sm:$0x1 pattern:$0x75316420]  ;;  %v1150_v31 = vcombine.high %v9150_v25, %v9150_v25  ;;  %v11056_v40 = vrot.slane %v9150_v25, %v11046_v35  ;;  %vm6056_vm10 = vmand %vm5724_vm3, %vm6055_vm9 }
  0x84   : > { %v9152_v33 = vld.sshfl [vmem:[#allocation2 + $0xc] sm:$0x33 pattern:$0x75316420]  ;;  %v11053_v39 = vrot.slane %v1126_v28, %v11046_v35  ;;  %v11062_v42 = vrot.slane %v9151_v27, %v11046_v35 }
  0x85   : > { %v9153_v34 = vld.sshfl [vmem:[#allocation2 + $0x10] sm:$0x33 pattern:$0x75316420]  ;;  %v1188_v36 = vcombine.high %v9152_v33, %v9152_v33  ;;  %v11059_v41 = vrot.slane %v1150_v31, %v11046_v35  ;;  %v11065_v43 = vrot.slane %v9152_v33, %v11046_v35 }
  0x86   : > { %v1212_v37 = vcombine.high %v9153_v34, %v9153_v34  ;;  %v11071_v45 = vrot.slane %v9153_v34, %v11046_v35  ;;  %v1880_v47 = vcombine.low %v11050_v38, %v11053_v39  ;;  %v9187_v48 = vcombine.high %v11050_v38, %v11053_v39  ;;  %v9154_v54 = vld.sshfl [vmem:[#allocation2 + $0x14] sm:$0x1 pattern:$0x75316420] }
  0x87   : > { %v11068_v44 = vrot.slane %v1188_v36, %v11046_v35  ;;  %v1882_v49 = vcombine.low %v11056_v40, %v11059_v41  ;;  %v1203_v50 = vcombine.high %v11065_v43, %v11065_v43  ;;  %v9188_v53 = vcombine.high %v11056_v40, %v11059_v41  ;;  %v9155_v59 = vld.sshfl [vmem:[#allocation2 + $0x18] sm:$0x33 pattern:$0x75316420] }
  0x88   : > { %v11074_v46 = vrot.slane %v1212_v37, %v11046_v35  ;;  %v1227_v52 = vcombine.high %v11071_v45, %v11071_v45  ;;  %v1890_v55 = vrot.slane %v1880_v47, %v11046_v35  ;;  %v1897_v56 = vrot.slane %v9187_v48, %v11046_v35  ;;  %v9156_v1 = vld.sshfl [vmem:[#allocation2 + $0x1c] sm:$0x33 pattern:$0x75316420] }
  0x89   : > { %v1204_v51 = vcombine.high %v11068_v44, %v11068_v44  ;;  %v1904_v57 = vrot.slane %v1882_v49, %v11046_v35  ;;  %v1929_v58 = vcombine.low %v11062_v42, %v11065_v43  ;;  %v1911_v60 = vrot.slane %v9188_v53, %v11046_v35  ;;  %v9157_v22 = vld.sshfl [vmem:[#allocation2 + $0x20] sm:$0x1 pattern:$0x75316420] }
  0x8a   : > { %v1930_v61 = vcombine.low %v11068_v44, %v1203_v50  ;;  %v1932_v63 = vcombine.low %v11074_v46, %v1227_v52  ;;  %v1912_v2 = vcombine.low %v1890_v55, %v1897_v56  ;;  %v1228_v4 = vcombine.high %v11074_v46, %v11074_v46  ;;  %v9158_v21 = vld.sshfl [vmem:[#allocation2 + $0x24] sm:$0x33 pattern:$0x75316420] }
  0x8b   : > { %v1931_v62 = vcombine.low %v1204_v51, %v11071_v45  ;;  %v1939_v3 = vrot.slane %v1929_v58, %v11046_v35  ;;  %v11103_v5 = vrot.slane %v9154_v54, %v11046_v35  ;;  %v1913_v6 = vcombine.low %v1904_v57, %v1911_v60  ;;  %v9159_v49 = vld.sshfl [vmem:[#allocation2 + $0x28] sm:$0x33 pattern:$0x75316420] }
  0x8c   : > { %v11106_v7 = vrot.slane %v1930_v61, %v11046_v35  ;;  %v11112_v9 = vrot.slane %v1932_v63, %v11046_v35  ;;  %v1920_v10 = vrot.slane %v1912_v2, %v11046_v35  ;;  %v1250_v12 = vcombine.high %v9155_v59, %v9155_v59 }
  0x8d   : > { %v11109_v8 = vrot.slane %v1931_v62, %v11046_v35  ;;  %v11116_v19 = vrot.slane %v9155_v59, %v11046_v35  ;;  %v1274_v11 = vcombine.high %v9156_v1, %v9156_v1  ;;  %v1927_v13 = vrot.slane %v1913_v6, %v11046_v35 }
  0x8e   : > { %14303 = vst [vmem:[#allocation5_spill] sm:$0xff] %v11106_v7  ;;  %14305 = vst [vmem:[#allocation7_spill] sm:$0xff] %v11112_v9  ;;  %v1961_v14 = vcombine.low %v1939_v3, %v11106_v7  ;;  %v11123_v16 = vrot.slane %v9156_v1, %v11046_v35  ;;  %v11126_v17 = vrot.slane %v1250_v12, %v11046_v35  ;;  %v9171_v7 = vld.sshfl [vmem:[#allocation2 + $0x58] sm:$0x33 pattern:$0x75316420] }
  0x8f   : > { %14304 = vst [vmem:[#allocation6_spill] sm:$0xff] %v11109_v8  ;;  %v1962_v15 = vcombine.low %v11109_v8, %v11112_v9  ;;  %v11129_v18 = vrot.slane %v1274_v11, %v11046_v35  ;;  %v1978_v20 = vcombine.low %v1228_v4, %v11103_v5  ;;  %v11135_v29 = vcombine.low %v1920_v10, %v1927_v13  ;;  %v9160_v4 = vld.sshfl [vmem:[#allocation2 + $0x2c] sm:$0x1 pattern:$0x75316420] }
  0x90   : > { %v1969_v32 = vrot.slane %v1961_v14, %v11046_v35  ;;  %v11140_v25 = vrot.slane %v9157_v22, %v11046_v35  ;;  %v1979_v27 = vcombine.low %v11116_v19, %v11126_v17  ;;  %v9189_v28 = vcombine.high %v11116_v19, %v11126_v17 }
  0x91   : > { %v1976_v24 = vrot.slane %v1962_v15, %v11046_v35  ;;  %v1981_v30 = vcombine.low %v11123_v16, %v11129_v18  ;;  %v11149_v31 = vrot.slane %v1978_v20, %v11046_v35  ;;  %v2444_v0 = vshrl.u32 %v11135_v29, 16  ;;  %v9161_v15 = vld.sshfl [vmem:[#allocation2 + $0x30] sm:$0x33 pattern:$0x75316420] }
  0x92   : > { %v2446_v34 = vshll.u32 %v11135_v29, 16  ;;  %v1312_v36 = vcombine.high %v9158_v21, %v9158_v21  ;;  %v11156_v37 = vrot.slane %v1979_v27, %v11046_v35  ;;  %v11159_v47 = vrot.slane %v9189_v28, %v11046_v35  ;;  %v9162_v28 = vld.sshfl [vmem:[#allocation2 + $0x34] sm:$0x33 pattern:$0x75316420] }
  0x93   : > { %14306 = vst [vmem:[#allocation8_spill] sm:$0xff] %v11149_v31  ;;  %v11151_v33 = vcombine.low %v1969_v32, %v1976_v24  ;;  %v11162_v48 = vrot.slane %v1981_v30, %v11046_v35  ;;  %v11165_v50 = vrot.slane %v9158_v21, %v11046_v35  ;;  %v1336_v62 = vcombine.high %v9159_v49, %v9159_v49 }
  0x94   : > { %14307 = vst [vmem:[#allocation9_spill] sm:$0xff] %v11156_v37  ;;  %14308 = vst [vmem:[#allocation10_spill] sm:$0xff] %v11159_v47  ;;  %v2448_v51 = vrot.slane %v2446_v34, 1  ;;  %v11170_v54 = vrot.slane %v1312_v36, %v11046_v35  ;;  %v2010_v55 = vcombine.low %v11149_v31, %v11156_v37  ;;  %v11185_v2 = vrot.slane %v9159_v49, %v11046_v35 }
  0x95   : > { %14309 = vst [vmem:[#allocation11_spill] sm:$0xff] %v11162_v48  ;;  %v2451_v52 = vshll.u32 %v11151_v33, 16  ;;  %v2455_v53 = vshrl.u32 %v11151_v33, 16  ;;  %v2011_v56 = vcombine.low %v11159_v47, %v11162_v48  ;;  %v1327_v58 = vcombine.high %v11165_v50, %v11165_v50 }
  0x96   : > { %v2449_v59 = vor.u32 %v2448_v51, %v2444_v0  ;;  %v1328_v61 = vcombine.high %v11170_v54, %v11170_v54  ;;  %v2018_v63 = vrot.slane %v2010_v55, %v11046_v35  ;;  %v9190_v3 = vcombine.high %v11123_v16, %v11129_v18  ;;  %v9174_v47 = vld.sshfl [vmem:[#allocation2 + $0x64] sm:$0x33 pattern:$0x75316420] }
  0x97   : > { %v2453_v60 = vrot.slane %v2451_v52, 1  ;;  %v2025_v1 = vrot.slane %v2011_v56, %v11046_v35  ;;  %v2028_v12 = vcombine.low %v11140_v25, %v11165_v50  ;;  %v2029_v11 = vcombine.low %v11170_v54, %v1327_v58 }
  0x98   : > { %v2030_v13 = vcombine.low %v1328_v61, %v11185_v2  ;;  %v11198_v14 = vrot.slane %v9190_v3, %v11046_v35  ;;  %v11201_v20 = vrot.slane %v1336_v62, %v11046_v35  ;;  %v1351_v24 = vcombine.high %v11185_v2, %v11185_v2  ;;  %v9221_v61 = vld [vmem:[%s14192_s1 + $0x4] sm:$0x3]  ;;  %v9164_v3 = vld.sshfl [vmem:[#allocation2 + $0x3c] sm:$0x33 pattern:$0x75316420] }
  0x99   : > { %v2454_v6 = vsel %vm2442_vm15, %v2449_v59, %v2453_v60  ;;  %v2457_v10 = vor.u32 %v2455_v53, %v2453_v60  ;;  %v11194_v22 = vcombine.low %v2018_v63, %v2025_v1  ;;  %v11204_v21 = vrot.slane %v2028_v12, %v11046_v35  ;;  %v9163_v59 = vld.sshfl [vmem:[#allocation2 + $0x38] sm:$0x1 pattern:$0x75316420] }
  0x9a   : > { %9734 = vmatprep.mubr.msk.bf16.mxu0 %vm2538_vm2, %v2454_v6  ;;  %14310 = vst [vmem:[#allocation12_spill] sm:$0xff] %v11198_v14  ;;  %v11207_v32 = vrot.slane %v2029_v11, %v11046_v35  ;;  %v11212_v27 = vrot.slane %v9160_v4, %v11046_v35  ;;  %v11216_v0 = vrot.slane %v2030_v13, %v11046_v35 }
  0x9b   : > { %14311 = vst [vmem:[#allocation13_spill] sm:$0xff] %v11204_v21  ;;  %v2459_v30 = vshll.u32 %v11194_v22, 16  ;;  %v2463_v34 = vshrl.u32 %v11194_v22, 16  ;;  %v2059_v49 = vcombine.low %v11198_v14, %v11204_v21  ;;  %v1352_v51 = vcombine.high %v11201_v20, %v11201_v20 }
  0x9c   : > { %14312 = vst [vmem:[#allocation14_spill] sm:$0xff] %v11207_v32  ;;  %14313 = vst [vmem:[#allocation15_spill] sm:$0xff] %v11216_v0  ;;  %v1374_v52 = vcombine.high %v9161_v15, %v9161_v15  ;;  %v11226_v53 = vrot.slane %v9161_v15, %v11046_v35  ;;  %v2060_v56 = vcombine.low %v11207_v32, %v11216_v0 }
  0x9d   : > { %v2461_v55 = vrot.slane %v2459_v30, 1  ;;  %v2076_v58 = vcombine.low %v11201_v20, %v1351_v24  ;;  %v1398_v60 = vcombine.high %v9162_v28, %v9162_v28  ;;  %v2067_v62 = vrot.slane %v2059_v49, %v11046_v35 }
  0x9e   : > { %v11236_v63 = vrot.slane %v1374_v52, %v11046_v35  ;;  %v2077_v1 = vcombine.low %v1352_v51, %v11212_v27  ;;  %v11240_v4 = vrot.slane %v9162_v28, %v11046_v35  ;;  %v2074_v12 = vrot.slane %v2060_v56, %v11046_v35 }
  0x9f   : > { %v2462_v6 = vsel %vm2442_vm15, %v2457_v10, %v2461_v55  ;;  %v2465_v11 = vor.u32 %v2463_v34, %v2461_v55  ;;  %v11245_v13 = vrot.slane %v2076_v58, %v11046_v35  ;;  %v11256_v28 = vrot.slane %v1398_v60, %v11046_v35 }
  0xa0   : > { %9735 = vmatmul.mubr.msk.bf16.vlgmr.msra.gmra.mrb[0].mxu0 %vm2538_vm2, %v2462_v6  ;;  %v2078_v15 = vcombine.low %v11226_v53, %v11236_v63  ;;  %v9191_v24 = vcombine.high %v11226_v53, %v11236_v63  ;;  %v11253_v30 = vrot.slane %v2077_v1, %v11046_v35  ;;  %v3463_v10 = vsel %vm2575_vm14, %v9221_v61, 0 }
  0xa1   : > { %14314 = vst [vmem:[#allocation16_spill] sm:$0xff] %v11245_v13  ;;  %9759 = vmatpush3.bf16.msra.mxu0 %v11133_v23  ;;  %9760 = vmatprep.mubr.msk.bf16.mxu0 %vm2538_vm2, %v11135_v29  ;;  %v11262_v34 = vcombine.low %v2067_v62, %v2074_v12  ;;  %v11265_v49 = vrot.slane %v9163_v59, %v11046_v35 }
  0xa2   : > { %14315 = vst [vmem:[#allocation17_spill] sm:$0xff] %v11253_v30  ;;  %v1436_v51 = vcombine.high %v9164_v3, %v9164_v3  ;;  %10473 = vmatprep.subr.msk.bf16.mxu0 %vm2575_vm14, %v9221_v61  ;;  %v11269_v52 = vrot.slane %v2078_v15, %v11046_v35  ;;  %v11272_v55 = vrot.slane %v9191_v24, %v11046_v35  ;;  %v9165_v61 = vld.sshfl [vmem:[#allocation2 + $0x40] sm:$0x33 pattern:$0x75316420] }
  0xa3   : > { %v2108_v23 = vcombine.low %v11245_v13, %v11253_v30  ;;  %v11277_v29 = vrot.slane %v9164_v3, %v11046_v35  ;;  %v2467_v56 = vshll.u32 %v11262_v34, 16  ;;  %v2471_v58 = vshrl.u32 %v11262_v34, 16 }
  0xa4   : > { %14316 = vst [vmem:[#allocation18_spill] sm:$0xff] %v11269_v52  ;;  %14317 = vst [vmem:[#allocation19_spill] sm:$0xff] %v11272_v55  ;;  %v11282_v59 = vrot.slane %v1436_v51, %v11046_v35  ;;  %v2125_v60 = vcombine.low %v11240_v4, %v11256_v28  ;;  %v2109_v62 = vcombine.low %v11269_v52, %v11272_v55  ;;  %v9166_v51 = vld.sshfl [vmem:[#allocation2 + $0x44] sm:$0x1 pattern:$0x75316420] }
  0xa5   : > { %v2116_v1 = vrot.slane %v2108_v23, %v11046_v35  ;;  %v1451_v3 = vcombine.high %v11277_v29, %v11277_v29  ;;  %v9192_v6 = vcombine.high %v11240_v4, %v11256_v28  ;;  %v2469_v12 = vrot.slane %v2467_v56, 1  ;;  %v9167_v55 = vld.sshfl [vmem:[#allocation2 + $0x48] sm:$0x33 pattern:$0x75316420] }
  0xa6   : > { %v2127_v15 = vcombine.low %v11265_v49, %v11277_v29  ;;  %v11296_v24 = vrot.slane %v2125_v60, %v11046_v35  ;;  %v1452_v36 = vcombine.high %v11282_v59, %v11282_v59  ;;  %v2123_v57 = vrot.slane %v2109_v62, %v11046_v35 }
  0xa7   : > { %v2128_v23 = vcombine.low %v11282_v59, %v1451_v3  ;;  %v11303_v26 = vrot.slane %v9192_v6, %v11046_v35  ;;  %v1460_v30 = vcombine.high %v9165_v61, %v9165_v61  ;;  %v2470_v56 = vsel %vm2442_vm15, %v2465_v11, %v2469_v12 }
  0xa8   : > { %14318 = vst [vmem:[#allocation20_spill] sm:$0xff] %v11296_v24  ;;  %v2473_v52 = vor.u32 %v2471_v58, %v2469_v12  ;;  %v11307_v0 = vrot.slane %v2127_v15, %v11046_v35  ;;  %v11310_v60 = vrot.slane %v9165_v61, %v11046_v35  ;;  %9738 = vmatprep.mubr.msk.bf16.mxu1 %vm2538_vm2, %v2470_v56 }
  0xa9   : > { %14319 = vst [vmem:[#allocation21_spill] sm:$0xff] %v11303_v26  ;;  %v11313_v13 = vcombine.low %v2116_v1, %v2123_v57  ;;  %v11316_v62 = vrot.slane %v2128_v23, %v11046_v35  ;;  %v2157_v3 = vcombine.low %v11296_v24, %v11303_v26  ;;  %v11321_v6 = vrot.slane %v1460_v30, %v11046_v35  ;;  %v9168_v57 = vld.sshfl [vmem:[#allocation2 + $0x4c] sm:$0x33 pattern:$0x75316420] }
  0xaa   : > { %14320 = vst [vmem:[#allocation22_spill] sm:$0xff] %v11307_v0  ;;  %v1475_v11 = vcombine.high %v11310_v60, %v11310_v60  ;;  %v11326_v58 = vrot.slane %v9166_v51, %v11046_v35  ;;  %v1498_v61 = vcombine.high %v9167_v55, %v9167_v55  ;;  %v11329_v12 = vrot.slane %v9167_v55, %v11046_v35  ;;  %v9244_v24 = vld [vmem:[%s14192_s1 + $0x6] sm:$0x3] }
  0xab   : > { %14321 = vst [vmem:[#allocation23_spill] sm:$0xff] %v11316_v62  ;;  %v2475_v1 = vshll.u32 %v11313_v13, 16  ;;  %v2158_v15 = vcombine.low %v11307_v0, %v11316_v62  ;;  %v2165_v23 = vrot.slane %v2157_v3, %v11046_v35  ;;  %v2479_v30 = vshrl.u32 %v11313_v13, 16 }
  0xac   : > { %v1476_v56 = vcombine.high %v11321_v6, %v11321_v6  ;;  %v11339_v51 = vrot.slane %v1498_v61, %v11046_v35  ;;  %v2174_v26 = vcombine.low %v1452_v36, %v11310_v60  ;;  %v2175_v55 = vcombine.low %v11321_v6, %v1475_v11  ;;  %9761 = vmatmul.mubr.msk.bf16.vlgmr.msra.gmra.mrb[0].mxu0 %vm2538_vm2, %v11151_v33  ;;  %v9169_v0 = vld.sshfl [vmem:[#allocation2 + $0x50] sm:$0x1 pattern:$0x75316420] }
  0xad   : > { %v2477_v3 = vrot.slane %v2475_v1, 1  ;;  %v2172_v62 = vrot.slane %v2158_v15, %v11046_v35  ;;  %v1522_v21 = vcombine.high %v9168_v57, %v9168_v57  ;;  %v11350_v32 = vrot.slane %v9168_v57, %v11046_v35  ;;  %9785 = vmatpush3.bf16.msra.mxu0 %v3463_v10  ;;  %9764 = vmatprep.mubr.msk.bf16.mxu0 %vm2538_vm2, %v11194_v22 }
  0xae   : > { %v2176_v36 = vcombine.low %v1476_v56, %v11326_v58  ;;  %v2177_v11 = vcombine.low %v11329_v12, %v11339_v51  ;;  %v11358_v61 = vrot.slane %v2174_v26, %v11046_v35  ;;  %v11364_v57 = vrot.slane %v2175_v55, %v11046_v35  ;;  %10474 = vmatprep.subr.msk.bf16.mxu0 %vm2575_vm14, %v9244_v24  ;;  %v9170_v26 = vld.sshfl [vmem:[#allocation2 + $0x54] sm:$0x33 pattern:$0x75316420] }
  0xaf   : > { %v2478_v33 = vsel %vm2442_vm15, %v2473_v52, %v2477_v3  ;;  %v11361_v1 = vcombine.low %v2165_v23, %v2172_v62  ;;  %v2481_v15 = vor.u32 %v2479_v30, %v2477_v3  ;;  %v11375_v56 = vrot.slane %v1522_v21, %v11046_v35 }
  0xb0   : > { %14322 = vst [vmem:[#allocation24_spill] sm:$0xff] %v11358_v61  ;;  %14323 = vst [vmem:[#allocation25_spill] sm:$0xff] %v11364_v57  ;;  %9739 = vmatmul.mubr.msk.bf16.vlgmr.msra.gmra.mrb[0].mxu1 %vm2538_vm2, %v2478_v33  ;;  %v11369_v22 = vrot.slane %v2176_v36, %v11046_v35  ;;  %v11372_v10 = vrot.slane %v2177_v11, %v11046_v35  ;;  %v11378_v52 = vrot.slane %v9169_v0, %v11046_v35 }
  0xb1   : > { %v2483_v62 = vshll.u32 %v11361_v1, 16  ;;  %v2206_v23 = vcombine.low %v11358_v61, %v11364_v57  ;;  %v2487_v30 = vshrl.u32 %v11361_v1, 16  ;;  %v11385_v55 = vrot.slane %v9170_v26, %v11046_v35 }
  0xb2   : > { %14324 = vst [vmem:[#allocation26_spill] sm:$0xff] %v11369_v22  ;;  %14325 = vst [vmem:[#allocation27_spill] sm:$0xff] %v11372_v10  ;;  %v2207_v3 = vcombine.low %v11369_v22, %v11372_v10  ;;  %v9193_v21 = vcombine.high %v11329_v12, %v11339_v51  ;;  %v2224_v0 = vcombine.low %v11350_v32, %v11375_v56 }
  0xb3   : > { %v9194_v36 = vcombine.high %v11350_v32, %v11375_v56  ;;  %v2485_v11 = vrot.slane %v2483_v62, 1  ;;  %v2214_v33 = vrot.slane %v2206_v23, %v11046_v35  ;;  %v2226_v57 = vcombine.low %v11378_v52, %v11385_v55 }
  0xb4   : > { %v1560_v61 = vcombine.high %v9170_v26, %v9170_v26  ;;  %v2221_v9 = vrot.slane %v2207_v3, %v11046_v35  ;;  %v11400_v10 = vrot.slane %v9193_v21, %v11046_v35  ;;  %v11403_v22 = vrot.slane %v2224_v0, %v11046_v35  ;;  %9765 = vmatmul.mubr.msk.bf16.gmra.mrb[4].mxu0 %vm2538_vm2, %v11262_v34  ;;  %v9172_v3 = vld.sshfl [vmem:[#allocation2 + $0x5c] sm:$0x1 pattern:$0x75316420] }
  0xb5   : > { %v11406_v31 = vrot.slane %v9194_v36, %v11046_v35  ;;  %v2486_v62 = vsel %vm2442_vm15, %v2481_v15, %v2485_v11  ;;  %v2489_v23 = vor.u32 %v2487_v30, %v2485_v11  ;;  %v11412_v26 = vrot.slane %v2226_v57, %v11046_v35  ;;  %9768 = vmatprep.mubr.msk.bf16.mxu0 %vm2538_vm2, %v11313_v13 }
  0xb6   : > { %14326 = vst [vmem:[#allocation28_spill] sm:$0xff] %v11400_v10  ;;  %14327 = vst [vmem:[#allocation29_spill] sm:$0xff] %v11403_v22  ;;  %v11415_v21 = vrot.slane %v1560_v61, %v11046_v35  ;;  %9742 = vmatprep.mubr.msk.bf16.mxu1 %vm2538_vm2, %v2486_v62  ;;  %v2222_v0 = vcombine.low %v2214_v33, %v2221_v9  ;;  %v2255_v36 = vcombine.low %v11400_v10, %v11403_v22  ;;  %v9173_v9 = vld.sshfl [vmem:[#allocation2 + $0x60] sm:$0x33 pattern:$0x75316420] }
  0xb7   : > { %14328 = vst [vmem:[#allocation30_spill] sm:$0xff] %v11406_v31  ;;  %14329 = vst [vmem:[#allocation31_spill] sm:$0xff] %v11412_v26  ;;  %v1575_v34 = vcombine.high %v11385_v55, %v11385_v55  ;;  %v11425_v15 = vsel %vm2575_vm14, %v9244_v24, 0  ;;  %v2256_v57 = vcombine.low %v11406_v31, %v11412_v26  ;;  %v1584_v30 = vcombine.high %v9171_v7, %v9171_v7 }
  0xb8   : > { %v1576_v61 = vcombine.high %v11415_v21, %v11415_v21  ;;  %v11432_v11 = vrot.slane %v9171_v7, %v11046_v35  ;;  %v2491_v13 = vshll.u32 %v2222_v0, 16  ;;  %v2263_v33 = vrot.slane %v2255_v36, %v11046_v35 }
  0xb9   : > { %v2495_v62 = vshrl.u32 %v2222_v0, 16  ;;  %v11436_v22 = vrot.slane %v9172_v3, %v11046_v35  ;;  %v2270_v24 = vrot.slane %v2256_v57, %v11046_v35  ;;  %v11440_v10 = vrot.slane %v1584_v30, %v11046_v35 }
  0xba   : > { %14330 = vst [vmem:[#allocation32_spill] sm:$0xff] %v11432_v11  ;;  %v1599_v26 = vcombine.high %v11432_v11, %v11432_v11  ;;  %v2272_v31 = vcombine.low %v11415_v21, %v1575_v34  ;;  %v2493_v7 = vrot.slane %v2491_v13, 1  ;;  %v2273_v8 = vcombine.low %v1576_v61, %v11432_v11 }
  0xbb   : > { %14331 = vst [vmem:[#allocation33_spill] sm:$0xff] %v11436_v22  ;;  %v1622_v14 = vcombine.high %v9173_v9, %v9173_v9  ;;  %v11447_v36 = vrot.slane %v9173_v9, %v11046_v35  ;;  %v2271_v48 = vcombine.low %v2263_v33, %v2270_v24  ;;  %v1600_v3 = vcombine.high %v11440_v10, %v11440_v10  ;;  %v9175_v9 = vld.sshfl [vmem:[#allocation2 + $0x68] sm:$0x1 pattern:$0x75316420] }
  0xbc   : > { %v2274_v57 = vcombine.low %v11440_v10, %v1599_v26  ;;  %v11453_v30 = vrot.slane %v2272_v31, %v11046_v35  ;;  %v2494_v37 = vsel %vm2442_vm15, %v2489_v23, %v2493_v7  ;;  %v2497_v34 = vor.u32 %v2495_v62, %v2493_v7  ;;  %9769 = vmatmul.mubr.msk.bf16.gmra.mrb[8].mxu0 %vm2538_vm2, %v11361_v1  ;;  %v9176_v62 = vld.sshfl [vmem:[#allocation2 + $0x6c] sm:$0x33 pattern:$0x75316420] }
  0xbd   : > { %v11457_v13 = vrot.slane %v2273_v8, %v11046_v35  ;;  %v11460_v61 = vrot.slane %v1622_v14, %v11046_v35  ;;  %9743 = vmatmul.mubr.msk.bf16.gmra.mrb[4].mxu1 %vm2538_vm2, %v2494_v37  ;;  %v2499_v26 = vshll.u32 %v2271_v48, 16  ;;  %v2275_v31 = vcombine.low %v1600_v3, %v11436_v22  ;;  %9772 = vmatprep.mubr.msk.bf16.mxu0 %vm2538_vm2, %v2222_v0 }
  0xbe   : > { %14332 = vst [vmem:[#allocation34_spill] sm:$0xff] %v11453_v30  ;;  %v11467_v33 = vrot.slane %v2274_v57, %v11046_v35  ;;  %v2503_v23 = vshrl.u32 %v2271_v48, 16  ;;  %v1646_v14 = vcombine.high %v9174_v47, %v9174_v47  ;;  %v11473_v24 = vrot.slane %v9174_v47, %v11046_v35 }
  0xbf   : > { %14333 = vst [vmem:[#allocation35_spill] sm:$0xff] %v11457_v13  ;;  %14334 = vst [vmem:[#allocation36_spill] sm:$0xff] %v11460_v61  ;;  %v2304_v8 = vcombine.low %v11453_v30, %v11457_v13  ;;  %v2321_v37 = vcombine.low %v11447_v36, %v11460_v61  ;;  %v2501_v1 = vrot.slane %v2499_v26, 1  ;;  %v11478_v7 = vrot.slane %v2275_v31, %v11046_v35 }
  0xc0   : > { %14335 = vst [vmem:[#allocation37_spill] sm:$0xff] %v11467_v33  ;;  %14336 = vst [vmem:[#allocation38_spill] sm:$0xff] %v11473_v24  ;;  %v9195_v3 = vcombine.high %v11447_v36, %v11460_v61  ;;  %v11483_v57 = vrot.slane %v9175_v9, %v11046_v35  ;;  %v11487_v13 = vrot.slane %v1646_v14, %v11046_v35  ;;  %v9177_v30 = vld.sshfl [vmem:[#allocation2 + $0x70] sm:$0x33 pattern:$0x75316420] }
  0xc1   : > { %14337 = vst [vmem:[#allocation39_spill] sm:$0xff] %v11478_v7  ;;  %v2312_v0 = vrot.slane %v2304_v8, %v11046_v35  ;;  %v11490_v47 = vrot.slane %v2321_v37, %v11046_v35  ;;  %v1684_v22 = vcombine.high %v9176_v62, %v9176_v62  ;;  %v2502_v26 = vsel %vm2442_vm15, %v2497_v34, %v2501_v1 }
  0xc2   : > { %14338 = vst [vmem:[#allocation40_spill] sm:$0xff] %v11487_v13  ;;  %v2305_v31 = vcombine.low %v11467_v33, %v11478_v7  ;;  %v2505_v11 = vor.u32 %v2503_v23, %v2501_v1  ;;  %v11496_v61 = vrot.slane %v9195_v3, %v11046_v35  ;;  %9746 = vmatprep.mubr.msk.bf16.mxu1 %vm2538_vm2, %v2502_v26 }
  0xc3   : > { %14339 = vst [vmem:[#allocation41_spill] sm:$0xff] %v11490_v47  ;;  %v2323_v9 = vcombine.low %v11473_v24, %v11487_v13  ;;  %v9196_v8 = vcombine.high %v11473_v24, %v11487_v13  ;;  %v11504_v14 = vrot.slane %v9176_v62, %v11046_v35  ;;  %v11507_v34 = vrot.slane %v1684_v22, %v11046_v35 }
  0xc4   : > { %14340 = vst [vmem:[#allocation42_spill] sm:$0xff] %v11496_v61  ;;  %v2319_v37 = vrot.slane %v2305_v31, %v11046_v35  ;;  %v2353_v23 = vcombine.low %v11490_v47, %v11496_v61  ;;  %v1708_v1 = vcombine.high %v9177_v30, %v9177_v30  ;;  %v11513_v3 = vrot.slane %v9177_v30, %v11046_v35  ;;  %v9178_v47 = vld.sshfl [vmem:[#allocation2 + $0x74] sm:$0x1 pattern:$0x75316420] }
  0xc5   : > { %14341 = vst [vmem:[#allocation43_spill] sm:$0xff] %v11504_v14  ;;  %v11516_v26 = vrot.slane %v2323_v9, %v11046_v35  ;;  %v11519_v7 = vrot.slane %v9196_v8, %v11046_v35  ;;  %v1699_v62 = vcombine.high %v11504_v14, %v11504_v14  ;;  %v1700_v22 = vcombine.high %v11507_v34, %v11507_v34 }
  0xc6   : > { %14342 = vst [vmem:[#allocation44_spill] sm:$0xff] %v11513_v3  ;;  %v2320_v31 = vcombine.low %v2312_v0, %v2319_v37  ;;  %9773 = vmatmul.mubr.msk.bf16.gmra.mrb[12].mxu0 %vm2538_vm2, %v2271_v48  ;;  %v2361_v61 = vrot.slane %v2353_v23, %v11046_v35  ;;  %v11528_v30 = vrot.slane %v1708_v1, %v11046_v35  ;;  %v11538_v48 = vld.sshfl [vmem:[#allocation2 + $0x78] sm:$0x33 pattern:$0x75316420] }
  0xc7   : > { %14343 = vst [vmem:[#allocation45_spill] sm:$0xff] %v11516_v26  ;;  %14344 = vst [vmem:[#allocation46_spill] sm:$0xff] %v11519_v7  ;;  %v1723_v9 = vcombine.high %v11513_v3, %v11513_v3  ;;  %v2354_v8 = vcombine.low %v11516_v26, %v11519_v7  ;;  %v2370_v33 = vcombine.low %v11483_v57, %v11504_v14 }
  0xc8   : > { %14345 = vst [vmem:[#allocation47_spill] sm:$0xff] %v11528_v30  ;;  %v2371_v13 = vcombine.low %v11507_v34, %v1699_v62  ;;  %v2372_v0 = vcombine.low %v1700_v22, %v11513_v3  ;;  %14346 = vst [vmem:[#allocation48_spill] sm:$0xff] %v11538_v48  ;;  %v2507_v37 = vshll.u32 %v2320_v31, 16  ;;  %v2511_v23 = vshrl.u32 %v2320_v31, 16  ;;  %9776 = vmatprep.mubr.msk.bf16.mxu0 %vm2538_vm2, %v2320_v31 }
  0xc9   : > { %v2373_v1 = vcombine.low %v11528_v30, %v1723_v9  ;;  %v1724_v24 = vcombine.high %v11528_v30, %v11528_v30  ;;  %v2368_v7 = vrot.slane %v2354_v8, %v11046_v35  ;;  %v11546_v26 = vrot.slane %v2370_v33, %v11046_v35 }
  0xca   : > { %v11549_v62 = vrot.slane %v2371_v13, %v11046_v35  ;;  %v11552_v22 = vrot.slane %v2372_v0, %v11046_v35  ;;  %v2509_v3 = vrot.slane %v2507_v37, 1  ;;  %v11558_v31 = vrot.slane %v9178_v47, %v11046_v35 }
  0xcb   : > { %14347 = vst [vmem:[#allocation49_spill] sm:$0xff] %v11546_v26  ;;  %v11555_v14 = vrot.slane %v2373_v1, %v11046_v35  ;;  %v11562_v9 = vrot.slane %v11538_v48, %v11046_v35  ;;  %v2369_v8 = vcombine.low %v2361_v61, %v2368_v7  ;;  %v1141_v13 = vcombine.high %v11050_v38, %v11050_v38 }
  0xcc   : > { %14348 = vst [vmem:[#allocation50_spill] sm:$0xff] %v11549_v62  ;;  %14349 = vst [vmem:[#allocation51_spill] sm:$0xff] %v11552_v22  ;;  %v2402_v33 = vcombine.low %v11546_v26, %v11549_v62  ;;  %v1142_v0 = vcombine.high %v11053_v39, %v11053_v39  ;;  %v2510_v37 = vsel %vm2442_vm15, %v2505_v11, %v2509_v3 }
  0xcd   : > { %14350 = vst [vmem:[#allocation52_spill] sm:$0xff] %v11555_v14  ;;  %14351 = vst [vmem:[#allocation53_spill] sm:$0xff] %v11558_v31  ;;  %v2513_v1 = vor.u32 %v2511_v23, %v2509_v3  ;;  %v2403_v47 = vcombine.low %v11552_v22, %v11555_v14  ;;  %v2419_v30 = vcombine.low %v1724_v24, %v11558_v31  ;;  %9747 = vmatmul.mubr.msk.bf16.gmra.mrb[8].mxu1 %vm2538_vm2, %v2510_v37 }
  0xce   : > { %v2515_v61 = vshll.u32 %v2369_v8, 16  ;;  %v2410_v7 = vrot.slane %v2402_v33, %v11046_v35  ;;  %v2519_v62 = vshrl.u32 %v2369_v8, 16  ;;  %v2433_v38 = vrot.slane %v11562_v9, %v11046_v35  ;;  %9777 = vmatmul.mubr.msk.bf16.gmra.mrb[16].mxu0 %vm2538_vm2, %v2369_v8 }
  0xcf   : > { %v2417_v26 = vrot.slane %v2403_v47, %v11046_v35  ;;  %v11581_v11 = vrot.slane %v2419_v30, %v11046_v35  ;;  %v1165_v3 = vcombine.high %v11056_v40, %v11056_v40  ;;  %v1166_v24 = vcombine.high %v11059_v41, %v11059_v41 }
  0xd0   : > { %v2517_v23 = vrot.slane %v2515_v61, 1  ;;  %v2872_v33 = vcombine.low %v11053_v39, %v1141_v13  ;;  %v2873_v37 = vcombine.low %v1142_v0, %v11056_v40  ;;  %v2921_v14 = vcombine.low %v11065_v43, %v11068_v44 }
  0xd1   : > { %v2418_v47 = vcombine.low %v2410_v7, %v2417_v26  ;;  %v2434_v8 = vcombine.low %v11581_v11, %v2433_v38  ;;  %v2713_v30 = vrot.slane %v11581_v11, %v11046_v35  ;;  %v2874_v22 = vcombine.low %v11059_v41, %v1165_v3 }
  0xd2   : > { %v2518_v48 = vsel %vm2442_vm15, %v2513_v1, %v2517_v23  ;;  %v2521_v31 = vor.u32 %v2519_v62, %v2517_v23  ;;  %v2875_v61 = vcombine.low %v1166_v24, %v11062_v42  ;;  %v2882_v39 = vrot.slane %v2872_v33, %v11046_v35 }
  0xd3   : > { %9750 = vmatprep.mubr.msk.bf16.mxu1 %vm2538_vm2, %v2518_v48  ;;  %v2523_v40 = vshll.u32 %v2418_v47, 16  ;;  %v2441_v13 = vrot.slane %v2434_v8, %v11046_v35  ;;  %v2527_v26 = vshrl.u32 %v2418_v47, 16  ;;  %9780 = vmatprep.mubr.msk.bf16.mxu0 %vm2538_vm2, %v2418_v47  ;;  %v2889_v0 = vrot.slane %v2873_v37, %v11046_v35 }
  0xd4   : > { %v2896_v7 = vrot.slane %v2874_v22, %v11046_v35  ;;  %v2903_v41 = vrot.slane %v2875_v61, %v11046_v35  ;;  %v9222_v62 = vcombine.high %v11065_v43, %v11068_v44  ;;  %v2923_v42 = vcombine.low %v11071_v45, %v11074_v46 }
  0xd5   : > { %v2525_v1 = vrot.slane %v2523_v40, 1  ;;  %v2531_v48 = vshll.u32 %v2441_v13, 16  ;;  %v2535_v38 = vshrl.u32 %v2441_v13, 16  ;;  %v2904_v3 = vcombine.low %v2882_v39, %v2889_v0 }
  0xd6   : > { %v2905_v24 = vcombine.low %v2896_v7, %v2903_v41  ;;  %v9223_v23 = vcombine.high %v11071_v45, %v11074_v46  ;;  %v2931_v33 = vrot.slane %v2921_v14, %v11046_v35  ;;  %v2938_v22 = vrot.slane %v9222_v62, %v11046_v35  ;;  %9781 = vmatmul.mubr.msk.bf16.gmra.mrb[20].mxu0 %vm2538_vm2, %v2713_v30 }
  0xd7   : > { %v2526_v37 = vsel %vm2442_vm15, %v2521_v31, %v2525_v1  ;;  %v2529_v47 = vor.u32 %v2527_v26, %v2525_v1  ;;  %v2533_v8 = vrot.slane %v2531_v48, 1  ;;  %v2912_v43 = vrot.slane %v2904_v3, %v11046_v35 }
  0xd8   : > { %9751 = vmatmul.mubr.msk.bf16.gmra.mrb[12].mxu1 %vm2538_vm2, %v2526_v37  ;;  %v2919_v44 = vrot.slane %v2905_v24, %v11046_v35  ;;  %v2945_v61 = vrot.slane %v2923_v42, %v11046_v35  ;;  %v2952_v45 = vrot.slane %v9223_v23, %v11046_v35  ;;  %v2953_v46 = vcombine.low %v2931_v33, %v2938_v22  ;;  %v11671_v37 = vld [vmem:[%s14192_s1 + $0x8] sm:$0x3] }
  0xd9   : > { %v2534_v14 = vsel %vm2442_vm15, %v2529_v47, %v2533_v8  ;;  %v2537_v39 = vor.u32 %v2535_v38, %v2533_v8  ;;  %v1265_v31 = vcombine.high %v11116_v19, %v11116_v19  ;;  %v1266_v30 = vcombine.high %v11126_v17, %v11126_v17 }
  0xda   : > { %9754 = vmatprep.mubr.msk.bf16.mxu1 %vm2538_vm2, %v2534_v14  ;;  %v2920_v40 = vcombine.low %v2912_v43, %v2919_v44  ;;  %v2954_v13 = vcombine.low %v2945_v61, %v2952_v45  ;;  %v2961_v26 = vrot.slane %v2953_v46, %v11046_v35  ;;  %v1289_v0 = vcombine.high %v11123_v16, %v11123_v16 }
  0xdb   : > { %v2970_v7 = vcombine.low %v11103_v5, %v11116_v19  ;;  %v2971_v41 = vcombine.low %v11126_v17, %v1265_v31  ;;  %v2972_v62 = vcombine.low %v1266_v30, %v11123_v16  ;;  %v1290_v42 = vcombine.high %v11129_v18, %v11129_v18 }
  0xdc   : > { %9786 = vmatprep.mubr.msk.bf16.mxu0 %vm2538_vm2, %v2920_v40  ;;  %v2968_v1 = vrot.slane %v2954_v13, %v11046_v35  ;;  %v2973_v48 = vcombine.low %v11129_v18, %v1289_v0  ;;  %v3020_v38 = vcombine.low %v11165_v50, %v11170_v54  ;;  %v9224_v3 = vcombine.high %v11165_v50, %v11170_v54 }
  0xdd   : > { %v2980_v5 = vrot.slane %v2970_v7, %v11046_v35  ;;  %v11643_v19 = vrot.slane %v2971_v41, %v11046_v35  ;;  %v11646_v16 = vrot.slane %v2972_v62, %v11046_v35  ;;  %v3019_v17 = vcombine.low %v1290_v42, %v11140_v25 }
  0xde   : > { %v11649_v24 = vcombine.low %v2961_v26, %v2968_v1  ;;  %v11652_v18 = vrot.slane %v2973_v48, %v11046_v35  ;;  %v3022_v23 = vcombine.low %v11185_v2, %v11201_v20  ;;  %v11657_v50 = vrot.slane %v3020_v38, %v11046_v35 }
  0xdf   : > { %v3002_v54 = vcombine.low %v2980_v5, %v11643_v19  ;;  %v11661_v33 = vrot.slane %v3019_v17, %v11046_v35  ;;  %v11664_v22 = vrot.slane %v9224_v3, %v11046_v35  ;;  %v1389_v25 = vcombine.high %v11226_v53, %v11226_v53 }
  0xe0   : > { %9755 = vmatmul.mubr.msk.bf16.gmra.mrb[16].mxu1 %vm2538_vm2, %v2537_v39  ;;  %9787 = vmatmul.mubr.msk.bf16.vlgmr.msra.gmra.mrb[0].mxu0 %vm2538_vm2, %v11649_v24  ;;  %v3003_v47 = vcombine.low %v11646_v16, %v11652_v18  ;;  %v11679_v8 = vrot.slane %v3022_v23, %v11046_v35  ;;  %v1390_v43 = vcombine.high %v11236_v63, %v11236_v63 }
  0xe1   : > { %9811 = vmatpush3.bf16.msra.mxu0 %v11425_v15  ;;  %v3010_v44 = vrot.slane %v3002_v54, %v11046_v35  ;;  %v3051_v61 = vcombine.low %v11661_v33, %v11657_v50  ;;  %v9225_v46 = vcombine.high %v11185_v2, %v11201_v20  ;;  %v3069_v31 = vcombine.low %v11212_v27, %v11226_v53 }
  0xe2   : > { %v3017_v14 = vrot.slane %v3003_v47, %v11046_v35  ;;  %v3052_v39 = vcombine.low %v11664_v22, %v11679_v8  ;;  %v3070_v15 = vcombine.low %v11236_v63, %v1389_v25  ;;  %10475 = vmatprep.subr.msk.bf16.mxu0 %vm2575_vm14, %v11671_v37  ;;  %v3071_v40 = vcombine.low %v1390_v43, %v11240_v4 }
  0xe3   : > { %v3059_v30 = vrot.slane %v3051_v61, %v11046_v35  ;;  %v11702_v13 = vrot.slane %v9225_v46, %v11046_v35  ;;  %v11708_v26 = vrot.slane %v3069_v31, %v11046_v35  ;;  %v1413_v0 = vcombine.high %v11240_v4, %v11240_v4 }
  0xe4   : > { %v11704_v2 = vcombine.low %v3010_v44, %v3017_v14  ;;  %v3066_v20 = vrot.slane %v3052_v39, %v11046_v35  ;;  %v11711_v27 = vrot.slane %v3070_v15, %v11046_v35  ;;  %v11714_v53 = vrot.slane %v3071_v40, %v11046_v35 }
  0xe5   : > { %v1414_v7 = vcombine.high %v11256_v28, %v11256_v28  ;;  %v3100_v62 = vcombine.low %v11702_v13, %v11708_v26  ;;  %v3119_v42 = vcombine.low %v11277_v29, %v11282_v59  ;;  %v9226_v1 = vcombine.high %v11277_v29, %v11282_v59 }
  0xe6   : > { %9790 = vmatprep.mubr.msk.bf16.mxu0 %vm2538_vm2, %v11704_v2  ;;  %v11724_v41 = vcombine.low %v3059_v30, %v3066_v20  ;;  %v3101_v4 = vcombine.low %v11711_v27, %v11714_v53  ;;  %v3117_v48 = vcombine.low %v11256_v28, %v1413_v0  ;;  %v1513_v29 = vcombine.high %v11329_v12, %v11329_v12 }
  0xe7   : > { %v3118_v38 = vcombine.low %v1414_v7, %v11265_v49  ;;  %v3108_v3 = vrot.slane %v3100_v62, %v11046_v35  ;;  %v11740_v5 = vrot.slane %v3119_v42, %v11046_v35  ;;  %v11743_v17 = vrot.slane %v9226_v1, %v11046_v35 }
  0xe8   : > { %9791 = vmatmul.mubr.msk.bf16.gmra.mrb[4].mxu0 %vm2538_vm2, %v11724_v41  ;;  %v3115_v59 = vrot.slane %v3101_v4, %v11046_v35  ;;  %v11749_v28 = vrot.slane %v3117_v48, %v11046_v35  ;;  %v3166_v23 = vcombine.low %v11310_v60, %v11321_v6  ;;  %v9227_v25 = vcombine.high %v11310_v60, %v11321_v6 }
  0xe9   : > { %v11752_v49 = vrot.slane %v3118_v38, %v11046_v35  ;;  %v3150_v54 = vcombine.low %v11740_v5, %v11743_v17  ;;  %v3168_v47 = vcombine.low %v11326_v58, %v11329_v12  ;;  %v3169_v43 = vcombine.low %v11339_v51, %v1513_v29  ;;  %v14352_v38 = vld [vmem:[#allocation32_spill] sm:$0xff] }
  0xea   : > { %v11763_v44 = vcombine.low %v3108_v3, %v3115_v59  ;;  %v11768_v46 = vrot.slane %v3166_v23, %v11046_v35  ;;  %v1514_v14 = vcombine.high %v11339_v51, %v11339_v51  ;;  %v11774_v60 = vrot.slane %v9227_v25, %v11046_v35 }
  0xeb   : > { %v3149_v61 = vcombine.low %v11749_v28, %v11752_v49  ;;  %v3164_v39 = vrot.slane %v3150_v54, %v11046_v35  ;;  %v11777_v6 = vrot.slane %v3168_v47, %v11046_v35  ;;  %v11780_v58 = vrot.slane %v3169_v43, %v11046_v35 }
  0xec   : > { %9794 = vmatprep.mubr.msk.bf16.mxu0 %vm2538_vm2, %v11763_v44  ;;  %v1537_v31 = vcombine.high %v11350_v32, %v11350_v32  ;;  %v1538_v51 = vcombine.high %v11375_v56, %v11375_v56  ;;  %v3215_v15 = vcombine.low %v1514_v14, %v11350_v32  ;;  %v3198_v30 = vcombine.low %v11768_v46, %v11774_v60 }
  0xed   : > { %v3157_v12 = vrot.slane %v3149_v61, %v11046_v35  ;;  %v3199_v40 = vcombine.low %v11777_v6, %v11780_v58  ;;  %v3218_v20 = vcombine.low %v11385_v55, %v11415_v21  ;;  %v9228_v0 = vcombine.high %v11385_v55, %v11415_v21  ;;  %v14353_v21 = vld [vmem:[#allocation33_spill] sm:$0xff] }
  0xee   : > { %v3216_v62 = vcombine.low %v11375_v56, %v1537_v31  ;;  %v3217_v42 = vcombine.low %v1538_v51, %v11378_v52  ;;  %v11803_v32 = vrot.slane %v3215_v15, %v11046_v35  ;;  %v3206_v1 = vrot.slane %v3198_v30, %v11046_v35  ;;  %v14358_v51 = vld [vmem:[#allocation40_spill] sm:$0xff] }
  0xef   : > { %v11798_v7 = vcombine.low %v3157_v12, %v3164_v39  ;;  %v3213_v4 = vrot.slane %v3199_v40, %v11046_v35  ;;  %v11808_v48 = vrot.slane %v3218_v20, %v11046_v35  ;;  %v3265_v3 = vcombine.low %v14352_v38, %v11440_v10  ;;  %v14356_v39 = vld [vmem:[#allocation36_spill] sm:$0xff]  ;;  %v14357_v12 = vld [vmem:[#allocation38_spill] sm:$0xff] }
  0xf0   : > { %v11815_v56 = vrot.slane %v3216_v62, %v11046_v35  ;;  %v11818_v52 = vrot.slane %v3217_v42, %v11046_v35  ;;  %v9229_v55 = vcombine.high %v14352_v38, %v11440_v10  ;;  %v3267_v29 = vcombine.low %v14353_v21, %v11447_v36  ;;  %v14360_v21 = vld [vmem:[#allocation43_spill] sm:$0xff] }
  0xf1   : > { %9795 = vmatmul.mubr.msk.bf16.gmra.mrb[8].mxu0 %vm2538_vm2, %v11798_v7  ;;  %v11824_v59 = vcombine.low %v3206_v1, %v3213_v4  ;;  %v11827_v23 = vrot.slane %v9228_v0, %v11046_v35  ;;  %v11830_v54 = vrot.slane %v3265_v3, %v11046_v35  ;;  %v1637_v25 = vcombine.high %v11447_v36, %v11447_v36 }
  0xf2   : > { %v3247_v47 = vcombine.low %v11803_v32, %v11815_v56  ;;  %v3248_v10 = vcombine.low %v11818_v52, %v11808_v48  ;;  %v11839_v43 = vrot.slane %v9229_v55, %v11046_v35  ;;  %v11842_v61 = vrot.slane %v3267_v29, %v11046_v35 }
  0xf3   : > { %14354 = vst [vmem:[#allocation32_spill] sm:$0xff] %v11830_v54  ;;  %9798 = vmatprep.mubr.msk.bf16.mxu0 %vm2538_vm2, %v11824_v59  ;;  %v3296_v14 = vcombine.low %v11827_v23, %v11830_v54  ;;  %v1638_v36 = vcombine.high %v14356_v39, %v14356_v39  ;;  %v1661_v31 = vcombine.high %v14357_v12, %v14357_v12  ;;  %v3972_v54 = vsel %vm2575_vm14, %v11671_v37, 0 }
  0xf4   : > { %14355 = vst [vmem:[#allocation33_spill] sm:$0xff] %v11842_v61  ;;  %v1662_v15 = vcombine.high %v14358_v51, %v14358_v51  ;;  %v3255_v30 = vrot.slane %v3247_v47, %v11046_v35  ;;  %v3262_v40 = vrot.slane %v3248_v10, %v11046_v35  ;;  %v3297_v20 = vcombine.low %v11839_v43, %v11842_v61 }
  0xf5   : > { %v3313_v0 = vcombine.low %v14356_v39, %v1637_v25  ;;  %v3304_v62 = vrot.slane %v3296_v14, %v11046_v35  ;;  %v3314_v42 = vcombine.low %v1638_v36, %v14357_v12  ;;  %v3315_v1 = vcombine.low %v14358_v51, %v1661_v31  ;;  %v14364_v39 = vld [vmem:[#allocation47_spill] sm:$0xff]  ;;  %v14365_v36 = vld [vmem:[#allocation44_spill] sm:$0xff] }
  0xf6   : > { %v3316_v4 = vcombine.low %v1662_v15, %v11483_v57  ;;  %v11863_v38 = vcombine.low %v3255_v30, %v3262_v40  ;;  %v3311_v3 = vrot.slane %v3297_v20, %v11046_v35  ;;  %v3362_v29 = vcombine.low %v14360_v21, %v11507_v34 }
  0xf7   : > { %v11867_v55 = vrot.slane %v3313_v0, %v11046_v35  ;;  %v11872_v25 = vrot.slane %v3314_v42, %v11046_v35  ;;  %v11875_v47 = vrot.slane %v3315_v1, %v11046_v35  ;;  %v9230_v57 = vcombine.high %v14360_v21, %v11507_v34 }
  0xf8   : > { %v11878_v10 = vrot.slane %v3316_v4, %v11046_v35  ;;  %v11884_v14 = vcombine.low %v3304_v62, %v3311_v3  ;;  %v3364_v12 = vcombine.low %v14365_v36, %v14364_v39  ;;  %v9231_v31 = vcombine.high %v14365_v36, %v14364_v39  ;;  %v14370_v4 = vld [vmem:[#allocation53_spill] sm:$0xff] }
  0xf9   : > { %14359 = vst [vmem:[#allocation36_spill] sm:$0xff] %v11867_v55  ;;  %14361 = vst [vmem:[#allocation38_spill] sm:$0xff] %v11872_v25  ;;  %9799 = vmatmul.mubr.msk.bf16.gmra.mrb[12].mxu0 %vm2538_vm2, %v11863_v38  ;;  %v11891_v51 = vrot.slane %v3362_v29, %v11046_v35  ;;  %v3345_v15 = vcombine.low %v11867_v55, %v11872_v25  ;;  %v11898_v30 = vrot.slane %v9230_v57, %v11046_v35 }
  0xfa   : > { %14362 = vst [vmem:[#allocation40_spill] sm:$0xff] %v11875_v47  ;;  %14363 = vst [vmem:[#allocation43_spill] sm:$0xff] %v11878_v10  ;;  %v3346_v34 = vcombine.low %v11875_v47, %v11878_v10  ;;  %9802 = vmatprep.mubr.msk.bf16.mxu0 %vm2538_vm2, %v11884_v14  ;;  %v11903_v40 = vrot.slane %v3364_v12, %v11046_v35  ;;  %v11906_v20 = vrot.slane %v9231_v31, %v11046_v35 }
  0xfb   : > { %14366 = vst [vmem:[#allocation47_spill] sm:$0xff] %v11891_v51  ;;  %14367 = vst [vmem:[#allocation44_spill] sm:$0xff] %v11898_v30  ;;  %v3353_v0 = vrot.slane %v3345_v15, %v11046_v35  ;;  %v3394_v42 = vcombine.low %v11891_v51, %v11898_v30  ;;  %v3411_v3 = vcombine.low %v14370_v4, %v11562_v9  ;;  %v3851_v39 = vshrl.u32 %v11649_v24, 16 }
  0xfc   : > { %14368 = vst [vmem:[#allocation54_spill] sm:$0xff] %v11903_v40  ;;  %14369 = vst [vmem:[#allocation55_spill] sm:$0xff] %v11906_v20  ;;  %v3360_v62 = vrot.slane %v3346_v34, %v11046_v35  ;;  %v3395_v1 = vcombine.low %v11903_v40, %v11906_v20  ;;  %v3853_v36 = vshll.u32 %v11649_v24, 16  ;;  %v3857_v12 = vshll.u32 %v11704_v2, 16 }
  0xfd   : > { %v3402_v29 = vrot.slane %v3394_v42, %v11046_v35  ;;  %v3861_v31 = vshrl.u32 %v11704_v2, 16  ;;  %v11929_v34 = vrot.slane %v3411_v3, %v11046_v35  ;;  %v3864_v42 = vshll.u32 %v11724_v41, 16 }
  0xfe   : > { %v11916_v21 = vcombine.low %v3353_v0, %v3360_v62  ;;  %v3409_v57 = vrot.slane %v3395_v1, %v11046_v35  ;;  %v3855_v0 = vrot.slane %v3853_v36, 1  ;;  %v3859_v62 = vrot.slane %v3857_v12, 1 }
  0xff   : > { %v3866_v63 = vrot.slane %v3864_v42, 1  ;;  %v3425_v45 = vrot.slane %v11929_v34, %v11046_v35  ;;  %v3868_v20 = vshrl.u32 %v11724_v41, 16  ;;  %v3875_v36 = vshrl.u32 %v11763_v44, 16 }
 0x100   : > { %v11926_v15 = vcombine.low %v3402_v29, %v3409_v57  ;;  %v3856_v1 = vor.u32 %v3855_v0, %v3851_v39  ;;  %v3863_v4 = vor.u32 %v3861_v31, %v3859_v62  ;;  %v3871_v29 = vshll.u32 %v11763_v44, 16 }
 0x101   : > { %9803 = vmatmul.mubr.msk.bf16.gmra.mrb[16].mxu0 %vm2538_vm2, %v11916_v21  ;;  %v3870_v12 = vor.u32 %v3868_v20, %v3866_v63  ;;  %v3878_v39 = vshll.u32 %v11798_v7, 16  ;;  %v3882_v31 = vshrl.u32 %v11798_v7, 16  ;;  %v3885_v0 = vshll.u32 %v11824_v59, 16 }
 0x102   : > { %9806 = vmatprep.mubr.msk.bf16.mxu0 %vm2538_vm2, %v11926_v15  ;;  %v11939_v3 = vsel %vm2442_vm15, %v3856_v1, %v3859_v62  ;;  %v11942_v57 = vsel %vm2442_vm15, %v3863_v4, %v3866_v63  ;;  %v3873_v30 = vrot.slane %v3871_v29, 1  ;;  %v3889_v42 = vshrl.u32 %v11824_v59, 16 }
 0x103   : > { %v3892_v4 = vshll.u32 %v11863_v38, 16  ;;  %v3880_v63 = vrot.slane %v3878_v39, 1  ;;  %v3887_v20 = vrot.slane %v3885_v0, 1  ;;  %v3896_v29 = vshrl.u32 %v11863_v38, 16 }
 0x104   : > { %v11951_v62 = vsel %vm2442_vm15, %v3870_v12, %v3873_v30  ;;  %v3877_v1 = vor.u32 %v3875_v36, %v3873_v30  ;;  %v3899_v40 = vshll.u32 %v11884_v14, 16  ;;  %v3903_v51 = vshrl.u32 %v11884_v14, 16 }
 0x105   : > { %v3894_v10 = vrot.slane %v3892_v4, 1  ;;  %v3910_v12 = vshrl.u32 %v11916_v21, 16  ;;  %v3884_v36 = vor.u32 %v3882_v31, %v3880_v63  ;;  %v3891_v25 = vor.u32 %v3889_v42, %v3887_v20 }
 0x106   : > { %v11962_v30 = vsel %vm2442_vm15, %v3877_v1, %v3880_v63  ;;  %v3901_v47 = vrot.slane %v3899_v40, 1  ;;  %v3913_v0 = vshll.u32 %v11926_v15, 16  ;;  %v9270_v40 = vld [vmem:[%s14192_s1 + $0xa] sm:$0x3] }
 0x107   : > { %v11966_v61 = vsel %vm2442_vm15, %v3884_v36, %v3887_v20  ;;  %v11969_v4 = vsel %vm2442_vm15, %v3891_v25, %v3894_v10  ;;  %v14371_v25 = vld [vmem:[#allocation48_spill] sm:$0xff] }
 0x108   : > { %v3905_v55 = vor.u32 %v3903_v51, %v3901_v47  ;;  %v11976_v42 = vrot.slane %v3913_v0, 1  ;;  %v14373_v51 = vld [vmem:[#allocation10_spill] sm:$0xff]  ;;  %v1761_v0 = vcombine.high %v11562_v9, %v11562_v9 }
 0x109   : > { %9807 = vmatmul.mubr.msk.bf16.gmra.mrb[24].mxu0 %vm2538_vm2, %v3425_v45  ;;  %v3906_v45 = vshll.u32 %v11916_v21, 16 }
 0x10a   : > { %9812 = vmatprep.mubr.msk.bf16.mxu0 %vm2538_vm2, %v11649_v24  ;;  %v3898_v24 = vor.u32 %v3896_v29, %v3894_v10  ;;  %v1746_v10 = vcombine.high %v14371_v25, %v14371_v25  ;;  %v9180_v29 = vld.sshfl [vmem:[#allocation2 + $0x7c] sm:$0x33 pattern:$0x75316420] }
 0x10b   : > { %v3908_v39 = vrot.slane %v3906_v45, 1  ;;  %v14376_v45 = vld [vmem:[#allocation12_spill] sm:$0xff] }
 0x10c   : > { %v11974_v1 = vsel %vm2442_vm15, %v3898_v24, %v3901_v47  ;;  %v14372_v47 = vld [vmem:[#allocation9_spill] sm:$0xff]  ;;  %v1760_v24 = vrot.slane %v1746_v10, %v11046_v35 }
 0x10d   : > { %v3912_v31 = vor.u32 %v3910_v12, %v3908_v39  ;;  %v11982_v63 = vsel %vm2442_vm15, %v3905_v55, %v3908_v39  ;;  %v14374_v20 = vcombine.low %v14372_v47, %v14373_v51 }
 0x10e   : > { %v3618_v51 = vcombine.low %v1760_v24, %v1761_v0 }
 0x10f   : > { %v11990_v37 = vsel %vm2442_vm15, %v3912_v31, %v11976_v42  ;;  %v4152_v55 = vrot.slane %v14374_v20, %v11046_v35  ;;  %v1762_v31 = vcombine.high %v1760_v24, %v1760_v24 }
 0x111   : > { %9813 = vmatmul.mubr.msk.bf16.vlgmr.msra.gmra.mrb[0].mxu0 %vm2538_vm2, %v11704_v2  ;;  %v14375_v2 = vld [vmem:[#allocation11_spill] sm:$0xff] }
 0x112   : > { %9837 = vmatpush3.bf16.msra.mxu0 %v3972_v54  ;;  %9816 = vmatprep.mubr.msk.bf16.mxu0 %vm2538_vm2, %v11724_v41  ;;  %v14377_v12 = vcombine.low %v14375_v2, %v14376_v45  ;;  %v1770_v54 = vcombine.high %v9180_v29, %v9180_v29  ;;  %v1777_v41 = vrot.slane %v9180_v29, %v11046_v35 }
 0x113   : > { %10476 = vmatprep.subr.msk.bf16.mxu0 %vm2575_vm14, %v9270_v40  ;;  %v9271_v29 = vcombine.high %v11562_v9, %v1760_v24 }
 0x114   : > { %v4159_v36 = vrot.slane %v14377_v12, %v11046_v35  ;;  %v1784_v25 = vrot.slane %v1770_v54, %v11046_v35  ;;  %v1785_v47 = vcombine.high %v1777_v41, %v1777_v41  ;;  %v3619_v10 = vcombine.low %v1762_v31, %v1777_v41 }
 0x115   : > { %v4314_v12 = vrot.slane %v9271_v29, %v11046_v35 }
 0x116   : > { %v12004_v39 = vcombine.low %v4152_v55, %v4159_v36  ;;  %v3620_v20 = vcombine.low %v1784_v25, %v1785_v47  ;;  %v4297_v55 = vcombine.low %v11562_v9, %v1760_v24  ;;  %v4299_v2 = vcombine.low %v1777_v41, %v1784_v25 }
 0x117   : > { %v9272_v45 = vcombine.high %v1777_v41, %v1784_v25  ;;  %v12024_v36 = vrot.slane %v3619_v10, %v11046_v35 }
 0x118   : > { %v12029_v9 = vrot.slane %v3620_v20, %v11046_v35  ;;  %v4321_v24 = vrot.slane %v4299_v2, %v11046_v35  ;;  %v1786_v20 = vcombine.high %v1784_v25, %v1784_v25  ;;  %v9285_v25 = vld [vmem:[%s14192_s1 + $0xc] sm:$0x3] }
 0x119   : > { %9817 = vmatmul.mubr.msk.bf16.gmra.mrb[4].mxu0 %vm2538_vm2, %v11763_v44  ;;  %v4307_v44 = vrot.slane %v4297_v55, %v11046_v35  ;;  %v4328_v54 = vrot.slane %v9272_v45, %v11046_v35 }
 0x11a   : > { %9820 = vmatprep.mubr.msk.bf16.mxu0 %vm2538_vm2, %v11798_v7  ;;  %v12021_v7 = vrot.slane %v3618_v51, %v11046_v35  ;;  %v3643_v47 = vcombine.low %v12024_v36, %v12029_v9  ;;  %v9181_v51 = vld.sshfl [vmem:[#allocation2 + $0x80] sm:$0x1 pattern:$0x75316420] }
 0x11b   : > { %v4329_v41 = vcombine.low %v4307_v44, %v4314_v12  ;;  %v4330_v0 = vcombine.low %v4321_v24, %v4328_v54  ;;  %v12044_v55 = vrot.slane %v9181_v51, %v11046_v35  ;;  %v12071_v24 = vld.sshfl [vmem:[#allocation2 + $0x84] sm:$0x33 pattern:$0x75316420]  ;;  %v14379_v51 = vld [vmem:[#allocation5_spill] sm:$0xff] }
 0x11c   : > { %v3642_v31 = vcombine.low %v11929_v34, %v12021_v7  ;;  %v3657_v2 = vrot.slane %v3643_v47, %v11046_v35  ;;  %v14378_v47 = vld [vmem:[#allocation6_spill] sm:$0xff] }
 0x11d   : > { %v3659_v45 = vcombine.low %v1786_v20, %v12044_v55  ;;  %v14380_v20 = vld [vmem:[#allocation8_spill] sm:$0xff] }
 0x11e   : > { %v3650_v29 = vrot.slane %v3642_v31, %v11046_v35 }
 0x11f   : > { %v12054_v12 = vrot.slane %v3659_v45, %v11046_v35 }
 0x120   : > { %v3658_v44 = vcombine.low %v3650_v29, %v3657_v2 }
 0x121   : > { %9821 = vmatmul.mubr.msk.bf16.gmra.mrb[8].mxu0 %vm2538_vm2, %v11824_v59  ;;  %v4337_v59 = vrot.slane %v4329_v41, %v11046_v35  ;;  %v3917_v41 = vshrl.u32 %v11926_v15, 16 }
 0x122   : > { %9824 = vmatprep.mubr.msk.bf16.mxu0 %vm2538_vm2, %v11863_v38  ;;  %v4344_v38 = vrot.slane %v4330_v0, %v11046_v35  ;;  %v3920_v54 = vshll.u32 %v3658_v44, 16 }
 0x124   : > { %v12039_v10 = vcombine.low %v4337_v59, %v4344_v38  ;;  %v3919_v59 = vor.u32 %v3917_v41, %v11976_v42  ;;  %v4127_v38 = vcombine.low %v14379_v51, %v14378_v47  ;;  %v14390_v51 = vld [vmem:[#allocation22_spill] sm:$0xff] }
 0x129   : > { %9825 = vmatmul.mubr.msk.bf16.gmra.mrb[12].mxu0 %vm2538_vm2, %v11884_v14  ;;  %v3673_v14 = vrot.slane %v12054_v12, %v11046_v35 }
 0x12a   : > { %9828 = vmatprep.mubr.msk.bf16.mxu0 %vm2538_vm2, %v11916_v21  ;;  %v4398_v21 = vsel %vm2575_vm14, %v9270_v40, 0 }
 0x131   : > { %9829 = vmatmul.mubr.msk.bf16.gmra.mrb[16].mxu0 %vm2538_vm2, %v11926_v15  ;;  %v14381_v15 = vld [vmem:[#allocation7_spill] sm:$0xff] }
 0x132   : > { %9832 = vmatprep.mubr.msk.bf16.mxu0 %vm2538_vm2, %v3658_v44  ;;  %v4128_v29 = vcombine.low %v14381_v15, %v14380_v20  ;;  %v14392_v15 = vld [vmem:[#allocation24_spill] sm:$0xff] }
 0x134   : > { %v4142_v42 = vrot.slane %v4128_v29, %v11046_v35  ;;  %v14393_v29 = vld [vmem:[#allocation23_spill] sm:$0xff] }
 0x139   : > { %9833 = vmatmul.mubr.msk.bf16.gmra.mrb[28].mxu0 %vm2538_vm2, %v3673_v14  ;;  %v14382_v14 = vld [vmem:[#allocation14_spill] sm:$0xff] }
 0x13a   : > { %9838 = vmatprep.mubr.msk.bf16.mxu0 %vm2538_vm2, %v11939_v3  ;;  %v12075_v3 = vrot.slane %v12071_v24, %v11046_v35 }
 0x141   : > { %9839 = vmatmul.mubr.msk.bf16.vlgmr.msra.gmra.mrb[0].mxu0 %vm2538_vm2, %v11942_v57  ;;  %v3842_v57 = vrot.slane %v12075_v3, %v11046_v35 }
 0x142   : > { %9863 = vmatpush3.bf16.msra.mxu0 %v4398_v21  ;;  %9842 = vmatprep.mubr.msk.bf16.mxu0 %vm2538_vm2, %v11951_v62  ;;  %v14383_v21 = vld [vmem:[#allocation13_spill] sm:$0xff] }
 0x143   : > { %10477 = vmatprep.subr.msk.bf16.mxu0 %vm2575_vm14, %v9285_v25  ;;  %v3843_v40 = vcombine.low %v12054_v12, %v3842_v57  ;;  %v4161_v57 = vcombine.low %v14383_v21, %v14382_v14 }
 0x145   : > { %v3850_v62 = vrot.slane %v3843_v40, %v11046_v35  ;;  %v14384_v40 = vld [vmem:[#allocation16_spill] sm:$0xff] }
 0x147   : > { %v3928_v0 = vshll.u32 %v3850_v62, 16 }
 0x149   : > { %9843 = vmatmul.mubr.msk.bf16.gmra.mrb[4].mxu0 %vm2538_vm2, %v11962_v30  ;;  %v3924_v30 = vshrl.u32 %v3658_v44, 16  ;;  %v3930_v31 = vrot.slane %v3928_v0, 1  ;;  %v14386_v0 = vld [vmem:[#allocation18_spill] sm:$0xff] }
 0x14a   : > { %9846 = vmatprep.mubr.msk.bf16.mxu0 %vm2538_vm2, %v11966_v61  ;;  %v3922_v61 = vrot.slane %v3920_v54, 1  ;;  %v14385_v54 = vld [vmem:[#allocation15_spill] sm:$0xff] }
 0x14b   : > { %v4162_v41 = vcombine.low %v14385_v54, %v14384_v40  ;;  %v14395_v40 = vld [vmem:[#allocation26_spill] sm:$0xff]  ;;  %v14396_v54 = vld [vmem:[#allocation25_spill] sm:$0xff] }
 0x151   : > { %9847 = vmatmul.mubr.msk.bf16.gmra.mrb[8].mxu0 %vm2538_vm2, %v11969_v4  ;;  %v3926_v4 = vor.u32 %v3924_v30, %v3922_v61  ;;  %v4176_v30 = vrot.slane %v4162_v41, %v11046_v35  ;;  %v4212_v41 = vcombine.low %v14396_v54, %v14395_v40  ;;  %v14408_v54 = vld [vmem:[#allocation45_spill] sm:$0xff] }
 0x152   : > { %9850 = vmatprep.mubr.msk.bf16.mxu0 %vm2538_vm2, %v11974_v1  ;;  %v3923_v1 = vsel %vm2442_vm15, %v3919_v59, %v3922_v61  ;;  %v14387_v61 = vld [vmem:[#allocation17_spill] sm:$0xff] }
 0x153   : > { %v3931_v2 = vsel %vm2442_vm15, %v3926_v4, %v3930_v31  ;;  %v4178_v59 = vcombine.low %v14387_v61, %v14386_v0  ;;  %v14388_v4 = vld [vmem:[#allocation20_spill] sm:$0xff]  ;;  %v14399_v61 = vcombine.low %v11679_v8, %v11702_v13 }
 0x159   : > { %9851 = vmatmul.mubr.msk.bf16.gmra.mrb[12].mxu0 %vm2538_vm2, %v11982_v63  ;;  %v3932_v63 = vshrl.u32 %v3850_v62, 16  ;;  %v4169_v62 = vrot.slane %v4161_v57, %v11046_v35 }
 0x15a   : > { %9854 = vmatprep.mubr.msk.bf16.mxu0 %vm2538_vm2, %v11990_v37  ;;  %v4135_v37 = vrot.slane %v4127_v38, %v11046_v35  ;;  %v14391_v38 = vld [vmem:[#allocation21_spill] sm:$0xff] }
 0x15b   : > { %v3934_v45 = vor.u32 %v3932_v63, %v3930_v31  ;;  %v14389_v31 = vld [vmem:[#allocation19_spill] sm:$0xff]  ;;  %v12117_v47 = vcombine.low %v4169_v62, %v4176_v30  ;;  %v4195_v20 = vcombine.low %v14391_v38, %v14390_v51  ;;  %v4616_v63 = vsel %vm2575_vm14, %v9285_v25, 0  ;;  %v14397_v62 = vld [vmem:[#allocation28_spill] sm:$0xff] }
 0x15c   : > { %v4143_v44 = vcombine.low %v4135_v37, %v4142_v42  ;;  %v9298_v37 = vld [vmem:[%s14192_s1 + $0xe] sm:$0x3]  ;;  %v4186_v42 = vrot.slane %v4178_v59, %v11046_v35  ;;  %v14394_v25 = vcombine.low %v11657_v50, %v11664_v22  ;;  %v14398_v30 = vld [vmem:[#allocation27_spill] sm:$0xff]  ;;  %v12152_v59 = vrot.slane %v14399_v61, %v11046_v35 }
 0x15d   : > { %v4213_v0 = vcombine.low %v14398_v30, %v14397_v62  ;;  %v14401_v50 = vld [vmem:[#allocation29_spill] sm:$0xff]  ;;  %v14403_v51 = vld [vmem:[#allocation31_spill] sm:$0xff] }
 0x15e   : > { %v12140_v21 = vrot.slane %v14394_v25, %v11046_v35  ;;  %v14410_v30 = vld [vmem:[#allocation49_spill] sm:$0xff] }
 0x161   : > { %9855 = vmatmul.mubr.msk.bf16.gmra.mrb[16].mxu0 %vm2538_vm2, %v3923_v1  ;;  %v4179_v1 = vcombine.low %v14389_v31, %v14388_v4  ;;  %v14400_v31 = vld [vmem:[#allocation30_spill] sm:$0xff] }
 0x162   : > { %9858 = vmatprep.mubr.msk.bf16.mxu0 %vm2538_vm2, %v3931_v2  ;;  %v4196_v2 = vcombine.low %v14393_v29, %v14392_v15  ;;  %v4229_v22 = vcombine.low %v14401_v50, %v14400_v31  ;;  %v4227_v15 = vrot.slane %v4213_v0, %v11046_v35  ;;  %v14411_v0 = vld [vmem:[#allocation46_spill] sm:$0xff] }
 0x163   : > { %v4264_v61 = vcombine.low %v14411_v0, %v14410_v30 }
 0x164   : > { %v4210_v14 = vrot.slane %v4196_v2, %v11046_v35  ;;  %v4237_v8 = vrot.slane %v4229_v22, %v11046_v35 }
 0x169   : > { %9859 = vmatmul.mubr.msk.bf16.gmra.mrb[32].mxu0 %vm2538_vm2, %v3934_v45  ;;  %v4193_v45 = vrot.slane %v4179_v1, %v11046_v35  ;;  %v14402_v1 = vld [vmem:[#allocation34_spill] sm:$0xff] }
 0x16a   : > { %9864 = vmatprep.mubr.msk.bf16.mxu0 %vm2538_vm2, %v4143_v44  ;;  %v4203_v44 = vrot.slane %v4195_v20, %v11046_v35  ;;  %v4230_v38 = vcombine.low %v14403_v51, %v14402_v1  ;;  %v4220_v20 = vrot.slane %v4212_v41, %v11046_v35  ;;  %v14409_v41 = vld [vmem:[#allocation42_spill] sm:$0xff]  ;;  %v4278_v1 = vrot.slane %v4264_v61, %v11046_v35 }
 0x16b   : > { %v12142_v57 = vcombine.low %v4186_v42, %v4193_v45  ;;  %v14405_v42 = vld [vmem:[#allocation35_spill] sm:$0xff]  ;;  %v4263_v62 = vcombine.low %v14409_v41, %v14408_v54  ;;  %v4346_v41 = vcombine.low %v12044_v55, %v12075_v3  ;;  %v4907_v55 = vsel %vm2575_vm14, %v9298_v37, 0 }
 0x16c   : > { %v12154_v4 = vcombine.low %v4203_v44, %v4210_v14  ;;  %v4244_v13 = vrot.slane %v4230_v38, %v11046_v35  ;;  %v12170_v2 = vcombine.low %v4220_v20, %v4227_v15  ;;  %v14406_v44 = vld [vmem:[#allocation41_spill] sm:$0xff]  ;;  %v14407_v14 = vld [vmem:[#allocation39_spill] sm:$0xff]  ;;  %v14413_v20 = vld [vmem:[#allocation50_spill] sm:$0xff] }
 0x16d   : > { %v4247_v25 = vcombine.low %v14407_v14, %v14406_v44  ;;  %v4271_v22 = vrot.slane %v4263_v62, %v11046_v35  ;;  %v14412_v38 = vld [vmem:[#allocation51_spill] sm:$0xff]  ;;  %v12219_v62 = vrot.slane %v4346_v41, %v11046_v35  ;;  %v5539_v41 = vld [vmem:[%s14196_s5] sm:$0xff] }
 0x16e   : > { %v12176_v40 = vcombine.low %v4237_v8, %v4244_v13  ;;  %v4280_v15 = vcombine.low %v14413_v20, %v14412_v38  ;;  %v14414_v8 = vld [vmem:[#allocation52_spill] sm:$0xff]  ;;  %v1808_v20 = vcombine.high %v12071_v24, %v12071_v24  ;;  %v1823_v24 = vcombine.high %v12075_v3, %v12075_v3  ;;  %5564 = vperm.xlu0 %10527, %v5539_v41  }
 0x16f   : > { %v4261_v50 = vrot.slane %v4247_v25, %v11046_v35  ;;  %v4281_v13 = vcombine.low %v14414_v8, %v11581_v11 }
 0x170   : > { %v4288_v25 = vrot.slane %v4280_v15, %v11046_v35  ;;  %v9183_v15 = vld.sshfl [vmem:[#allocation2 + $0x88] sm:$0x33 pattern:$0x75316420] }
 0x171   : > { %9865 = vmatmul.mubr.msk.bf16.vlgmr.msra.gmra.mrb[0].mxu0 %vm2538_vm2, %v12004_v39  ;;  %v4295_v54 = vrot.slane %v4281_v13, %v11046_v35  ;;  %v12259_v13 = vrot.slane %v1808_v20, %v11046_v35 }
 0x172   : > { %9889 = vmatpush3.bf16.msra.mxu0 %v4616_v63  ;;  %9868 = vmatprep.mubr.msk.bf16.mxu0 %vm2538_vm2, %v12117_v47  ;;  %v14404_v63 = vld [vmem:[#allocation37_spill] sm:$0xff] }
 0x173   : > { %10478 = vmatprep.subr.msk.bf16.mxu0 %vm2575_vm14, %v9298_v37  ;;  %v4246_v45 = vcombine.low %v14405_v42, %v14404_v63  ;;  %v12198_v42 = vcombine.low %v4271_v22, %v4278_v1  ;;  %v12212_v11 = vcombine.low %v4288_v25, %v4295_v54  ;;  %v12240_v22 = vld [vmem:[%s14192_s1 + $0x10] sm:$0x3]  ;;  %v1832_v25 = vcombine.high %v9183_v15, %v9183_v15 }
 0x174   : > { %v12262_v54 = vrot.slane %v9183_v15, %v11046_v35  ;;  %v1824_v20 = vcombine.high %v12259_v13, %v12259_v13  ;;  %v4553_v41 = vcombine.low %v12259_v13, %v1823_v24 }
 0x175   : > { %v4254_v31 = vrot.slane %v4246_v45, %v11046_v35  ;;  %v12279_v15 = vrot.slane %v1832_v25, %v11046_v35  ;;  %v5542_v25 = vld [vmem:[%s14196_s5 + $0x18] sm:$0xff] }
 0x176   : > { %v1847_v29 = vcombine.high %v12262_v54, %v12262_v54 }
 0x177   : > { %v12190_v51 = vcombine.low %v4254_v31, %v4261_v50  ;;  %v4360_v31 = vrot.slane %v12219_v62, %v11046_v35 }
 0x179   : > { %9869 = vmatmul.mubr.msk.bf16.gmra.mrb[4].mxu0 %vm2538_vm2, %v12142_v57 }
 0x17a   : > { %9872 = vmatprep.mubr.msk.bf16.mxu0 %vm2538_vm2, %v12154_v4 }
 0x181   : > { %9873 = vmatmul.mubr.msk.bf16.gmra.mrb[8].mxu0 %vm2538_vm2, %v12170_v2 }
 0x182   : > { %9876 = vmatprep.mubr.msk.bf16.mxu0 %vm2538_vm2, %v12176_v40 }
 0x183   : > { %v12196_v63 = vpop.f32.mrb[0].mxu1 }
 0x184   : > { %14415 = vst [vmem:[#allocation53_spill] sm:$0xff] %v12196_v63  ;;  %v12200_v45 = vpop.f32.mrb[1].mxu1  ;;  %v9184_v63 = vld.sshfl [vmem:[#allocation2 + $0x8c] sm:$0x1 pattern:$0x75316420] }
 0x185   : > { %14416 = vst [vmem:[#allocation48_spill] sm:$0xff] %v12200_v45  ;;  %v12202_v44 = vpop.f32.mrb[2].mxu1 }
 0x186   : > { %14417 = vst [vmem:[#allocation9_spill] sm:$0xff] %v12202_v44  ;;  %v12204_v14 = vpop.f32.mrb[3].mxu1 }
 0x187   : > { %14418 = vst [vmem:[#allocation10_spill] sm:$0xff] %v12204_v14  ;;  %v4555_v14 = vcombine.low %v12279_v15, %v1847_v29 }
 0x189   : > { %9877 = vmatmul.mubr.msk.bf16.gmra.mrb[12].mxu0 %vm2538_vm2, %v12190_v51 }
 0x18a   : > { %9880 = vmatprep.mubr.msk.bf16.mxu0 %vm2538_vm2, %v12198_v42 }
 0x190   : > { %v12223_v30 = vpop.f32.mrb[4].mxu1 }
 0x191   : > { %9881 = vmatmul.mubr.msk.bf16.gmra.mrb[16].mxu0 %vm2538_vm2, %v12212_v11  ;;  %14419 = vst [vmem:[#allocation11_spill] sm:$0xff] %v12223_v30  ;;  %v12225_v0 = vpop.f32.mrb[5].mxu1 }
 0x192   : > { %9884 = vmatprep.mubr.msk.bf16.mxu0 %vm2538_vm2, %v12039_v10  ;;  %14420 = vst [vmem:[#allocation12_spill] sm:$0xff] %v12225_v0  ;;  %v12227_v61 = vpop.f32.mrb[6].mxu1 }
 0x193   : > { %14421 = vst [vmem:[#allocation6_spill] sm:$0xff] %v12227_v61  ;;  %v12231_v50 = vpop.f32.mrb[7].mxu1 }
 0x194   : > { %14422 = vst [vmem:[#allocation5_spill] sm:$0xff] %v12231_v50 }
 0x199   : > { %9885 = vmatmul.mubr.msk.bf16.gmra.mrb[36].mxu0 %vm2538_vm2, %v4360_v31  ;;  %v5541_v31 = vld [vmem:[%s14196_s5 + $0x10] sm:$0xff] }
 0x19a   : > { %9890 = vmatprep.mubr.msk.bf16.mxu0 %vm2538_vm2, %v12004_v39  ;;  %5574 = vperm.xlu1 %10528, %v5541_v31   ;;  %v4562_v31 = vrot.slane %v4553_v41, %v11046_v35 }
 0x19c   : > { %v4577_v45 = vcombine.low %v12219_v62, %v4562_v31  ;;  %v4786_v31 = vshrl.u32 %v12004_v39, 16 }
 0x19e   : > { %5579 = vperm.xlu1 %10528, %v5542_v25  }
 0x1a0   : > { %v12244_v1 = vpop.f32.mrb[8].mxu1 }
 0x1a1   : > { %9891 = vmatmul.mubr.msk.bf16.vlgmr.msra.gmra.mrb[0].mxu0 %vm2538_vm2, %v12117_v47  ;;  %14423 = vst [vmem:[#allocation8_spill] sm:$0xff] %v12244_v1  ;;  %v12246_v38 = vpop.f32.mrb[9].mxu1 }
 0x1a2   : > { %9915 = vmatpush3.bf16.msra.mxu0 %v4907_v55  ;;  %14424 = vst [vmem:[#allocation7_spill] sm:$0xff] %v12246_v38  ;;  %9894 = vmatprep.mubr.msk.bf16.mxu0 %vm2538_vm2, %v12142_v57  ;;  %v12252_v37 = vpop.f32.mrb[10].mxu1  ;;  %v5540_v38 = vld [vmem:[%s14196_s5 + $0x8] sm:$0xff] }
 0x1a3   : > { %14425 = vst [vmem:[#allocation14_spill] sm:$0xff] %v12252_v37  ;;  %10479 = vmatprep.subr.msk.bf16.mxu0 %vm2575_vm14, %v12240_v22  ;;  %v12256_v8 = vpop.f32.mrb[11].mxu1  ;;  %5569 = vperm.xlu0 %10527, %v5540_v38   ;;  %v5543_v38 = vld [vmem:[%s14196_s5 + $0x20] sm:$0xff] }
 0x1a4   : > { %14426 = vst [vmem:[#allocation13_spill] sm:$0xff] %v12256_v8 }
 0x1a9   : > { %9895 = vmatmul.mubr.msk.bf16.gmra.mrb[4].mxu0 %vm2538_vm2, %v12154_v4  ;;  %v9782_v55 = vpop.f32.mrb[20].mxu0 }
 0x1aa   : > { %9898 = vmatprep.mubr.msk.bf16.mxu0 %vm2538_vm2, %v12170_v2  ;;  %v2856_v37 = vpop.f32.mrb[21].mxu0 }
 0x1ab   : > { %v12283_v8 = vpop.f32.mrb[12].mxu1  ;;  %v9783_v50 = vpop.f32.mrb[22].mxu0 }
 0x1ac   : > { %14427 = vst [vmem:[#allocation16_spill] sm:$0xff] %v12283_v8  ;;  %v12288_v1 = vpop.f32.mrb[13].mxu1  ;;  %v2859_v0 = vpop.f32.mrb[23].mxu0  ;;  %v4554_v8 = vcombine.low %v1824_v20, %v12262_v54  ;;  %v5560_v50 = vld [vmem:[%s14196_s5 + $0xa8] sm:$0xff]  ;;  %v4576_v20 = vrot.slane %v4555_v14, %v11046_v35  ;;  %v1848_v14 = vcombine.high %v12279_v15, %v12279_v15 }
 0x1ad   : > { %14428 = vst [vmem:[#allocation15_spill] sm:$0xff] %v12288_v1  ;;  %v12293_v61 = vpop.f32.mrb[14].mxu1  ;;  %5669 = vperm.xlu0 %10527, %v5560_v50   ;;  %v5561_v50 = vld [vmem:[%s14196_s5 + $0xb0] sm:$0xf] }
 0x1ae   : > { %14429 = vst [vmem:[#allocation18_spill] sm:$0xff] %v12293_v61  ;;  %v12295_v30 = vpop.f32.mrb[15].mxu1  ;;  %v4569_v24 = vrot.slane %v4554_v8, %v11046_v35  ;;  %5674 = vperm.xlu1 %10528, %v5561_v50   ;;  %v4803_v50 = vshrl.u32 %v12142_v57, 16 }
 0x1af   : > { %14430 = vst [vmem:[#allocation17_spill] sm:$0xff] %v12295_v30 }
 0x1b0   : > { %v4578_v41 = vcombine.low %v4569_v24, %v4576_v20  ;;  %v5544_v20 = vld [vmem:[%s14196_s5 + $0x28] sm:$0xff] }
 0x1b1   : > { %9899 = vmatmul.mubr.msk.bf16.gmra.mrb[8].mxu0 %vm2538_vm2, %v12176_v40  ;;  %5584 = vperm.xlu0 %10527, %v5543_v38  }
 0x1b2   : > { %9902 = vmatprep.mubr.msk.bf16.mxu0 %vm2538_vm2, %v12190_v51  ;;  %v4592_v62 = vrot.slane %v4578_v41, %v11046_v35  ;;  %5589 = vperm.xlu1 %10528, %v5544_v20   ;;  %v5546_v41 = vld [vmem:[%s14196_s5 + $0x38] sm:$0xff] }
 0x1b3   : > { %v9756_v29 = vpop.f32.mrb[16].mxu1 }
 0x1b4   : > { %v12313_v30 = vadd.f32 %v9782_v55, %v9756_v29  ;;  %v2693_v25 = vpop.f32.mrb[17].mxu1  ;;  %v12325_v55 = vrot.slane %v9184_v63, %v11046_v35  ;;  %v5545_v63 = vld [vmem:[%s14196_s5 + $0x30] sm:$0xff]  ;;  %v5547_v29 = vld [vmem:[%s14196_s5 + $0x40] sm:$0xff] }
 0x1b5   : > { %v12315_v61 = vadd.f32 %v2856_v37, %v2693_v25  ;;  %v9757_v1 = vpop.f32.mrb[18].mxu1  ;;  %v4788_v37 = vshll.u32 %v12004_v39, 16  ;;  %5594 = vperm.xlu0 %10527, %v5545_v63   ;;  %v4806_v63 = vshll.u32 %v12154_v4, 16 }
 0x1b6   : > { %v2696_v44 = vpop.f32.mrb[19].mxu1  ;;  %v4585_v1 = vrot.slane %v4577_v45, %v11046_v35  ;;  %v4792_v45 = vshll.u32 %v12117_v47, 16  ;;  %5599 = vperm.xlu1 %10528, %v5546_v41   ;;  %v4813_v41 = vshll.u32 %v12170_v2, 16 }
 0x1b7   : > { %v12318_v8 = vadd.f32 %v2859_v0, %v2696_v44  ;;  %v4594_v44 = vcombine.low %v1848_v14, %v12325_v55  ;;  %v4790_v24 = vrot.slane %v4788_v37, 1  ;;  %v5549_v14 = vld [vmem:[%s14196_s5 + $0x50] sm:$0xff]  ;;  %v4796_v37 = vshrl.u32 %v12117_v47, 16 }
 0x1b8   : > { %v12333_v0 = vcombine.low %v4585_v1, %v4592_v62  ;;  %v4794_v25 = vrot.slane %v4792_v45, 1  ;;  %v4799_v62 = vshll.u32 %v12142_v57, 16  ;;  %v4808_v57 = vrot.slane %v4806_v63, 1  ;;  %v5555_v63 = vld [vmem:[%s14196_s5 + $0x80] sm:$0xff] }
 0x1b9   : > { %9903 = vmatmul.mubr.msk.bf16.gmra.mrb[12].mxu0 %vm2538_vm2, %v12198_v42  ;;  %v12352_v38 = vrot.slane %v4594_v44, %v11046_v35  ;;  %v4791_v39 = vor.u32 %v4790_v24, %v4786_v31  ;;  %5604 = vperm.xlu0 %10527, %v5547_v29   ;;  %v5548_v31 = vld [vmem:[%s14196_s5 + $0x48] sm:$0xff]  ;;  %v5551_v24 = vld [vmem:[%s14196_s5 + $0x60] sm:$0xff]  ;;  %v5550_v29 = vld [vmem:[%s14196_s5 + $0x58] sm:$0xff] }
 0x1ba   : > { %9906 = vmatprep.mubr.msk.bf16.mxu0 %vm2538_vm2, %v12212_v11  ;;  %v4801_v45 = vrot.slane %v4799_v62, 1  ;;  %v4798_v47 = vor.u32 %v4796_v37, %v4794_v25  ;;  %5609 = vperm.xlu1 %10528, %v5548_v31   ;;  %v4817_v37 = vshrl.u32 %v12170_v2, 16 }
 0x1bb   : > { %v4608_v1 = vrot.slane %v12352_v38, %v11046_v35  ;;  %v4795_v44 = vsel %vm2442_vm15, %v4791_v39, %v4794_v25  ;;  %v5553_v39 = vld [vmem:[%s14196_s5 + $0x70] sm:$0xff]  ;;  %v4810_v25 = vshrl.u32 %v12154_v4, 16  ;;  %v4815_v4 = vrot.slane %v4813_v41, 1 }
 0x1bc   : > { %v4805_v20 = vor.u32 %v4803_v50, %v4801_v45  ;;  %v5552_v50 = vld [vmem:[%s14196_s5 + $0x68] sm:$0xff] }
 0x1bd   : > { %5614 = vperm.xlu0 %10527, %v5549_v14   ;;  %v4802_v14 = vsel %vm2442_vm15, %v4798_v47, %v4801_v45  ;;  %v4819_v2 = vor.u32 %v4817_v37, %v4815_v4  ;;  %v5554_v45 = vld [vmem:[%s14196_s5 + $0x78] sm:$0xff]  ;;  %v5557_v47 = vld [vmem:[%s14196_s5 + $0x90] sm:$0xff] }
 0x1be   : > { %v4809_v62 = vsel %vm2442_vm15, %v4805_v20, %v4808_v57  ;;  %5619 = vperm.xlu1 %10528, %v5550_v29   ;;  %v4827_v20 = vshll.u32 %v12190_v51, 16 }
 0x1c1   : > { %9907 = vmatmul.mubr.msk.bf16.gmra.mrb[16].mxu0 %vm2538_vm2, %v12039_v10  ;;  %5624 = vperm.xlu0 %10527, %v5551_v24   ;;  %v9185_v24 = vld.sshfl [vmem:[#allocation2 + $0x90] sm:$0x33 pattern:$0x75316420] }
 0x1c2   : > { %9910 = vmatprep.mubr.msk.bf16.mxu0 %vm2538_vm2, %v12333_v0  ;;  %5629 = vperm.xlu1 %10528, %v5552_v50  }
 0x1c5   : > { %5634 = vperm.xlu0 %10527, %v5553_v39   ;;  %v4824_v39 = vshrl.u32 %v12176_v40, 16 }
 0x1c6   : > { %5639 = vperm.xlu1 %10528, %v5554_v45  }
 0x1c9   : > { %9911 = vmatmul.mubr.msk.bf16.gmra.mrb[40].mxu0 %vm2538_vm2, %v4608_v1  ;;  %v5333_v1 = vsel %vm2575_vm14, %v12240_v22, 0  ;;  %v4812_v22 = vor.u32 %v4810_v25, %v4808_v57  ;;  %5644 = vperm.xlu0 %10527, %v5555_v63   ;;  %v12409_v57 = vrot.slane %v9185_v24, %v11046_v35  ;;  %v4834_v25 = vshll.u32 %v12198_v42, 16 }
 0x1ca   : > { %9916 = vmatprep.mubr.msk.bf16.mxu0 %vm2538_vm2, %v4795_v44  ;;  %v4820_v44 = vshll.u32 %v12176_v40, 16  ;;  %v4829_v40 = vrot.slane %v4827_v20, 1  ;;  %v4841_v24 = vshll.u32 %v12212_v11, 16  ;;  %v4838_v20 = vshrl.u32 %v12198_v42, 16 }
 0x1cb   : > { %v4816_v29 = vsel %vm2442_vm15, %v4812_v22, %v4815_v4  ;;  %v4836_v50 = vrot.slane %v4834_v25, 1  ;;  %v5558_v4 = vld [vmem:[%s14196_s5 + $0x98] sm:$0xff] }
 0x1cc   : > { %v4822_v31 = vrot.slane %v4820_v44, 1 }
 0x1cd   : > { %5654 = vperm.xlu0 %10527, %v5557_v47  }
 0x1ce   : > { %v4823_v41 = vsel %vm2442_vm15, %v4819_v2, %v4822_v31  ;;  %v4826_v37 = vor.u32 %v4824_v39, %v4822_v31 }
 0x1d0   : > { %v4830_v47 = vsel %vm2442_vm15, %v4826_v37, %v4829_v40  ;;  %v4852_v37 = vshrl.u32 %v12039_v10, 16 }
 0x1d1   : > { %9917 = vmatmul.mubr.msk.bf16.vlgmr.msra.gmra.mrb[0].mxu0 %vm2538_vm2, %v4802_v14  ;;  %v4831_v14 = vshrl.u32 %v12190_v51, 16  ;;  %v4777_v51 = vrot.slane %v12409_v57, %v11046_v35 }
 0x1d2   : > { %9941 = vmatpush3.bf16.msra.mxu0 %v5333_v1  ;;  %9920 = vmatprep.mubr.msk.bf16.mxu0 %vm2538_vm2, %v4809_v62  ;;  %v5556_v1 = vld [vmem:[%s14196_s5 + $0x88] sm:$0xff]  ;;  %v5559_v62 = vld [vmem:[%s14196_s5 + $0xa0] sm:$0xff] }
 0x1d3   : > { %v4833_v44 = vor.u32 %v4831_v14, %v4829_v40  ;;  %5649 = vperm.xlu1 %10528, %v5556_v1   ;;  %5664 = vperm.xlu0 %10527, %v5559_v62   ;;  %v4845_v14 = vshrl.u32 %v12212_v11, 16  ;;  %v4840_v1 = vor.u32 %v4838_v20, %v4836_v50  ;;  %v4855_v40 = vshll.u32 %v12333_v0, 16 }
 0x1d7   : > { %5659 = vperm.xlu1 %10528, %v5558_v4  }
 0x1d9   : > { %9921 = vmatmul.mubr.msk.bf16.gmra.mrb[4].mxu0 %vm2538_vm2, %v4816_v29  ;;  %v4778_v29 = vcombine.low %v12352_v38, %v4777_v51 }
 0x1da   : > { %9924 = vmatprep.mubr.msk.bf16.mxu0 %vm2538_vm2, %v4823_v41  ;;  %v4837_v41 = vsel %vm2442_vm15, %v4833_v44, %v4836_v50 }
 0x1db   : > { %v4785_v38 = vrot.slane %v4778_v29, %v11046_v35 }
 0x1dc   : > { %v9808_v63 = vpop.f32.mrb[24].mxu0 }
 0x1dd   : > { %v12428_v22 = vadd.f32 %v9808_v63, %v12313_v30  ;;  %v3579_v2 = vpop.f32.mrb[25].mxu0  ;;  %v4848_v30 = vshll.u32 %v12039_v10, 16  ;;  %v4863_v44 = vshll.u32 %v4785_v38, 16  ;;  %v4857_v63 = vrot.slane %v4855_v40, 1 }
 0x1de   : > { %v12432_v31 = vadd.f32 %v3579_v2, %v12315_v61  ;;  %v9809_v45 = vpop.f32.mrb[26].mxu0  ;;  %v4843_v61 = vrot.slane %v4841_v24, 1  ;;  %v5063_v10 = vcombine.low %v11652_v18, %v11661_v33  ;;  %v5113_v33 = vcombine.low %v11752_v49, %v11740_v5 }
 0x1df   : > { %v3582_v39 = vpop.f32.mrb[27].mxu0  ;;  %v4850_v62 = vrot.slane %v4848_v30, 1  ;;  %v4865_v2 = vrot.slane %v4863_v44, 1  ;;  %v5062_v45 = vcombine.low %v11643_v19, %v11646_v16  ;;  %v5097_v19 = vcombine.low %v11714_v53, %v11749_v28 }
 0x1e0   : > { %v12441_v25 = vadd.f32 %v3582_v39, %v12318_v8  ;;  %v4847_v42 = vor.u32 %v4845_v14, %v4843_v61  ;;  %v4844_v11 = vsel %vm2442_vm15, %v4840_v1, %v4843_v61  ;;  %v4859_v8 = vshrl.u32 %v12333_v0, 16 }
 0x1e1   : > { %9925 = vmatmul.mubr.msk.bf16.gmra.mrb[8].mxu0 %vm2538_vm2, %v4830_v47  ;;  %v4854_v50 = vor.u32 %v4852_v37, %v4850_v62  ;;  %v4867_v0 = vshrl.u32 %v4785_v38, 16  ;;  %v5070_v20 = vrot.slane %v5062_v45, %v11046_v35  ;;  %v5077_v29 = vrot.slane %v5063_v10, %v11046_v35  ;;  %v14441_v45 = vld [vmem:[#allocation55_spill] sm:$0xff] }
 0x1e2   : > { %9928 = vmatprep.mubr.msk.bf16.mxu0 %vm2538_vm2, %v4837_v41  ;;  %v4851_v51 = vsel %vm2442_vm15, %v4847_v42, %v4850_v62  ;;  %v4861_v4 = vor.u32 %v4859_v8, %v4857_v63  ;;  %v5096_v14 = vcombine.low %v11708_v26, %v11711_v27  ;;  %v5111_v18 = vrot.slane %v5097_v19, %v11046_v35  ;;  %v14438_v8 = vld [vmem:[#allocation43_spill] sm:$0xff] }
 0x1e3   : > { %v4858_v24 = vsel %vm2442_vm15, %v4854_v50, %v4857_v63  ;;  %v4869_v39 = vor.u32 %v4867_v0, %v4865_v2  ;;  %v5078_v41 = vcombine.low %v5070_v20, %v5077_v29  ;;  %v5114_v30 = vcombine.low %v11743_v17, %v11768_v46 }
 0x1e4   : > { %v4866_v47 = vsel %vm2442_vm15, %v4861_v4, %v4865_v2  ;;  %v5104_v16 = vrot.slane %v5096_v14, %v11046_v35  ;;  %v5130_v26 = vcombine.low %v11774_v60, %v11777_v6  ;;  %v5131_v27 = vcombine.low %v11780_v58, %v11803_v32  ;;  %v14432_v60 = vld [vmem:[#allocation32_spill] sm:$0xff]  ;;  %v14434_v32 = vld [vmem:[#allocation33_spill] sm:$0xff]  ;;  %v14439_v4 = vld [vmem:[#allocation54_spill] sm:$0xff] }
 0x1e5   : > { %v14431_v53 = vcombine.low %v12140_v21, %v12152_v59  ;;  %v5121_v28 = vrot.slane %v5113_v33, %v11046_v35  ;;  %v5128_v1 = vrot.slane %v5114_v30, %v11046_v35  ;;  %v5147_v49 = vcombine.low %v11815_v56, %v11818_v52  ;;  %v14433_v58 = vld [vmem:[#allocation36_spill] sm:$0xff] }
 0x1e6   : > { %v5112_v61 = vcombine.low %v5104_v16, %v5111_v18  ;;  %v5138_v5 = vrot.slane %v5130_v26, %v11046_v35  ;;  %v5145_v17 = vrot.slane %v5131_v27, %v11046_v35  ;;  %v5148_v46 = vcombine.low %v11808_v48, %v11827_v23  ;;  %v14435_v23 = vld [vmem:[#allocation40_spill] sm:$0xff] }
 0x1e7   : > { %v5164_v6 = vcombine.low %v14432_v60, %v11839_v43  ;;  %v5165_v21 = vcombine.low %v14434_v32, %v14433_v58  ;;  %v5129_v59 = vcombine.low %v5121_v28, %v5128_v1  ;;  %v5155_v62 = vrot.slane %v5147_v49, %v11046_v35  ;;  %v14436_v43 = vld [vmem:[#allocation38_spill] sm:$0xff]  ;;  %v14440_v2 = vld [vmem:[#allocation44_spill] sm:$0xff] }
 0x1e8   : > { %v5146_v42 = vcombine.low %v5138_v5, %v5145_v17  ;;  %v5162_v38 = vrot.slane %v5148_v46, %v11046_v35  ;;  %v5181_v37 = vcombine.low %v14436_v43, %v14435_v23  ;;  %v5199_v10 = vcombine.low %v14441_v45, %v11929_v34 }
 0x1e9   : > { %9929 = vmatmul.mubr.msk.bf16.gmra.mrb[12].mxu0 %vm2538_vm2, %v4844_v11  ;;  %v5172_v40 = vrot.slane %v5164_v6, %v11046_v35  ;;  %v5179_v11 = vrot.slane %v5165_v21, %v11046_v35  ;;  %v9312_v29 = vcombine.high %v12075_v3, %v12259_v13  ;;  %v5215_v18 = vcombine.low %v12021_v7, %v12024_v36 }
 0x1ea   : > { %9932 = vmatprep.mubr.msk.bf16.mxu0 %vm2538_vm2, %v4851_v51  ;;  %v5163_v56 = vcombine.low %v5155_v62, %v5162_v38  ;;  %v14437_v51 = vld [vmem:[#allocation47_spill] sm:$0xff]  ;;  %v5189_v34 = vrot.slane %v5181_v37, %v11046_v35  ;;  %v5213_v16 = vrot.slane %v5199_v10, %v11046_v35  ;;  %v5216_v33 = vcombine.low %v12029_v9, %v12054_v12 }
 0x1eb   : > { %v5180_v52 = vcombine.low %v5172_v40, %v5179_v11  ;;  %v5182_v44 = vcombine.low %v14438_v8, %v14437_v51  ;;  %v5223_v27 = vrot.slane %v5215_v18, %v11046_v35  ;;  %v5281_v7 = vcombine.low %v12325_v55, %v12409_v57 }
 0x1ed   : > { %v5196_v19 = vrot.slane %v5182_v44, %v11046_v35  ;;  %v5288_v9 = vrot.slane %v5281_v7, %v11046_v35  ;;  %v5565_v43 = vpop.permute.xlu0 %5564 }
 0x1ef   : > { %v5295_v12 = vrot.slane %v5288_v9, %v11046_v35 }
 0x1f1   : > { %9933 = vmatmul.mubr.msk.bf16.gmra.mrb[16].mxu0 %vm2538_vm2, %v4858_v24  ;;  %v5198_v24 = vcombine.low %v14440_v2, %v14439_v4 }
 0x1f2   : > { %9936 = vmatprep.mubr.msk.bf16.mxu0 %vm2538_vm2, %v4866_v47  ;;  %v5232_v47 = vcombine.low %v12075_v3, %v12259_v13  ;;  %v5249_v13 = vrot.slane %v9312_v29, %v11046_v35 }
 0x1f4   : > { %v5242_v3 = vrot.slane %v5232_v47, %v11046_v35  ;;  %v12559_v47 = vld [vmem:[%s14193_s2] ss:$0 sm:$0xff] }
 0x1f9   : > { %9937 = vmatmul.mubr.msk.bf16.gmra.mrb[44].mxu0 %vm2538_vm2, %v4869_v39  ;;  %v5234_v39 = vcombine.low %v12262_v54, %v12279_v15 }
 0x1fa   : > { %9942 = vmatprep.mubr.msk.bf16.mxu0 %vm2538_vm2, %v5078_v41 }
 0x201   : > { %9943 = vmatmul.mubr.msk.bf16.vlgmr.msra.gmra.mrb[0].mxu0 %vm2538_vm2, %v14431_v53  ;;  %v5230_v53 = vrot.slane %v5216_v33, %v11046_v35 }
 0x202   : > { %9946 = vmatprep.mubr.msk.bf16.mxu0 %vm2538_vm2, %v5112_v61  ;;  %v5264_v61 = vcombine.low %v5242_v3, %v5249_v13 }
 0x203   : > { %v5231_v5 = vcombine.low %v5223_v27, %v5230_v53 }
 0x204   : > { %v5272_v28 = vrot.slane %v5264_v61, %v11046_v35 }
 0x209   : > { %9947 = vmatmul.mubr.msk.bf16.gmra.mrb[4].mxu0 %vm2538_vm2, %v5129_v59 }
 0x20a   : > { %9950 = vmatprep.mubr.msk.bf16.mxu0 %vm2538_vm2, %v5146_v42 }
 0x20c   : > { %v9834_v48 = vpop.f32.mrb[28].mxu0 }
 0x20d   : > { %v3833_v63 = vadd.f32 %v9834_v48, %v12428_v22  ;;  %v3797_v50 = vpop.f32.mrb[29].mxu0  ;;  %v9313_v22 = vcombine.high %v12262_v54, %v12279_v15  ;;  %v5256_v54 = vrot.slane %v5234_v39, %v11046_v35 }
 0x20e   : > { %v3831_v0 = vadd.f32 %v3797_v50, %v12432_v31  ;;  %v9835_v20 = vpop.f32.mrb[30].mxu0  ;;  %v5206_v31 = vrot.slane %v5198_v24, %v11046_v35 }
 0x20f   : > { %v3800_v41 = vpop.f32.mrb[31].mxu0  ;;  %v5263_v15 = vrot.slane %v9313_v22, %v11046_v35 }
 0x210   : > { %v3832_v14 = vadd.f32 %v3800_v41, %v12441_v25  ;;  %v5197_v25 = vcombine.low %v5189_v34, %v5196_v19  ;;  %v5214_v30 = vcombine.low %v5206_v31, %v5213_v16 }
 0x211   : > { %9951 = vmatmul.mubr.msk.bf16.gmra.mrb[8].mxu0 %vm2538_vm2, %v5163_v56  ;;  %v5265_v26 = vcombine.low %v5256_v54, %v5263_v15 }
 0x212   : > { %9954 = vmatprep.mubr.msk.bf16.mxu0 %vm2538_vm2, %v5180_v52 }
 0x213   : > { %v5279_v1 = vrot.slane %v5265_v26, %v11046_v35 }
 0x215   : > { %v5280_v36 = vcombine.low %v5272_v28, %v5279_v1 }
 0x219   : > { %9955 = vmatmul.mubr.msk.bf16.gmra.mrb[12].mxu0 %vm2538_vm2, %v5197_v25  ;;  %v5575_v51 = vpop.permute.xlu1 %5574 }
 0x21a   : > { %9958 = vmatprep.mubr.msk.bf16.mxu0 %vm2538_vm2, %v5214_v30 }
 0x21d   : > { %v5580_v10 = vpop.permute.xlu1 %5579 }
 0x221   : > { %9959 = vmatmul.mubr.msk.bf16.gmra.mrb[16].mxu0 %vm2538_vm2, %v5231_v5  ;;  %v14442_v5 = vld [vmem:[#allocation53_spill] sm:$0xff] }
 0x222   : > { %9962 = vmatprep.mubr.msk.bf16.mxu0 %vm2538_vm2, %v5280_v36  ;;  %v5570_v37 = vpop.permute.xlu0 %5569 }
 0x229   : > { %9963 = vmatmul.mubr.msk.bf16.gmra.mrb[48].mxu0 %vm2538_vm2, %v5295_v12 }
 0x22c   : > { %v12550_v50 = vpop.permute.xlu0 %5669 }
 0x23c   : > { %v9860_v17 = vpop.f32.mrb[32].mxu0 }
 0x23d   : > { %v4124_v49 = vadd.f32 %v9860_v17, %v3833_v63  ;;  %v4088_v46 = vpop.f32.mrb[33].mxu0 }
 0x23e   : > { %v4122_v60 = vadd.f32 %v4088_v46, %v3831_v0  ;;  %v9861_v6 = vpop.f32.mrb[34].mxu0  ;;  %v12561_v0 = vpop.permute.xlu0 %5584 }
 0x23f   : > { %v4091_v58 = vpop.f32.mrb[35].mxu0 }
 0x240   : > { %v4123_v32 = vadd.f32 %v4091_v58, %v3832_v14  ;;  %v12565_v14 = vpop.permute.xlu1 %5674 }
 0x242   : > { %v5595_v15 = vpop.permute.xlu0 %5594 }
 0x244   : > { %v12569_v53 = vpop.permute.xlu1 %5589 }
 0x26c   : > { %v9886_v21 = vpop.f32.mrb[36].mxu0 }
 0x26d   : > { %v4550_v55 = vadd.f32 %v9886_v21, %v4124_v49  ;;  %v4514_v57 = vpop.f32.mrb[37].mxu0  ;;  %v14443_v49 = vld [vmem:[#allocation48_spill] sm:$0xff] }
 0x26e   : > { %v4548_v59 = vadd.f32 %v4514_v57, %v4122_v60  ;;  %v9887_v42 = vpop.f32.mrb[38].mxu0  ;;  %v12574_v57 = vpop.permute.xlu0 %5604 }
 0x26f   : > { %v4517_v62 = vpop.f32.mrb[39].mxu0 }
 0x270   : > { %v4549_v38 = vadd.f32 %v4517_v62, %v4123_v32 }
 0x29c   : > { %v9912_v40 = vpop.f32.mrb[40].mxu0 }
 0x29d   : > { %v4768_v11 = vadd.f32 %v9912_v40, %v4550_v55  ;;  %v4732_v35 = vpop.f32.mrb[41].mxu0 }
 0x29e   : > { %v4766_v48 = vadd.f32 %v4732_v35, %v4548_v59  ;;  %v9913_v56 = vpop.f32.mrb[42].mxu0  ;;  %v6030_v35 = vld [vmem:[#allocation3] sm:$0xf] }
 0x29f   : > { %v4735_v52 = vpop.f32.mrb[43].mxu0 }
 0x2a0   : > { %v4767_v23 = vadd.f32 %v4735_v52, %v4549_v38 }
 0x2cc   : > { %v9938_v8 = vpop.f32.mrb[44].mxu0 }
 0x2cd   : > { %v12548_v44 = vadd.f32 %v9938_v8, %v4768_v11  ;;  %v5023_v63 = vpop.f32.mrb[45].mxu0 }
 0x2ce   : > { %v12552_v4 = vadd.f32 %v5023_v63, %v4766_v48  ;;  %v9939_v2 = vpop.f32.mrb[46].mxu0  ;;  %v5600_v63 = vpop.permute.xlu1 %5599 }
 0x2cf   : > { %v5026_v24 = vpop.f32.mrb[47].mxu0 }
 0x2d0   : > { %v12554_v45 = vadd.f32 %v5026_v24, %v4767_v23 }
 0x2d4   : > { %v9944_v20 = vpop.f32.mrb[0].mxu0 }
 0x2d5   : > { %v5495_v29 = vadd.f32 %v9944_v20, %v12559_v47  ;;  %v5369_v39 = vpop.f32.mrb[1].mxu0  ;;  %v14448_v20 = vld [vmem:[#allocation9_spill] sm:$0xff] }
 0x2d6   : > { %v5493_v22 = vadd.f32 %v12559_v47, %v5369_v39  ;;  %v9945_v41 = vpop.f32.mrb[2].mxu0 }
 0x2d7   : > { %v5518_v34 = vmax.f32 %v5495_v29, 0.0  ;;  %v5496_v19 = vadd.f32 %v9945_v41, %v12559_v47  ;;  %v5372_v31 = vpop.f32.mrb[3].mxu0 }
 0x2d8   : > { %v5516_v16 = vmax.f32 %v5493_v22, 0.0  ;;  %v5494_v3 = vadd.f32 %v12559_v47, %v5372_v31 }
 0x2d9   : > { %v5679_v13 = vmul.f32 %v5575_v51, %v5518_v34  ;;  %v5519_v54 = vmax.f32 %v5496_v19, 0.0 }
 0x2da   : > { %v5677_v25 = vmul.f32 %v5565_v43, %v5516_v16  ;;  %v5517_v18 = vmax.f32 %v5494_v3, 0.0 }
 0x2db   : > { %v9503_v33 = vpack.c.bf16 %v5679_v13, %v5679_v13  ;;  %v5680_v30 = vmul.f32 %v5580_v10, %v5519_v54  ;;  %v14449_v13 = vld [vmem:[#allocation10_spill] sm:$0xff] }
 0x2dc   : > { %v9501_v61 = vpack.c.bf16 %v5677_v25, %v5677_v25  ;;  %v5678_v26 = vmul.f32 %v5570_v37, %v5517_v18  ;;  %v9948_v27 = vpop.f32.mrb[4].mxu0  ;;  %v5615_v25 = vpop.permute.xlu0 %5614 }
 0x2dd   : > { %v5817_v28 = vshrl.u32 %v9503_v33, 16  ;;  %v9504_v1 = vpack.c.bf16 %v5680_v30, %v5680_v30  ;;  %v10310_v7 = vadd.f32 %v9948_v27, %v14442_v5  ;;  %v5385_v36 = vpop.f32.mrb[5].mxu0  ;;  %v5820_v9 = vshll.u32 %v9503_v33, 16  ;;  %v14450_v30 = vld [vmem:[#allocation11_spill] sm:$0xff] }
 0x2de   : > { %v5800_v12 = vshrl.u32 %v9501_v61, 16  ;;  %v9502_v17 = vpack.c.bf16 %v5678_v26, %v5678_v26  ;;  %v10311_v46 = vadd.f32 %v5385_v36, %v14443_v49  ;;  %v9949_v60 = vpop.f32.mrb[6].mxu0  ;;  %v5803_v58 = vshll.u32 %v9501_v61, 16 }
 0x2df   : > { %v5819_v6 = vrot.slane %v5817_v28, 7  ;;  %v5826_v32 = vshrl.u32 %v9504_v1, 16  ;;  %v5499_v21 = vadd.f32 %v10310_v7, %v12559_v47  ;;  %v5388_v55 = vpop.f32.mrb[7].mxu0  ;;  %v5829_v42 = vshll.u32 %v9504_v1, 16 }
 0x2e0   : > { %v5802_v59 = vrot.slane %v5800_v12, 7  ;;  %v5808_v62 = vshrl.u32 %v9502_v17, 16  ;;  %v5497_v38 = vadd.f32 %v10311_v46, %v12559_v47  ;;  %v5811_v56 = vshll.u32 %v9502_v17, 16  ;;  %v14451_v17 = vld [vmem:[#allocation12_spill] sm:$0xff]  ;;  %v5610_v46 = vpop.permute.xlu1 %5609 }
 0x2e1   : > { %v5822_v40 = vor.u32 %v5820_v9, %v5819_v6  ;;  %v12583_v48 = vrot.slane %v5826_v32, 7  ;;  %v5522_v52 = vmax.f32 %v5499_v21, 0.0  ;;  %v5824_v23 = vrot.slane %v5819_v6, 4  ;;  %v14452_v32 = vld [vmem:[#allocation6_spill] sm:$0xff] }
 0x2e2   : > { %v5805_v43 = vor.u32 %v5803_v58, %v5802_v59  ;;  %v5810_v51 = vrot.slane %v5808_v62, 7  ;;  %v5520_v8 = vmax.f32 %v5497_v38, 0.0  ;;  %v5806_v2 = vrot.slane %v5802_v59, 4  ;;  %v14453_v62 = vld [vmem:[#allocation5_spill] sm:$0xff] }
 0x2e3   : > { %v5831_v24 = vor.u32 %v5829_v42, %v12583_v48  ;;  %v5683_v10 = vmul.f32 %v5595_v15, %v5522_v52  ;;  %v10312_v29 = vadd.f32 %v9949_v60, %v14448_v20  ;;  %v10313_v54 = vadd.f32 %v5388_v55, %v14449_v13  ;;  %v12616_v52 = vpop.permute.xlu0 %5624 }
 0x2e4   : > { %v6031_v39 = vsel %vm12579_vm7, %v5805_v43, %v6030_v35  ;;  %v5813_v22 = vor.u32 %v5811_v56, %v5810_v51  ;;  %v5815_v41 = vrot.slane %v5810_v51, 4  ;;  %v5681_v34 = vmul.f32 %v12561_v0, %v5520_v8  ;;  %v9952_v19 = vpop.f32.mrb[8].mxu0 }
 0x2e5   : > { %6032 = vst [vmem:[#allocation3] sm:$0xf] %v6031_v39  ;;  %v5832_v31 = vsel %vm12587_vm8, %v5824_v23, %v5831_v24  ;;  %v9507_v16 = vpack.c.bf16 %v5683_v10, %v5683_v10  ;;  %v5500_v3 = vadd.f32 %v10312_v29, %v12559_v47  ;;  %v5401_v15 = vpop.f32.mrb[9].mxu0  ;;  %v10314_v61 = vadd.f32 %v9952_v19, %v14450_v30 }
 0x2e6   : > { %6035 = vst.msk [vmem:[#allocation3 + $0xc] sm:$0xf] %vm278_vm0, %v5832_v31  ;;  %v5814_v18 = vsel %vm12587_vm8, %v5806_v2, %v5813_v22  ;;  %v5823_v0 = vsel %vm12587_vm8, %v5815_v41, %v5822_v40  ;;  %v9505_v33 = vpack.c.bf16 %v5681_v34, %v5681_v34  ;;  %v9953_v26 = vpop.f32.mrb[10].mxu0  ;;  %v5498_v5 = vadd.f32 %v10313_v54, %v12559_v47  ;;  %v5620_v34 = vpop.permute.xlu1 %5619 }
 0x2e7   : > { %6033 = vst.msk [vmem:[#allocation3 + $0x4] sm:$0xf] %vm278_vm0, %v5814_v18  ;;  %6034 = vst.msk [vmem:[#allocation3 + $0x8] sm:$0xf] %vm278_vm0, %v5823_v0  ;;  %v5853_v27 = vshrl.u32 %v9507_v16, 16  ;;  %v5856_v28 = vshll.u32 %v9507_v16, 16  ;;  %v5503_v12 = vadd.f32 %v10314_v61, %v12559_v47  ;;  %v10315_v49 = vadd.f32 %v5401_v15, %v14451_v17 }
 0x2e8   : > { %v5523_v1 = vmax.f32 %v5500_v3, 0.0  ;;  %v5404_v7 = vpop.f32.mrb[11].mxu0  ;;  %v5835_v36 = vshrl.u32 %v9505_v33, 16  ;;  %v5838_v9 = vshll.u32 %v9505_v33, 16  ;;  %v5521_v58 = vmax.f32 %v5498_v5, 0.0 }
 0x2e9   : > { %v5855_v60 = vrot.slane %v5853_v27, 7  ;;  %v10316_v21 = vadd.f32 %v9953_v26, %v14452_v32  ;;  %v5526_v59 = vmax.f32 %v5503_v12, 0.0  ;;  %v5501_v42 = vadd.f32 %v10315_v49, %v12559_v47 }
 0x2ea   : > { %v5684_v6 = vmul.f32 %v5600_v63, %v5523_v1  ;;  %v5837_v55 = vrot.slane %v5835_v36, 7  ;;  %v10317_v38 = vadd.f32 %v5404_v7, %v14453_v62  ;;  %v5833_v40 = vrot.slane %v12583_v48, 4 }
 0x2eb   : > { %v5858_v11 = vor.u32 %v5856_v28, %v5855_v60  ;;  %v5682_v56 = vmul.f32 %v12569_v53, %v5521_v58  ;;  %v5860_v23 = vrot.slane %v5855_v60, 4  ;;  %v5687_v51 = vmul.f32 %v5615_v25, %v5526_v59  ;;  %v5630_v58 = vpop.permute.xlu1 %5629 }
 0x2ec   : > { %v9508_v35 = vpack.c.bf16 %v5684_v6, %v5684_v6  ;;  %v5840_v43 = vor.u32 %v5838_v9, %v5837_v55  ;;  %v5524_v8 = vmax.f32 %v5501_v42, 0.0  ;;  %v9956_v63 = vpop.f32.mrb[12].mxu0  ;;  %v5842_v2 = vrot.slane %v5837_v55, 4 }
 0x2ed   : > { %v9506_v10 = vpack.c.bf16 %v5682_v56, %v5682_v56  ;;  %v5504_v20 = vadd.f32 %v10316_v21, %v12559_v47  ;;  %v5417_v29 = vpop.f32.mrb[13].mxu0  ;;  %v9511_v39 = vpack.c.bf16 %v5687_v51, %v5687_v51  ;;  %v5502_v53 = vadd.f32 %v10317_v38, %v12559_v47  ;;  %v14455_v51 = vld [vmem:[#allocation7_spill] sm:$0xff] }
 0x2ee   : > { %v5862_v24 = vshrl.u32 %v9508_v35, 16  ;;  %v5841_v48 = vsel %vm12587_vm8, %v5833_v40, %v5840_v43  ;;  %v5685_v22 = vmul.f32 %v12574_v57, %v5524_v8  ;;  %v9957_v41 = vpop.f32.mrb[14].mxu0  ;;  %v5865_v31 = vshll.u32 %v9508_v35, 16  ;;  %v5635_v57 = vpop.permute.xlu0 %5634 }
 0x2ef   : > { %6036 = vst.msk [vmem:[#allocation3 + $0x10] sm:$0xf] %vm278_vm0, %v5841_v48  ;;  %v5844_v16 = vshrl.u32 %v9506_v10, 16  ;;  %v5527_v3 = vmax.f32 %v5504_v20, 0.0  ;;  %v5420_v13 = vpop.f32.mrb[15].mxu0  ;;  %v5847_v54 = vshll.u32 %v9506_v10, 16  ;;  %v10319_v8 = vadd.f32 %v5417_v29, %v14455_v51 }
 0x2f0   : > { %v5864_v19 = vrot.slane %v5862_v24, 7  ;;  %v5889_v15 = vshrl.u32 %v9511_v39, 16  ;;  %v9509_v25 = vpack.c.bf16 %v5685_v22, %v5685_v22  ;;  %v5525_v18 = vmax.f32 %v5502_v53, 0.0  ;;  %v14458_v53 = vld [vmem:[#allocation16_spill] sm:$0xff] }
 0x2f1   : > { %v5846_v33 = vrot.slane %v5844_v16, 7  ;;  %v5892_v30 = vshll.u32 %v9511_v39, 16  ;;  %v5688_v61 = vmul.f32 %v5620_v34, %v5527_v3  ;;  %v14457_v39 = vld [vmem:[#allocation13_spill] sm:$0xff] }
 0x2f2   : > { %v5867_v0 = vor.u32 %v5865_v31, %v5864_v19  ;;  %v5869_v26 = vrot.slane %v5864_v19, 4  ;;  %v5891_v27 = vrot.slane %v5889_v15, 7  ;;  %v5871_v28 = vshrl.u32 %v9509_v25, 16  ;;  %v12638_v10 = vpop.permute.xlu0 %5644  ;;  %v5640_v15 = vpop.permute.xlu1 %5639 }
 0x2f3   : > { %v5686_v1 = vmul.f32 %v5610_v46, %v5525_v18  ;;  %v5849_v7 = vor.u32 %v5847_v54, %v5846_v33  ;;  %v5851_v36 = vrot.slane %v5846_v33, 4  ;;  %v9512_v9 = vpack.c.bf16 %v5688_v61, %v5688_v61 }
 0x2f4   : > { %v5868_v5 = vsel %vm12587_vm8, %v5860_v23, %v5867_v0  ;;  %v5894_v12 = vor.u32 %v5892_v30, %v5891_v27  ;;  %v5873_v17 = vrot.slane %v5871_v28, 7  ;;  %v5874_v49 = vshll.u32 %v9509_v25, 16  ;;  %v9960_v6 = vpop.f32.mrb[16].mxu0  ;;  %v14454_v23 = vld [vmem:[#allocation8_spill] sm:$0xff] }
 0x2f5   : > { %6039 = vst.msk [vmem:[#allocation3 + $0x1c] sm:$0xf] %vm278_vm0, %v5868_v5  ;;  %v9510_v60 = vpack.c.bf16 %v5686_v1, %v5686_v1  ;;  %v5850_v32 = vsel %vm12587_vm8, %v5842_v2, %v5849_v7  ;;  %v5859_v46 = vsel %vm12587_vm8, %v5851_v36, %v5858_v11  ;;  %v5896_v21 = vrot.slane %v5891_v27, 4  ;;  %v5433_v59 = vpop.f32.mrb[17].mxu0  ;;  %v14456_v2 = vld [vmem:[#allocation14_spill] sm:$0xff]  ;;  %v14459_v7 = vld [vmem:[#allocation15_spill] sm:$0xff] }
 0x2f6   : > { %v5898_v55 = vshrl.u32 %v9512_v9, 16  ;;  %6037 = vst.msk [vmem:[#allocation3 + $0x14] sm:$0xf] %vm278_vm0, %v5850_v32  ;;  %6038 = vst.msk [vmem:[#allocation3 + $0x18] sm:$0xf] %vm278_vm0, %v5859_v46  ;;  %v5876_v42 = vor.u32 %v5874_v49, %v5873_v17  ;;  %v5901_v62 = vshll.u32 %v9512_v9, 16  ;;  %v10318_v43 = vadd.f32 %v9956_v63, %v14454_v23 }
 0x2f7   : > { %v5880_v38 = vshrl.u32 %v9510_v60, 16  ;;  %v5883_v40 = vshll.u32 %v9510_v60, 16  ;;  %v9961_v35 = vpop.f32.mrb[18].mxu0  ;;  %v10320_v11 = vadd.f32 %v9957_v41, %v14456_v2  ;;  %v10321_v22 = vadd.f32 %v5420_v13, %v14457_v39  ;;  %v14461_v32 = vld [vmem:[#allocation17_spill] sm:$0xff] }
 0x2f8   : > { %v12633_v56 = vrot.slane %v5898_v55, 7  ;;  %v5436_v24 = vpop.f32.mrb[19].mxu0  ;;  %v5877_v20 = vsel %vm12587_vm8, %v5869_v26, %v5876_v42  ;;  %v10322_v34 = vadd.f32 %v9960_v6, %v14458_v53  ;;  %v5878_v19 = vrot.slane %v5873_v17, 4  ;;  %v5655_v17 = vpop.permute.xlu0 %5654  ;;  %v14460_v6 = vld [vmem:[#allocation18_spill] sm:$0xff] }
 0x2f9   : > { %v5882_v48 = vrot.slane %v5880_v38, 7  ;;  %6040 = vst.msk [vmem:[#allocation3 + $0x20] sm:$0xf] %vm278_vm0, %v5877_v20  ;;  %v5507_v29 = vadd.f32 %v10318_v43, %v12559_v47  ;;  %v5505_v41 = vadd.f32 %v10319_v8, %v12559_v47  ;;  %v5508_v3 = vadd.f32 %v10320_v11, %v12559_v47  ;;  %v5650_v43 = vpop.permute.xlu1 %5649 }
 0x2fa   : > { %v5903_v63 = vor.u32 %v5901_v62, %v12633_v56  ;;  %v5506_v54 = vadd.f32 %v10321_v22, %v12559_v47  ;;  %v5511_v0 = vadd.f32 %v10322_v34, %v12559_v47  ;;  %v10323_v36 = vadd.f32 %v5433_v59, %v14459_v7 }
 0x2fb   : > { %v5885_v31 = vor.u32 %v5883_v40, %v5882_v48  ;;  %v5887_v16 = vrot.slane %v5882_v48, 4  ;;  %v5530_v25 = vmax.f32 %v5507_v29, 0.0  ;;  %v5528_v18 = vmax.f32 %v5505_v41, 0.0 }
 0x2fc   : > { %v5904_v13 = vsel %vm12587_vm8, %v5896_v21, %v5903_v63  ;;  %v5531_v61 = vmax.f32 %v5508_v3, 0.0  ;;  %v5529_v26 = vmax.f32 %v5506_v54, 0.0  ;;  %v12658_v27 = vpop.f32.mrb[48].mxu0  ;;  %v5534_v5 = vmax.f32 %v5511_v0, 0.0 }
 0x2fd   : > { %6043 = vst.msk [vmem:[#allocation3 + $0x2c] sm:$0xf] %vm278_vm0, %v5904_v13  ;;  %v5886_v33 = vsel %vm12587_vm8, %v5878_v19, %v5885_v31  ;;  %v5895_v30 = vsel %vm12587_vm8, %v5887_v16, %v5894_v12  ;;  %v5691_v28 = vmul.f32 %v5635_v57, %v5530_v25  ;;  %v5689_v1 = vmul.f32 %v12616_v52, %v5528_v18  ;;  %v5449_v9 = vpop.f32.mrb[49].mxu0  ;;  %v5660_v25 = vpop.permute.xlu1 %5659 }
 0x2fe   : > { %6041 = vst.msk [vmem:[#allocation3 + $0x24] sm:$0xf] %vm278_vm0, %v5886_v33  ;;  %6042 = vst.msk [vmem:[#allocation3 + $0x28] sm:$0xf] %vm278_vm0, %v5895_v30  ;;  %v5692_v49 = vmul.f32 %v5640_v15, %v5531_v61  ;;  %v5690_v60 = vmul.f32 %v5630_v58, %v5529_v26  ;;  %v10324_v12 = vadd.f32 %v9961_v35, %v14460_v6  ;;  %v9965_v21 = vpop.f32.mrb[50].mxu0  ;;  %v5905_v52 = vrot.slane %v12633_v56, 4 }
 0x2ff   : > { %v10325_v46 = vadd.f32 %v5436_v24, %v14461_v32  ;;  %v9515_v55 = vpack.c.bf16 %v5691_v28, %v5691_v28  ;;  %v9513_v42 = vpack.c.bf16 %v5689_v1, %v5689_v1  ;;  %v5695_v62 = vmul.f32 %v5655_v17, %v5534_v5  ;;  %v5452_v57 = vpop.f32.mrb[51].mxu0 }
 0x300   : > { %v5509_v38 = vadd.f32 %v10323_v36, %v12559_v47  ;;  %v9516_v40 = vpack.c.bf16 %v5692_v49, %v5692_v49  ;;  %v9514_v23 = vpack.c.bf16 %v5690_v60, %v5690_v60  ;;  %v5512_v59 = vadd.f32 %v10324_v12, %v12559_v47 }
 0x301   : > { %v5925_v51 = vshrl.u32 %v9515_v55, 16  ;;  %v5928_v58 = vshll.u32 %v9515_v55, 16  ;;  %v5907_v8 = vshrl.u32 %v9513_v42, 16  ;;  %v5510_v35 = vadd.f32 %v10325_v46, %v12559_v47 }
 0x302   : > { %v5910_v2 = vshll.u32 %v9513_v42, 16  ;;  %v5934_v11 = vshrl.u32 %v9516_v40, 16  ;;  %v5937_v24 = vshll.u32 %v9516_v40, 16  ;;  %v5916_v20 = vshrl.u32 %v9514_v23, 16 }
 0x303   : > { %v5927_v48 = vrot.slane %v5925_v51, 7  ;;  %v5909_v39 = vrot.slane %v5907_v8, 7  ;;  %v9519_v22 = vpack.c.bf16 %v5695_v62, %v5695_v62  ;;  %v5532_v53 = vmax.f32 %v5509_v38, 0.0 }
 0x304   : > { %v5936_v34 = vrot.slane %v5934_v11, 7  ;;  %v5918_v56 = vrot.slane %v5916_v20, 7  ;;  %v5919_v19 = vshll.u32 %v9514_v23, 16  ;;  %v5535_v63 = vmax.f32 %v5512_v59, 0.0  ;;  %v5665_v59 = vpop.permute.xlu0 %5664 }
 0x305   : > { %v5930_v29 = vor.u32 %v5928_v58, %v5927_v48  ;;  %v5932_v41 = vrot.slane %v5927_v48, 4  ;;  %v5912_v31 = vor.u32 %v5910_v2, %v5909_v39  ;;  %v5533_v16 = vmax.f32 %v5510_v35, 0.0 }
 0x306   : > { %v5914_v3 = vrot.slane %v5909_v39, 4  ;;  %v5939_v54 = vor.u32 %v5937_v24, %v5936_v34  ;;  %v5921_v15 = vor.u32 %v5919_v19, %v5918_v56  ;;  %v5923_v13 = vrot.slane %v5918_v56, 4 }
 0x307   : > { %v5913_v18 = vsel %vm12587_vm8, %v5905_v52, %v5912_v31  ;;  %v5961_v0 = vshrl.u32 %v9519_v22, 16  ;;  %v5693_v33 = vmul.f32 %v12638_v10, %v5532_v53  ;;  %v5696_v28 = vmul.f32 %v5660_v25, %v5535_v63 }
 0x308   : > { %6044 = vst.msk [vmem:[#allocation3 + $0x30] sm:$0xf] %vm278_vm0, %v5913_v18  ;;  %v5940_v30 = vsel %vm12587_vm8, %v5932_v41, %v5939_v54  ;;  %v5922_v61 = vsel %vm12587_vm8, %v5914_v3, %v5921_v15  ;;  %v5931_v26 = vsel %vm12587_vm8, %v5923_v13, %v5930_v29  ;;  %v5694_v5 = vmul.f32 %v5650_v43, %v5533_v16 }
 0x309   : > { %6047 = vst.msk [vmem:[#allocation3 + $0x3c] sm:$0xf] %vm278_vm0, %v5940_v30  ;;  %6045 = vst.msk [vmem:[#allocation3 + $0x34] sm:$0xf] %vm278_vm0, %v5922_v61  ;;  %v5963_v1 = vrot.slane %v5961_v0, 7  ;;  %v9517_v10 = vpack.c.bf16 %v5693_v33, %v5693_v33  ;;  %v5485_v7 = vadd.f32 %v12658_v27, %v12548_v44  ;;  %v5964_v36 = vshll.u32 %v9519_v22, 16 }
 0x30a   : > { %6046 = vst.msk [vmem:[#allocation3 + $0x38] sm:$0xf] %vm278_vm0, %v5931_v26  ;;  %v9520_v17 = vpack.c.bf16 %v5696_v28, %v5696_v28  ;;  %v5483_v49 = vadd.f32 %v5449_v9, %v12552_v4  ;;  %v5484_v60 = vadd.f32 %v5452_v57, %v12554_v45  ;;  %v5941_v6 = vrot.slane %v5936_v34, 4  ;;  %v6057_v33 = vld [vmem:[#allocation3 + $0x58] sm:$0x7] }
 0x30b   : > { %v5943_v12 = vshrl.u32 %v9517_v10, 16  ;;  %v5966_v32 = vor.u32 %v5964_v36, %v5963_v1  ;;  %v9518_v21 = vpack.c.bf16 %v5694_v5, %v5694_v5  ;;  %v5515_v55 = vadd.f32 %v12559_v47, %v5485_v7 }
 0x30c   : > { %v5970_v46 = vshrl.u32 %v9520_v17, 16  ;;  %v5946_v62 = vshll.u32 %v9517_v10, 16  ;;  %v5513_v38 = vadd.f32 %v12559_v47, %v5483_v49  ;;  %v5514_v52 = vadd.f32 %v12559_v47, %v5484_v60 }
 0x30d   : > { %v5945_v42 = vrot.slane %v5943_v12, 7  ;;  %v5973_v27 = vshll.u32 %v9520_v17, 16  ;;  %v5952_v40 = vshrl.u32 %v9518_v21, 16  ;;  %v5538_v23 = vmax.f32 %v5515_v55, 0.0 }
 0x30e   : > { %v5972_v44 = vrot.slane %v5970_v46, 7  ;;  %v5968_v4 = vrot.slane %v5963_v1, 4  ;;  %v5536_v45 = vmax.f32 %v5513_v38, 0.0  ;;  %v5537_v57 = vmax.f32 %v5514_v52, 0.0 }
 0x30f   : > { %v5948_v9 = vor.u32 %v5946_v62, %v5945_v42  ;;  %v5954_v51 = vrot.slane %v5952_v40, 7  ;;  %v5955_v58 = vshll.u32 %v9518_v21, 16  ;;  %v5699_v8 = vmul.f32 %v12565_v14, %v5538_v23 }
 0x310   : > { %v5975_v43 = vor.u32 %v5973_v27, %v5972_v44  ;;  %v5950_v2 = vrot.slane %v5945_v42, 4  ;;  %v5697_v11 = vmul.f32 %v5665_v59, %v5536_v45  ;;  %v5698_v47 = vmul.f32 %v12550_v50, %v5537_v57 }
 0x311   : > { %v5949_v35 = vsel %vm12587_vm8, %v5941_v6, %v5948_v9  ;;  %v5957_v20 = vor.u32 %v5955_v58, %v5954_v51  ;;  %v5959_v48 = vrot.slane %v5954_v51, 4  ;;  %v9523_v39 = vpack.c.bf16 %v5699_v8, %v5699_v8 }
 0x312   : > { %6048 = vst.msk [vmem:[#allocation3 + $0x40] sm:$0xf] %vm278_vm0, %v5949_v35  ;;  %v5976_v24 = vsel %vm12587_vm8, %v5968_v4, %v5975_v43  ;;  %v9521_v22 = vpack.c.bf16 %v5697_v11, %v5697_v11  ;;  %v9522_v53 = vpack.c.bf16 %v5698_v47, %v5698_v47  ;;  %v5977_v54 = vrot.slane %v5972_v44, 4 }
 0x313   : > { %6051 = vst.msk [vmem:[#allocation3 + $0x4c] sm:$0xf] %vm278_vm0, %v5976_v24  ;;  %v5958_v14 = vsel %vm12587_vm8, %v5950_v2, %v5957_v20  ;;  %v5967_v34 = vsel %vm12587_vm8, %v5959_v48, %v5966_v32  ;;  %v5997_v56 = vshrl.u32 %v9523_v39, 16  ;;  %v6000_v29 = vshll.u32 %v9523_v39, 16 }
 0x314   : > { %6049 = vst.msk [vmem:[#allocation3 + $0x44] sm:$0xf] %vm278_vm0, %v5958_v14  ;;  %6050 = vst.msk [vmem:[#allocation3 + $0x48] sm:$0xf] %vm278_vm0, %v5967_v34  ;;  %v5979_v50 = vshrl.u32 %v9521_v22, 16  ;;  %v5988_v19 = vshrl.u32 %v9522_v53, 16 }
 0x315   : > { %v5999_v63 = vrot.slane %v5997_v56, 7  ;;  %v5982_v31 = vshll.u32 %v9521_v22, 16  ;;  %v5991_v3 = vshll.u32 %v9522_v53, 16  ;;  %v10593_v1 = vmov (!%p9087_p7), 0  }
 0x316   : > { %v5981_v41 = vrot.slane %v5979_v50, 7  ;;  %v5990_v16 = vrot.slane %v5988_v19, 7  ;;  %6062 = sbr.rel (%p9087_p7) target bundleno = 797 (0x31d), region = 56  ;;  %6063 = vst.msk [vmem:[#allocation3] sm:$0xf] (!%p9087_p7), %vm278_vm0, %v10593_v1 }
 0x317   : > { %v6002_v15 = vor.u32 %v6000_v29, %v5999_v63  ;;  %6064 = vst.msk [vmem:[#allocation3 + $0x4] sm:$0xf] (!%p9087_p7), %vm278_vm0, %v10593_v1 }
 0x318   : > { %v5984_v13 = vor.u32 %v5982_v31, %v5981_v41  ;;  %v5986_v25 = vrot.slane %v5981_v41, 4  ;;  %v5993_v18 = vor.u32 %v5991_v3, %v5990_v16  ;;  %v5995_v0 = vrot.slane %v5990_v16, 4  ;;  %6065 = vst.msk [vmem:[#allocation3 + $0x8] sm:$0x1] (!%p9087_p7), %vm281_vm1, %v10593_v1 }
 0x31a   : > { %v5985_v30 = vsel %vm12587_vm8, %v5977_v54, %v5984_v13  ;;  %v5994_v61 = vsel %vm12587_vm8, %v5986_v25, %v5993_v18  ;;  %v6003_v26 = vsel %vm12587_vm8, %v5995_v0, %v6002_v15 }
 0x31b   : > { %6052 = vst.msk [vmem:[#allocation3 + $0x50] sm:$0xf] %vm278_vm0, %v5985_v30  ;;  %6053 = vst.msk [vmem:[#allocation3 + $0x54] sm:$0xf] %vm278_vm0, %v5994_v61  ;;  %v6058_v28 = vsel %vm6056_vm10, %v6003_v26, %v6057_v33 }
 0x31c   : > { %6059 = vst [vmem:[#allocation3 + $0x58] sm:$0x7] %v6058_v28 }
 0x31d PF: > { %6068 = sbr.rel (%p9108_p8) target bundleno = 804 (0x324), region = 60  ;;  %vm6069_vm11 = vcmask (!%p9108_p8), 27649   ;;  %vm6072_vm12 = vcmask (!%p9108_p8), 25600   ;;  %v10594_v37 = vmov (!%p9108_p8), 0  }
 0x31e   : > { %6070 = vst.msk [vmem:[#allocation3 + $0x50] sm:$0xe] (!%p9108_p8), %vm6069_vm11, %v10594_v37 }
 0x31f   : > { %6071 = vst.msk [vmem:[#allocation3 + $0x54] sm:$0xf] (!%p9108_p8), %vm278_vm0, %v10594_v37 }
 0x320   : > { %6073 = vst.msk [vmem:[#allocation3 + $0x58] sm:$0x3] (!%p9108_p8), %vm6072_vm12, %v10594_v37 }
 0x324 PF: > { %v9352_v10 = vld [vmem:[%s14194_s3 + $0x2] sm:$0x3]  ;;  %v14267_v5 = vmov 0.0   ;;  %vm10596_vm1 = vmmov 0   ;;  %v12730_v17 = vld [vmem:[#allocation3 + $0x8] sm:$0xff]   ;;  %v12736_v6 = vld [vmem:[#allocation3 + $0x10] sm:$0xff]  }
 0x325   : > { %9966 = vmatprep.subr.bf16.mxu1 %v14267_v5  ;;  %v6252_v7 = vsel %vm2575_vm14, %v9352_v10, 0  ;;  %9968 = vmatprep.mubr.msk.bf16.mxu1 %vm10596_vm1, %v14267_v5  ;;  %v12728_v36 = vld [vmem:[#allocation3] sm:$0xff]   ;;  %v6156_v12 = vshll.u32 %v12730_v17, 16  ;;  %v6160_v32 = vshrl.u32 %v12730_v17, 16  ;;  %v12750_v52 = vshll.u32 %v12736_v6, 16  ;;  %v12760_v9 = vld [vmem:[#allocation3 + $0x18] sm:$0xff]  }
 0x326   : > { %9967 = vmatpush3.bf16.msra.mxu1 %v6252_v7  ;;  %10194 = vmatprep.subr.bf16.mxu0 %v14267_v5  ;;  %v6149_v49 = vshrl.u32 %v12728_v36, 16  ;;  %v6151_v60 = vshll.u32 %v12728_v36, 16  ;;  %v6097_v21 = vld [vmem:[%s14194_s3] sm:$0x3]  ;;  %v12765_v57 = vshrl.u32 %v12736_v6, 16  ;;  %v12768_v59 = vshll.u32 %v12760_v9, 16 }
 0x327   : > { %10004 = vmatprep.subr.bf16.mxu1 %v14267_v5  ;;  %10196 = vmatprep.mubr.msk.bf16.mxu0 %vm10596_vm1, %v14267_v5  ;;  %v6158_v55 = vrot.slane %v6156_v12, 1  ;;  %v12745_v42 = vrot.slane %v6156_v12, 2  ;;  %v12747_v62 = vrot.slane %v6160_v32, 1  ;;  %14462 = vst [vmem:[#allocation20_spill] sm:$0xff] %v12750_v52  ;;  %v6378_v44 = vsel %vm2575_vm14, %v6097_v21, 0  ;;  %v12775_v58 = vld [vmem:[#allocation3 + $0x20] sm:$0xff]  }
 0x328   : > { %v6153_v46 = vrot.slane %v6151_v60, 1  ;;  %v6166_v4 = vrot.slane %v12750_v52, 1  ;;  %14463 = vst [vmem:[#allocation19_spill] sm:$0xff] %v12765_v57  ;;  %14464 = vst [vmem:[#allocation22_spill] sm:$0xff] %v12768_v59  ;;  %v6174_v51 = vrot.slane %v12768_v59, 1  ;;  %v12779_v35 = vshrl.u32 %v12760_v9, 16 }
 0x329   : > { %v6162_v23 = vor.u32 %v6160_v32, %v6158_v55  ;;  %v12782_v2 = vshll.u32 %v12775_v58, 16  ;;  %v12789_v24 = vld [vmem:[#allocation3 + $0x28] sm:$0xff]   ;;  %v12793_v48 = vshrl.u32 %v12775_v58, 16  ;;  %v12803_v14 = vld [vmem:[#allocation3 + $0x30] sm:$0xff]   ;;  %v12817_v29 = vld [vmem:[#allocation3 + $0x38] sm:$0xff]   ;;  %v6488_v12 = vrot.slane %v12728_v36, 1 }
 0x32a   : > { %v6154_v38 = vor.u32 %v6153_v46, %v6149_v49  ;;  %v6170_v43 = vor.u32 %v12765_v57, %v6166_v4  ;;  %v6178_v11 = vor.u32 %v12779_v35, %v6174_v51  ;;  %v12796_v39 = vshll.u32 %v12789_v24, 16  ;;  %v12831_v15 = vld [vmem:[#allocation3 + $0x40] sm:$0xff]   ;;  %v12840_v0 = vld [vmem:[#allocation3 + $0x48] sm:$0xf]  ;;  %s9524_s22 = sshll.u32 %s10573_s21, 7 }
 0x32b   : > { %v6167_v45 = vsel %vm2442_vm15, %v6162_v23, %v6166_v4  ;;  %v6182_v47 = vrot.slane %v12782_v2, 1  ;;  %v12807_v56 = vshrl.u32 %v12789_v24, 16  ;;  %v12810_v50 = vshll.u32 %v12803_v14, 16  ;;  %v9381_v49 = vld [vmem:[%s14194_s3 + $0x4] sm:$0x3]  ;;  %s13686_s28 = scalar_lea.vmem %s10759_s10, %s9524_s22 }
 0x32c   : > { %v6159_v40 = vsel %vm2442_vm15, %v6154_v38, %v6158_v55  ;;  %v6175_v8 = vsel %vm2442_vm15, %v6170_v43, %v6174_v51  ;;  %v6190_v53 = vrot.slane %v12796_v39, 1  ;;  %v12821_v31 = vshrl.u32 %v12803_v14, 16  ;;  %v9391_v46 = vld [vmem:[%s14194_s3 + $0x6] sm:$0x3] }
 0x32d   : > { %9969 = vmatmul.mubr.msk.bf16.vlgmr.msra.gmra.mrb[20].mxu1 %vm2538_vm2, %v6159_v40  ;;  %v6183_v20 = vsel %vm2442_vm15, %v6178_v11, %v6182_v47  ;;  %v6186_v22 = vor.u32 %v12793_v48, %v6182_v47  ;;  %v6198_v63 = vrot.slane %v12810_v50, 1  ;;  %v12824_v16 = vshll.u32 %v12817_v29, 16 }
 0x32e   : > { %10005 = vmatpush3.bf16.msra.mxu1 %v6378_v44  ;;  %9972 = vmatprep.mubr.msk.bf16.mxu1 %vm10596_vm1, %v14267_v5  ;;  %v6194_v19 = vor.u32 %v12807_v56, %v6190_v53  ;;  %v12835_v25 = vshrl.u32 %v12817_v29, 16  ;;  %v12838_v18 = vshll.u32 %v12831_v15, 16  ;;  %v12849_v61 = vcombine.low %v12840_v0, %v12840_v0 }
 0x32f   : > { %10042 = vmatprep.subr.bf16.mxu1 %v14267_v5  ;;  %v6191_v34 = vsel %vm2442_vm15, %v6186_v22, %v6190_v53  ;;  %v6202_v3 = vor.u32 %v12821_v31, %v6198_v63  ;;  %v6206_v54 = vrot.slane %v12824_v16, 1  ;;  %v12853_v28 = vshrl.u32 %v12831_v15, 16 }
 0x330   : > { %v6199_v41 = vsel %vm2442_vm15, %v6194_v19, %v6198_v63  ;;  %v6214_v30 = vrot.slane %v12838_v18, 1  ;;  %v6220_v1 = vshll.u32 %v12849_v61, 16  ;;  %v6535_v60 = vsel %vm2575_vm14, %v9381_v49, 0  ;;  %v9403_v63 = vld [vmem:[%s14194_s3 + $0x8] sm:$0x3] }
 0x331   : > { %v6207_v13 = vsel %vm2442_vm15, %v6202_v3, %v6206_v54  ;;  %v6210_v33 = vor.u32 %v12835_v25, %v6206_v54  ;;  %v6489_v32 = vrot.slane %v12730_v17, 1  ;;  %vm6487_vm0 = vcmask 1046528  }
 0x332   : > { %v6218_v37 = vor.u32 %v12853_v28, %v6214_v30  ;;  %v6222_v10 = vrot.slane %v6220_v1, 1  ;;  %v6679_v55 = vsel %vm2575_vm14, %v9391_v46, 0  ;;  %v6491_v38 = vrot.slane %v12736_v6, 1  ;;  %v9423_v1 = vld [vmem:[%s14194_s3 + $0xc] sm:$0x3] }
 0x333   : > { %v6215_v26 = vsel %vm2442_vm15, %v6210_v33, %v6214_v30  ;;  %v6490_v21 = vsel %vm6487_vm0, %v6488_v12, %v6489_v32  ;;  %v6493_v44 = vrot.slane %v12760_v9, 1  ;;  %v6495_v23 = vrot.slane %v12775_v58, 1 }
 0x334   : > { %v6223_v7 = vsel %vm2442_vm15, %v6218_v37, %v6222_v10  ;;  %v6499_v51 = vrot.slane %v12803_v14, 1  ;;  %v6501_v11 = vrot.slane %v12817_v29, 1  ;;  %v6505_v53 = vrot.slane %v12849_v61, 1 }
 0x335   : > { %9973 = vmatmul.mubr.msk.bf16.gmra.mrb[24].mxu1 %vm2538_vm2, %v6167_v45  ;;  %v6494_v40 = vsel %vm6487_vm0, %v6491_v38, %v6493_v44  ;;  %v6496_v4 = vsel %vm6487_vm0, %v6493_v44, %v6495_v23  ;;  %v6497_v45 = vrot.slane %v12789_v24, 1  ;;  %v7203_v10 = vsel %vm2575_vm14, %v9423_v1, 0 }
 0x336   : > { %9976 = vmatprep.mubr.msk.bf16.mxu1 %vm10596_vm1, %v14267_v5  ;;  %v12946_v47 = vsel %vm6487_vm0, %v6499_v51, %v6501_v11  ;;  %10195 = vmatpush3.bf16.msra.mxu0 %v7203_v10  ;;  %v14265_v49 = vrot.slane %v12736_v6, 2  ;;  %vm7011_vm13 = vcmask 1045504   ;;  %v7017_v44 = vrot.slane %v12775_v58, 2 }
 0x337   : > { %v6498_v43 = vsel %vm6487_vm0, %v6495_v23, %v6497_v45  ;;  %10270 = vmatprep.subr.bf16.mxu0 %v14267_v5  ;;  %vm6806_vm15 = vsmask.f32 6400  ;;  %vm7535_vm3 = vcmask 1044480  }
 0x33d   : > { %9977 = vmatmul.mubr.msk.bf16.gmra.mrb[28].mxu1 %vm2538_vm2, %v6175_v8  ;;  %v12938_v8 = vsel %vm6487_vm0, %v6497_v45, %v6499_v51 }
 0x33e   : > { %9980 = vmatprep.mubr.msk.bf16.mxu1 %vm10596_vm1, %v14267_v5 }
 0x345   : > { %9981 = vmatmul.mubr.msk.bf16.gmra.mrb[32].mxu1 %vm2538_vm2, %v6183_v20  ;;  %v12953_v20 = vrot.slane %v12831_v15, 1 }
 0x346   : > { %9984 = vmatprep.mubr.msk.bf16.mxu1 %vm10596_vm1, %v14267_v5 }
 0x347   : > { %v12957_v22 = vsel %vm6487_vm0, %v6501_v11, %v12953_v20  ;;  %v7019_v11 = vrot.slane %v12789_v24, 2 }
 0x34d   : > { %9985 = vmatmul.mubr.msk.bf16.gmra.mrb[36].mxu1 %vm2538_vm2, %v6191_v34  ;;  %v6506_v34 = vsel %vm6487_vm0, %v12953_v20, %v6505_v53 }
 0x34e   : > { %9988 = vmatprep.mubr.msk.bf16.mxu1 %vm10596_vm1, %v14267_v5 }
 0x355   : > { %9989 = vmatmul.mubr.msk.bf16.gmra.mrb[40].mxu1 %vm2538_vm2, %v6199_v41 }
 0x356   : > { %9992 = vmatprep.mubr.msk.bf16.mxu1 %vm10596_vm1, %v14267_v5 }
 0x35d   : > { %9993 = vmatmul.mubr.msk.bf16.gmra.mrb[44].mxu1 %vm2538_vm2, %v6207_v13  ;;  %v6884_v13 = vsel %vm2575_vm14, %v9403_v63, 0  ;;  %v13036_v63 = vsel %vm7011_vm13, %v7017_v44, %v7019_v11 }
 0x35e   : > { %9996 = vmatprep.mubr.msk.bf16.mxu1 %vm10596_vm1, %v14267_v5 }
 0x365   : > { %9997 = vmatmul.mubr.msk.bf16.gmra.mrb[48].mxu1 %vm2538_vm2, %v6215_v26 }
 0x366   : > { %10000 = vmatprep.mubr.msk.bf16.mxu1 %vm10596_vm1, %v14267_v5 }
 0x36d   : > { %10001 = vmatmul.mubr.msk.bf16.gmra.mrb[52].mxu1 %vm2538_vm2, %v6223_v7 }
 0x36e   : > { %10006 = vmatprep.mubr.msk.bf16.mxu1 %vm10596_vm1, %v14267_v5 }
 0x375   : > { %10007 = vmatmul.mubr.msk.bf16.vlgmr.msra.gmra.mrb[56].mxu1 %vm2538_vm2, %v12728_v36  ;;  %v6492_v36 = vsel %vm6487_vm0, %v6489_v32, %v6491_v38 }
 0x376   : > { %10043 = vmatpush3.bf16.msra.mxu1 %v6535_v60  ;;  %10010 = vmatprep.mubr.msk.bf16.mxu1 %vm10596_vm1, %v14267_v5  ;;  %v7015_v60 = vrot.slane %v12760_v9, 2 }
 0x377   : > { %10080 = vmatprep.subr.bf16.mxu1 %v14267_v5 }
 0x378   : > { %v13002_v46 = vsel %vm7011_vm13, %v14265_v49, %v7015_v60 }
 0x379   : > { %10197 = vmatmul.mubr.msk.bf16.vlgmr.msra.gmra.mrb[52].mxu0 %vm2538_vm2, %v13002_v46 }
 0x37a   : > { %10200 = vmatprep.mubr.msk.bf16.mxu0 %vm10596_vm1, %v14267_v5 }
 0x37d   : > { %10011 = vmatmul.mubr.msk.bf16.gmra.mrb[60].mxu1 %vm2538_vm2, %v12730_v17 }
 0x37e   : > { %10014 = vmatprep.mubr.msk.bf16.mxu1 %vm10596_vm1, %v14267_v5 }
 0x385   : > { %10015 = vmatmul.mubr.msk.bf16.gmra.mrb[64].mxu1 %vm2538_vm2, %v12736_v6 }
 0x386   : > { %10018 = vmatprep.mubr.msk.bf16.mxu1 %vm10596_vm1, %v14267_v5 }
 0x38d   : > { %10019 = vmatmul.mubr.msk.bf16.gmra.mrb[68].mxu1 %vm2538_vm2, %v12760_v9 }
 0x38e   : > { %10022 = vmatprep.mubr.msk.bf16.mxu1 %vm10596_vm1, %v14267_v5 }
 0x395   : > { %10023 = vmatmul.mubr.msk.bf16.gmra.mrb[72].mxu1 %vm2538_vm2, %v12775_v58 }
 0x396   : > { %10026 = vmatprep.mubr.msk.bf16.mxu1 %vm10596_vm1, %v14267_v5 }
 0x39d   : > { %10027 = vmatmul.mubr.msk.bf16.gmra.mrb[76].mxu1 %vm2538_vm2, %v12789_v24 }
 0x39e   : > { %10030 = vmatprep.mubr.msk.bf16.mxu1 %vm10596_vm1, %v14267_v5 }
 0x3a5   : > { %10031 = vmatmul.mubr.msk.bf16.gmra.mrb[80].mxu1 %vm2538_vm2, %v12803_v14 }
 0x3a6   : > { %10034 = vmatprep.mubr.msk.bf16.mxu1 %vm10596_vm1, %v14267_v5 }
 0x3ad   : > { %10035 = vmatmul.mubr.msk.bf16.gmra.mrb[84].mxu1 %vm2538_vm2, %v12817_v29 }
 0x3ae   : > { %10038 = vmatprep.mubr.msk.bf16.mxu1 %vm10596_vm1, %v14267_v5 }
 0x3b5   : > { %10039 = vmatmul.mubr.msk.bf16.gmra.mrb[88].mxu1 %vm2538_vm2, %v12831_v15 }
 0x3b6   : > { %10044 = vmatprep.mubr.msk.bf16.mxu1 %vm10596_vm1, %v14267_v5 }
 0x3bd   : > { %10045 = vmatmul.mubr.msk.bf16.vlgmr.msra.gmra.mrb[92].mxu1 %vm2538_vm2, %v6490_v21  ;;  %v9445_v21 = vld [vmem:[%s14194_s3 + $0x10] sm:$0x3] }
 0x3be   : > { %10081 = vmatpush3.bf16.msra.mxu1 %v6679_v55  ;;  %10048 = vmatprep.mubr.msk.bf16.mxu1 %vm10596_vm1, %v14267_v5  ;;  %v7583_v55 = vsel %vm2575_vm14, %v9445_v21, 0 }
 0x3bf   : > { %10118 = vmatprep.subr.bf16.mxu1 %v14267_v5  ;;  %10271 = vmatpush3.bf16.msra.mxu0 %v7583_v55  ;;  %v6094_v55 = vld [vmem:[#allocation3 + $0x50] sm:$0xf] }
 0x3c5   : > { %10049 = vmatmul.mubr.msk.bf16.gmra.mrb[96].mxu1 %vm2538_vm2, %v6492_v36 }
 0x3c6   : > { %10052 = vmatprep.mubr.msk.bf16.mxu1 %vm10596_vm1, %v14267_v5 }
 0x3cd   : > { %10053 = vmatmul.mubr.msk.bf16.gmra.mrb[100].mxu1 %vm2538_vm2, %v6494_v40 }
 0x3ce   : > { %10056 = vmatprep.mubr.msk.bf16.mxu1 %vm10596_vm1, %v14267_v5 }
 0x3d5   : > { %10057 = vmatmul.mubr.msk.bf16.gmra.mrb[104].mxu1 %vm2538_vm2, %v6496_v4 }
 0x3d6   : > { %10060 = vmatprep.mubr.msk.bf16.mxu1 %vm10596_vm1, %v14267_v5 }
 0x3dd   : > { %10061 = vmatmul.mubr.msk.bf16.gmra.mrb[108].mxu1 %vm2538_vm2, %v6498_v43 }
 0x3de   : > { %10064 = vmatprep.mubr.msk.bf16.mxu1 %vm10596_vm1, %v14267_v5 }
 0x3e5   : > { %10065 = vmatmul.mubr.msk.bf16.gmra.mrb[112].mxu1 %vm2538_vm2, %v12938_v8 }
 0x3e6   : > { %10068 = vmatprep.mubr.msk.bf16.mxu1 %vm10596_vm1, %v14267_v5 }
 0x3ed   : > { %10069 = vmatmul.mubr.msk.bf16.gmra.mrb[116].mxu1 %vm2538_vm2, %v12946_v47 }
 0x3ee   : > { %10072 = vmatprep.mubr.msk.bf16.mxu1 %vm10596_vm1, %v14267_v5 }
 0x3f5   : > { %10073 = vmatmul.mubr.msk.bf16.gmra.mrb[120].mxu1 %vm2538_vm2, %v12957_v22 }
 0x3f6   : > { %10076 = vmatprep.mubr.msk.bf16.mxu1 %vm10596_vm1, %v14267_v5 }
 0x3fd   : > { %10077 = vmatmul.mubr.msk.bf16.gmra.mrb[124].mxu1 %vm2538_vm2, %v6506_v34 }
 0x3fe   : > { %10082 = vmatprep.mubr.msk.bf16.mxu1 %vm10596_vm1, %v14267_v5 }
 0x400   : > { %v12969_v19 = vpop.f32.mrb[20].mxu1 }
 0x401   : > { %v9970_v41 = vpop.f32.mrb[21].mxu1 }
 0x402   : > { %v12974_v3 = vpop.f32.mrb[22].mxu1 }
 0x403   : > { %v9971_v54 = vpop.f32.mrb[23].mxu1 }
 0x404   : > { %v7021_v54 = vrot.slane %v12803_v14, 2 }
 0x405   : > { %10083 = vmatmul.mubr.msk.bf16.vlgmr.msra.gmra.mrb[128].mxu1 %vm2538_vm2, %v6492_v36 }
 0x406   : > { %10119 = vmatpush3.bf16.msra.mxu1 %v6884_v13  ;;  %10086 = vmatprep.mubr.msk.bf16.mxu1 %vm10596_vm1, %v14267_v5 }
 0x407   : > { %10156 = vmatprep.subr.bf16.mxu1 %v14267_v5 }
 0x408   : > { %v12981_v33 = vpop.f32.mrb[24].mxu1 }
 0x409   : > { %v9974_v30 = vpop.f32.mrb[25].mxu1 }
 0x40a   : > { %v12983_v61 = vpop.f32.mrb[26].mxu1 }
 0x40b   : > { %v9975_v26 = vpop.f32.mrb[27].mxu1 }
 0x40c   : > { %v13052_v26 = vsel %vm7011_vm13, %v7019_v11, %v7021_v54 }
 0x40d   : > { %10087 = vmatmul.mubr.msk.bf16.gmra.mrb[132].mxu1 %vm2538_vm2, %v6494_v40 }
 0x40e   : > { %10090 = vmatprep.mubr.msk.bf16.mxu1 %vm10596_vm1, %v14267_v5 }
 0x410   : > { %v12991_v37 = vpop.f32.mrb[28].mxu1 }
 0x411   : > { %v9978_v7 = vpop.f32.mrb[29].mxu1 }
 0x412   : > { %v12996_v12 = vpop.f32.mrb[30].mxu1  ;;  %v7023_v7 = vrot.slane %v12817_v29, 2 }
 0x413   : > { %v9979_v32 = vpop.f32.mrb[31].mxu1 }
 0x415   : > { %10091 = vmatmul.mubr.msk.bf16.gmra.mrb[136].mxu1 %vm2538_vm2, %v6496_v4  ;;  %v13021_v4 = vsel %vm7011_vm13, %v7015_v60, %v7017_v44 }
 0x416   : > { %10094 = vmatprep.mubr.msk.bf16.mxu1 %vm10596_vm1, %v14267_v5  ;;  %10201 = vmatmul.mubr.msk.bf16.gmra.mrb[56].mxu0 %vm2538_vm2, %v13021_v4 }
 0x417   : > { %10204 = vmatprep.mubr.msk.bf16.mxu0 %vm10596_vm1, %v14267_v5 }
 0x418   : > { %v13015_v38 = vpop.f32.mrb[32].mxu1 }
 0x419   : > { %v9982_v36 = vpop.f32.mrb[33].mxu1 }
 0x41a   : > { %v13018_v40 = vpop.f32.mrb[34].mxu1 }
 0x41b   : > { %v9983_v23 = vpop.f32.mrb[35].mxu1 }
 0x41c   : > { %v7025_v23 = vrot.slane %v12831_v15, 2 }
 0x41d   : > { %10095 = vmatmul.mubr.msk.bf16.gmra.mrb[140].mxu1 %vm2538_vm2, %v6498_v43 }
 0x41e   : > { %10098 = vmatprep.mubr.msk.bf16.mxu1 %vm10596_vm1, %v14267_v5  ;;  %10205 = vmatmul.mubr.msk.bf16.gmra.mrb[60].mxu0 %vm2538_vm2, %v13036_v63 }
 0x41f   : > { %10208 = vmatprep.mubr.msk.bf16.mxu0 %vm10596_vm1, %v14267_v5 }
 0x420   : > { %v13030_v45 = vpop.f32.mrb[36].mxu1 }
 0x421   : > { %v9986_v51 = vpop.f32.mrb[37].mxu1 }
 0x422   : > { %v13033_v53 = vpop.f32.mrb[38].mxu1 }
 0x423   : > { %v9987_v34 = vpop.f32.mrb[39].mxu1 }
 0x425   : > { %10099 = vmatmul.mubr.msk.bf16.gmra.mrb[144].mxu1 %vm2538_vm2, %v12938_v8  ;;  %v6093_v8 = vld [vmem:[#allocation3 + $0x4c] sm:$0xf] }
 0x426   : > { %10102 = vmatprep.mubr.msk.bf16.mxu1 %vm10596_vm1, %v14267_v5  ;;  %10209 = vmatmul.mubr.msk.bf16.gmra.mrb[64].mxu0 %vm2538_vm2, %v13052_v26  ;;  %v13066_v60 = vcombine.low %v12840_v0, %v6093_v8 }
 0x427   : > { %10212 = vmatprep.mubr.msk.bf16.mxu0 %vm10596_vm1, %v14267_v5 }
 0x428   : > { %v13046_v43 = vpop.f32.mrb[40].mxu1  ;;  %v6668_v0 = vrot.slane %v13066_v60, 1  ;;  %v13105_v8 = vrot.slane %v13066_v60, 2 }
 0x429   : > { %v9990_v41 = vpop.f32.mrb[41].mxu1 }
 0x42a   : > { %v13049_v13 = vpop.f32.mrb[42].mxu1  ;;  %v6669_v11 = vsel %vm6487_vm0, %v12953_v20, %v6668_v0  ;;  %v13092_v41 = vsel %vm7011_vm13, %v7023_v7, %v7025_v23 }
 0x42b   : > { %v9991_v30 = vpop.f32.mrb[43].mxu1 }
 0x42d   : > { %10103 = vmatmul.mubr.msk.bf16.gmra.mrb[148].mxu1 %vm2538_vm2, %v12946_v47  ;;  %v13071_v47 = vsel %vm7011_vm13, %v7021_v54, %v7023_v7 }
 0x42e   : > { %10106 = vmatprep.mubr.msk.bf16.mxu1 %vm10596_vm1, %v14267_v5  ;;  %10213 = vmatmul.mubr.msk.bf16.gmra.mrb[68].mxu0 %vm2538_vm2, %v13071_v47 }
 0x42f   : > { %10216 = vmatprep.mubr.msk.bf16.mxu0 %vm10596_vm1, %v14267_v5 }
 0x430   : > { %v13062_v1 = vpop.f32.mrb[44].mxu1 }
 0x431   : > { %v9994_v10 = vpop.f32.mrb[45].mxu1 }
 0x432   : > { %v13068_v32 = vpop.f32.mrb[46].mxu1 }
 0x433   : > { %v9995_v21 = vpop.f32.mrb[47].mxu1 }
 0x434   : > { %v6810_v21 = vrot.slane %v12765_v57, 1 }
 0x435   : > { %10107 = vmatmul.mubr.msk.bf16.gmra.mrb[152].mxu1 %vm2538_vm2, %v12957_v22  ;;  %v13089_v22 = vcombine.low %v6094_v55, %v6094_v55 }
 0x436   : > { %10110 = vmatprep.mubr.msk.bf16.mxu1 %vm10596_vm1, %v14267_v5  ;;  %10217 = vmatmul.mubr.msk.bf16.gmra.mrb[72].mxu0 %vm2538_vm2, %v13092_v41 }
 0x437   : > { %10220 = vmatprep.mubr.msk.bf16.mxu0 %vm10596_vm1, %v14267_v5  ;;  %v6670_v54 = vrot.slane %v13089_v22, 1 }
 0x438   : > { %v13082_v36 = vpop.f32.mrb[48].mxu1 }
 0x439   : > { %v9998_v44 = vpop.f32.mrb[49].mxu1  ;;  %v6671_v7 = vsel %vm6487_vm0, %v6668_v0, %v6670_v54  ;;  %v6095_v54 = vld [vmem:[#allocation3 + $0x54] sm:$0xf] }
 0x43a   : > { %v13085_v51 = vpop.f32.mrb[50].mxu1  ;;  %v6811_v44 = vrot.slane %v12750_v52, 2 }
 0x43b   : > { %v9999_v34 = vpop.f32.mrb[51].mxu1 }
 0x43c   : > { %v13114_v34 = vsel %vm7011_vm13, %v7025_v23, %v13105_v8  ;;  %v6812_v0 = vor.u32 %v6811_v44, %v6810_v21  ;;  %v9413_v23 = vld [vmem:[%s14194_s3 + $0xa] sm:$0x3]  ;;  %v6815_v44 = vrot.slane %v12768_v59, 2 }
 0x43d   : > { %10111 = vmatmul.mubr.msk.bf16.gmra.mrb[156].mxu1 %vm2538_vm2, %v6669_v11 }
 0x43e   : > { %10114 = vmatprep.mubr.msk.bf16.mxu1 %vm10596_vm1, %v14267_v5  ;;  %10221 = vmatmul.mubr.msk.bf16.gmra.mrb[76].mxu0 %vm2538_vm2, %v13114_v34 }
 0x43f   : > { %10224 = vmatprep.mubr.msk.bf16.mxu0 %vm10596_vm1, %v14267_v5 }
 0x440   : > { %v13102_v20 = vpop.f32.mrb[52].mxu1 }
 0x441   : > { %v10002_v30 = vpop.f32.mrb[53].mxu1 }
 0x442   : > { %v13107_v10 = vpop.f32.mrb[54].mxu1  ;;  %v13123_v30 = vcombine.low %v6094_v55, %v6095_v54  ;;  %v6814_v55 = vrot.slane %v12779_v35, 1 }
 0x443   : > { %v10003_v11 = vpop.f32.mrb[55].mxu1 }
 0x444   : > { %v7192_v27 = vrot.slane %v13123_v30, 2 }
 0x445   : > { %10115 = vmatmul.mubr.msk.bf16.gmra.mrb[160].mxu1 %vm2538_vm2, %v6671_v7 }
 0x446   : > { %10120 = vmatprep.mubr.msk.bf16.mxu1 %vm10596_vm1, %v14267_v5  ;;  %v14465_v5 = vor.u32 %v12745_v42, %v12747_v62  ;;  %v14466_v42 = vmov 0.0   ;;  %v13151_v62 = vld [vmem:[#allocation3 + $0x58] ss:$0 sps:$4 sm:$0xff]  }
 0x448   : > { %v6414_v11 = vpop.f32.mrb[56].mxu1  ;;  %v6813_v21 = vsel %vm6806_vm15, %v14465_v5, %v6812_v0  ;;  %v6816_v5 = vor.u32 %v6815_v44, %v6814_v55 }
 0x449   : > { %v13129_v49 = vadd.f32 %v6414_v11, %v12969_v19  ;;  %v10008_v7 = vpop.f32.mrb[57].mxu1  ;;  %v7059_v19 = vsel %vm2575_vm14, %v9413_v23, 0  ;;  %v7193_v11 = vsel %vm7011_vm13, %v13105_v8, %v7192_v27  ;;  %v7194_v23 = vrot.slane %v13151_v62, 2 }
 0x44a   : > { %v6417_v52 = vpop.f32.mrb[58].mxu1  ;;  %10225 = vmatmul.mubr.msk.bf16.gmra.mrb[80].mxu0 %vm2538_vm2, %v7193_v11  ;;  %v6819_v11 = vrot.slane %v12782_v2, 2 }
 0x44b   : > { %v13139_v54 = vadd.f32 %v6417_v52, %v12974_v3  ;;  %v10009_v57 = vpop.f32.mrb[59].mxu1  ;;  %10228 = vmatprep.mubr.msk.bf16.mxu0 %vm10596_vm1, %v14466_v42  ;;  %v7195_v59 = vsel %vm7011_vm13, %v7192_v27, %v7194_v23  ;;  %v7537_v27 = vrot.slane %v12760_v9, 3 }
 0x44d   : > { %10121 = vmatmul.mubr.msk.bf16.vlgmr.msra.gmra.mrb[164].mxu1 %vm2538_vm2, %v6813_v21  ;;  %v6817_v21 = vsel %vm6806_vm15, %v6812_v0, %v6816_v5 }
 0x44e   : > { %10157 = vmatpush3.bf16.msra.mxu1 %v7059_v19  ;;  %10124 = vmatprep.mubr.msk.bf16.mxu1 %vm10596_vm1, %v14466_v42  ;;  %v6818_v19 = vrot.slane %v12793_v48, 1 }
 0x44f   : > { %10232 = vmatprep.subr.bf16.mxu1 %v14466_v42 }
 0x450   : > { %v6422_v52 = vpop.f32.mrb[60].mxu1 }
 0x451   : > { %v13154_v57 = vadd.f32 %v6422_v52, %v12981_v33  ;;  %v10012_v3 = vpop.f32.mrb[61].mxu1  ;;  %v6820_v33 = vor.u32 %v6819_v11, %v6818_v19 }
 0x452   : > { %v6425_v7 = vpop.f32.mrb[62].mxu1  ;;  %10229 = vmatmul.mubr.msk.bf16.gmra.mrb[84].mxu0 %vm2538_vm2, %v7195_v59  ;;  %v7536_v3 = vrot.slane %v12736_v6, 3 }
 0x453   : > { %v13161_v55 = vadd.f32 %v6425_v7, %v12983_v61  ;;  %v10013_v44 = vpop.f32.mrb[63].mxu1  ;;  %10272 = vmatprep.mubr.msk.bf16.mxu0 %vm10596_vm1, %v14466_v42  ;;  %v6821_v59 = vsel %vm6806_vm15, %v6816_v5, %v6820_v33  ;;  %v6822_v7 = vrot.slane %v12807_v56, 1 }
 0x455   : > { %10125 = vmatmul.mubr.msk.bf16.gmra.mrb[168].mxu1 %vm2538_vm2, %v6817_v21  ;;  %v6823_v21 = vrot.slane %v12796_v39, 2 }
 0x456   : > { %10128 = vmatprep.mubr.msk.bf16.mxu1 %vm10596_vm1, %v14466_v42 }
 0x457   : > { %v6824_v9 = vor.u32 %v6823_v21, %v6822_v7  ;;  %v7541_v21 = vrot.slane %v12789_v24, 3 }
 0x458   : > { %v6430_v0 = vpop.f32.mrb[64].mxu1 }
 0x459   : > { %v13171_v52 = vadd.f32 %v6430_v0, %v12991_v37  ;;  %v10016_v61 = vpop.f32.mrb[65].mxu1  ;;  %v7538_v37 = vsel %vm7535_vm3, %v7536_v3, %v7537_v27  ;;  %v7539_v0 = vrot.slane %v12775_v58, 3  ;;  %v6825_v3 = vsel %vm6806_vm15, %v6820_v33, %v6824_v9 }
 0x45a   : > { %v6433_v23 = vpop.f32.mrb[66].mxu1  ;;  %10273 = vmatmul.mubr.msk.bf16.vlgmr.msra.gmra.mrb[88].mxu0 %vm2538_vm2, %v7538_v37 }
 0x45b   : > { %v13179_v44 = vadd.f32 %v6433_v23, %v12996_v12  ;;  %v10017_v19 = vpop.f32.mrb[67].mxu1  ;;  %10276 = vmatprep.mubr.msk.bf16.mxu0 %vm10596_vm1, %v14466_v42  ;;  %v6826_v23 = vrot.slane %v12821_v31, 1  ;;  %v7540_v7 = vsel %vm7535_vm3, %v7537_v27, %v7539_v0 }
 0x45d   : > { %10129 = vmatmul.mubr.msk.bf16.gmra.mrb[172].mxu1 %vm2538_vm2, %v6821_v59  ;;  %v6827_v59 = vrot.slane %v12810_v50, 2 }
 0x45e   : > { %10132 = vmatprep.mubr.msk.bf16.mxu1 %vm10596_vm1, %v14466_v42 }
 0x45f   : > { %v6828_v58 = vor.u32 %v6827_v59, %v6826_v23  ;;  %v7542_v23 = vsel %vm7535_vm3, %v7539_v0, %v7541_v21  ;;  %v7543_v59 = vrot.slane %v12803_v14, 3 }
 0x460   : > { %v6438_v5 = vpop.f32.mrb[68].mxu1 }
 0x461   : > { %v13189_v11 = vadd.f32 %v6438_v5, %v13015_v38  ;;  %v10020_v12 = vpop.f32.mrb[69].mxu1  ;;  %v6829_v27 = vsel %vm6806_vm15, %v6824_v9, %v6828_v58 }
 0x462   : > { %v6441_v61 = vpop.f32.mrb[70].mxu1  ;;  %10277 = vmatmul.mubr.msk.bf16.gmra.mrb[92].mxu0 %vm2538_vm2, %v7540_v7  ;;  %v6830_v12 = vrot.slane %v12835_v25, 1 }
 0x463   : > { %v13196_v19 = vadd.f32 %v6441_v61, %v13018_v40  ;;  %v10021_v37 = vpop.f32.mrb[71].mxu1  ;;  %10280 = vmatprep.mubr.msk.bf16.mxu0 %vm10596_vm1, %v14466_v42  ;;  %v6831_v61 = vrot.slane %v12824_v16, 2 }
 0x465   : > { %10133 = vmatmul.mubr.msk.bf16.gmra.mrb[176].mxu1 %vm2538_vm2, %v6825_v3  ;;  %v6832_v24 = vor.u32 %v6831_v61, %v6830_v12  ;;  %v7544_v12 = vsel %vm7535_vm3, %v7541_v21, %v7543_v59 }
 0x466   : > { %10136 = vmatprep.mubr.msk.bf16.mxu1 %vm10596_vm1, %v14466_v42 }
 0x467   : > { %v6833_v0 = vsel %vm6806_vm15, %v6828_v58, %v6832_v24  ;;  %v6842_v58 = vshll.u32 %v13066_v60, 16 }
 0x468   : > { %v6446_v38 = vpop.f32.mrb[72].mxu1 }
 0x469   : > { %v13206_v33 = vadd.f32 %v6446_v38, %v13030_v45  ;;  %v10024_v40 = vpop.f32.mrb[73].mxu1  ;;  %v6834_v38 = vrot.slane %v12853_v28, 1 }
 0x46a   : > { %v6449_v5 = vpop.f32.mrb[74].mxu1  ;;  %10281 = vmatmul.mubr.msk.bf16.gmra.mrb[96].mxu0 %vm2538_vm2, %v7542_v23  ;;  %v6835_v40 = vrot.slane %v12838_v18, 2 }
 0x46b   : > { %v13213_v3 = vadd.f32 %v6449_v5, %v13033_v53  ;;  %v10025_v37 = vpop.f32.mrb[75].mxu1  ;;  %10284 = vmatprep.mubr.msk.bf16.mxu0 %vm10596_vm1, %v14466_v42 }
 0x46c   : > { %v6836_v14 = vor.u32 %v6835_v40, %v6834_v38  ;;  %v7545_v37 = vrot.slane %v12817_v29, 3 }
 0x46d   : > { %10137 = vmatmul.mubr.msk.bf16.gmra.mrb[180].mxu1 %vm2538_vm2, %v6829_v27 }
 0x46e   : > { %10140 = vmatprep.mubr.msk.bf16.mxu1 %vm10596_vm1, %v14466_v42  ;;  %v7546_v40 = vsel %vm7535_vm3, %v7543_v59, %v7545_v37 }
 0x470   : > { %v6454_v45 = vpop.f32.mrb[76].mxu1 }
 0x471   : > { %v13223_v9 = vadd.f32 %v6454_v45, %v13046_v43  ;;  %v10028_v53 = vpop.f32.mrb[77].mxu1  ;;  %v6839_v43 = vshrl.u32 %v13066_v60, 16  ;;  %v6837_v45 = vsel %vm6806_vm15, %v6832_v24, %v6836_v14  ;;  %v6851_v24 = vshll.u32 %v13089_v22, 16 }
 0x472   : > { %v6457_v7 = vpop.f32.mrb[78].mxu1  ;;  %10285 = vmatmul.mubr.msk.bf16.gmra.mrb[100].mxu0 %vm2538_vm2, %v7544_v12  ;;  %v7547_v12 = vrot.slane %v12831_v15, 3 }
 0x473   : > { %v13230_v5 = vadd.f32 %v6457_v7, %v13049_v13  ;;  %v10029_v27 = vpop.f32.mrb[79].mxu1  ;;  %10288 = vmatprep.mubr.msk.bf16.mxu0 %vm10596_vm1, %v14466_v42  ;;  %v6841_v53 = vrot.slane %v6839_v43, 1  ;;  %v6844_v7 = vrot.slane %v6842_v58, 2 }
 0x475   : > { %10141 = vmatmul.mubr.msk.bf16.gmra.mrb[184].mxu1 %vm2538_vm2, %v6833_v0  ;;  %v6845_v29 = vor.u32 %v6844_v7, %v6841_v53  ;;  %v7548_v7 = vsel %vm7535_vm3, %v7545_v37, %v7547_v12 }
 0x476   : > { %10144 = vmatprep.mubr.msk.bf16.mxu1 %vm10596_vm1, %v14466_v42 }
 0x478   : > { %v6462_v13 = vpop.f32.mrb[80].mxu1 }
 0x479   : > { %v13242_v61 = vadd.f32 %v6462_v13, %v13062_v1  ;;  %v10032_v21 = vpop.f32.mrb[81].mxu1  ;;  %v6848_v1 = vshrl.u32 %v13089_v22, 16 }
 0x47a   : > { %v6465_v23 = vpop.f32.mrb[82].mxu1  ;;  %10289 = vmatmul.mubr.msk.bf16.gmra.mrb[104].mxu0 %vm2538_vm2, %v7546_v40  ;;  %v6846_v21 = vsel %vm6806_vm15, %v6836_v14, %v6845_v29  ;;  %v7549_v40 = vrot.slane %v13066_v60, 3 }
 0x47b   : > { %v13251_v0 = vadd.f32 %v6465_v23, %v13068_v32  ;;  %v10033_v38 = vpop.f32.mrb[83].mxu1  ;;  %10292 = vmatprep.mubr.msk.bf16.mxu0 %vm10596_vm1, %v14466_v42  ;;  %v6850_v23 = vrot.slane %v6848_v1, 1 }
 0x47d   : > { %10145 = vmatmul.mubr.msk.bf16.gmra.mrb[188].mxu1 %vm2538_vm2, %v6837_v45  ;;  %v6853_v45 = vrot.slane %v6851_v24, 2 }
 0x47e   : > { %10148 = vmatprep.mubr.msk.bf16.mxu1 %vm10596_vm1, %v14466_v42 }
 0x47f   : > { %v6854_v15 = vor.u32 %v6853_v45, %v6850_v23  ;;  %v14467_v45 = vrot.slane %v12736_v6, 2 }
 0x480   : > { %v6470_v32 = vpop.f32.mrb[84].mxu1 }
 0x481   : > { %v13263_v27 = vadd.f32 %v6470_v32, %v13082_v36  ;;  %v10036_v59 = vpop.f32.mrb[85].mxu1  ;;  %v6855_v37 = vsel %vm6806_vm15, %v6845_v29, %v6854_v15 }
 0x482   : > { %v6473_v13 = vpop.f32.mrb[86].mxu1  ;;  %10293 = vmatmul.mubr.msk.bf16.gmra.mrb[108].mxu0 %vm2538_vm2, %v7548_v7  ;;  %v7550_v59 = vsel %vm7535_vm3, %v7547_v12, %v7549_v40 }
 0x483   : > { %v13268_v38 = vadd.f32 %v6473_v13, %v13085_v51  ;;  %v10037_v53 = vpop.f32.mrb[87].mxu1  ;;  %10296 = vmatprep.mubr.msk.bf16.mxu0 %vm10596_vm1, %v14466_v42 }
 0x485   : > { %10149 = vmatmul.mubr.msk.bf16.gmra.mrb[192].mxu1 %vm2538_vm2, %v6846_v21  ;;  %v7551_v21 = vrot.slane %v13123_v30, 3 }
 0x486   : > { %10152 = vmatprep.mubr.msk.bf16.mxu1 %vm10596_vm1, %v14466_v42 }
 0x488   : > { %v6478_v36 = vpop.f32.mrb[88].mxu1 }
 0x489   : > { %v13278_v14 = vadd.f32 %v6478_v36, %v13102_v20  ;;  %v10040_v51 = vpop.f32.mrb[89].mxu1  ;;  %v7012_v20 = vrot.slane %v12730_v17, 2  ;;  %v7552_v36 = vsel %vm7535_vm3, %v7549_v40, %v7551_v21 }
 0x48a   : > { %v6481_v1 = vpop.f32.mrb[90].mxu1  ;;  %10297 = vmatmul.mubr.msk.bf16.gmra.mrb[112].mxu0 %vm2538_vm2, %v7550_v59  ;;  %v7553_v51 = vrot.slane %v13151_v62, 3 }
 0x48b   : > { %v13283_v24 = vadd.f32 %v6481_v1, %v13107_v10  ;;  %v10041_v32 = vpop.f32.mrb[91].mxu1  ;;  %10300 = vmatprep.mubr.msk.bf16.mxu0 %vm10596_vm1, %v14466_v42  ;;  %v9435_v10 = vld [vmem:[%s14194_s3 + $0xe] sm:$0x3]  ;;  %v7014_v53 = vsel %vm7011_vm13, %v7012_v20, %v14467_v45 }
 0x48c   : > { %v7408_v15 = vsel %vm2575_vm14, %v9435_v10, 0  ;;  %v7554_v32 = vsel %vm7535_vm3, %v7551_v21, %v7553_v51  ;;  %vm7330_vm14 = vsmask.f32 5376 }
 0x48d   : > { %10153 = vmatmul.mubr.msk.bf16.gmra.mrb[196].mxu1 %vm2538_vm2, %v6855_v37 }
 0x48e   : > { %10158 = vmatprep.mubr.msk.bf16.mxu1 %vm10596_vm1, %v14466_v42 }
 0x490   : > { %v6571_v13 = vpop.f32.mrb[92].mxu1 }
 0x491   : > { %v13297_v29 = vadd.f32 %v6571_v13, %v13129_v49  ;;  %v10046_v12 = vpop.f32.mrb[93].mxu1 }
 0x492   : > { %v6574_v23 = vpop.f32.mrb[94].mxu1  ;;  %10301 = vmatmul.mubr.msk.bf16.gmra.mrb[116].mxu0 %vm2538_vm2, %v7552_v36 }
 0x493   : > { %v13304_v7 = vadd.f32 %v6574_v23, %v13139_v54  ;;  %v10047_v17 = vpop.f32.mrb[95].mxu1  ;;  %10304 = vmatprep.mubr.msk.bf16.mxu0 %vm10596_vm1, %v14466_v42 }
 0x495   : > { %10159 = vmatmul.mubr.msk.bf16.vlgmr.msra.gmra.mrb[200].mxu1 %vm2538_vm2, %v7014_v53 }
 0x496   : > { %10233 = vmatpush3.bf16.msra.mxu1 %v7408_v15  ;;  %10162 = vmatprep.mubr.msk.bf16.mxu1 %vm10596_vm1, %v14466_v42 }
 0x498   : > { %v6579_v6 = vpop.f32.mrb[96].mxu1 }
 0x499   : > { %v13315_v49 = vadd.f32 %v6579_v6, %v13154_v57  ;;  %v10050_v54 = vpop.f32.mrb[97].mxu1 }
 0x49a   : > { %v6582_v1 = vpop.f32.mrb[98].mxu1  ;;  %10305 = vmatmul.mubr.msk.bf16.gmra.mrb[120].mxu0 %vm2538_vm2, %v7554_v32 }
 0x49b   : > { %v13319_v40 = vadd.f32 %v6582_v1, %v13161_v55  ;;  %v10051_v37 = vpop.f32.mrb[99].mxu1 }
 0x49d   : > { %10163 = vmatmul.mubr.msk.bf16.gmra.mrb[204].mxu1 %vm2538_vm2, %v13002_v46 }
 0x49e   : > { %10166 = vmatprep.mubr.msk.bf16.mxu1 %vm10596_vm1, %v14466_v42 }
 0x4a0   : > { %v6587_v57 = vpop.f32.mrb[100].mxu1 }
 0x4a1   : > { %v13328_v59 = vadd.f32 %v6587_v57, %v13171_v52  ;;  %v10054_v20 = vpop.f32.mrb[101].mxu1 }
 0x4a2   : > { %v6590_v13 = vpop.f32.mrb[102].mxu1 }
 0x4a3   : > { %v13331_v55 = vadd.f32 %v6590_v13, %v13179_v44  ;;  %v10055_v10 = vpop.f32.mrb[103].mxu1 }
 0x4a5   : > { %10167 = vmatmul.mubr.msk.bf16.gmra.mrb[208].mxu1 %vm2538_vm2, %v13021_v4 }
 0x4a6   : > { %10170 = vmatprep.mubr.msk.bf16.mxu1 %vm10596_vm1, %v14466_v42 }
 0x4a8   : > { %v6595_v46 = vpop.f32.mrb[104].mxu1 }
 0x4a9   : > { %v13338_v12 = vadd.f32 %v6595_v46, %v13189_v11  ;;  %v10058_v21 = vpop.f32.mrb[105].mxu1 }
 0x4aa   : > { %v6598_v23 = vpop.f32.mrb[106].mxu1 }
 0x4ab   : > { %v13341_v52 = vadd.f32 %v6598_v23, %v13196_v19  ;;  %v10059_v45 = vpop.f32.mrb[107].mxu1  ;;  %v14469_v23 = vld [vmem:[#allocation20_spill] sm:$0xff] }
 0x4ac   : > { %v7332_v45 = vrot.slane %v14469_v23, 3 }
 0x4ad   : > { %10171 = vmatmul.mubr.msk.bf16.gmra.mrb[212].mxu1 %vm2538_vm2, %v13036_v63 }
 0x4ae   : > { %10174 = vmatprep.mubr.msk.bf16.mxu1 %vm10596_vm1, %v14466_v42 }
 0x4b0   : > { %v6603_v4 = vpop.f32.mrb[108].mxu1 }
 0x4b1   : > { %v13348_v44 = vadd.f32 %v6603_v4, %v13206_v33  ;;  %v10062_v53 = vpop.f32.mrb[109].mxu1  ;;  %v14470_v4 = vld [vmem:[#allocation22_spill] sm:$0xff] }
 0x4b2   : > { %v6606_v17 = vpop.f32.mrb[110].mxu1 }
 0x4b3   : > { %v13351_v11 = vadd.f32 %v6606_v17, %v13213_v3  ;;  %v10063_v15 = vpop.f32.mrb[111].mxu1 }
 0x4b5   : > { %10175 = vmatmul.mubr.msk.bf16.gmra.mrb[216].mxu1 %vm2538_vm2, %v13052_v26 }
 0x4b6   : > { %10178 = vmatprep.mubr.msk.bf16.mxu1 %vm10596_vm1, %v14466_v42 }
 0x4b8   : > { %v6611_v63 = vpop.f32.mrb[112].mxu1 }
 0x4b9   : > { %v13358_v19 = vadd.f32 %v6611_v63, %v13223_v9  ;;  %v10066_v36 = vpop.f32.mrb[113].mxu1 }
 0x4ba   : > { %v6614_v6 = vpop.f32.mrb[114].mxu1 }
 0x4bb   : > { %v13361_v33 = vadd.f32 %v6614_v6, %v13230_v5  ;;  %v10067_v54 = vpop.f32.mrb[115].mxu1 }
 0x4bc   : > { %v7339_v54 = vrot.slane %v12782_v2, 3  ;;  %v7342_v2 = vrot.slane %v12807_v56, 2 }
 0x4bd   : > { %10179 = vmatmul.mubr.msk.bf16.gmra.mrb[220].mxu1 %vm2538_vm2, %v13071_v47 }
 0x4be   : > { %10182 = vmatprep.mubr.msk.bf16.mxu1 %vm10596_vm1, %v14466_v42 }
 0x4c0   : > { %v6619_v26 = vpop.f32.mrb[116].mxu1 }
 0x4c1   : > { %v13368_v3 = vadd.f32 %v6619_v26, %v13242_v61  ;;  %v10070_v51 = vpop.f32.mrb[117].mxu1 }
 0x4c2   : > { %v6622_v1 = vpop.f32.mrb[118].mxu1 }
 0x4c3   : > { %v13371_v9 = vadd.f32 %v6622_v1, %v13251_v0  ;;  %v10071_v37 = vpop.f32.mrb[119].mxu1  ;;  %v7029_v0 = vrot.slane %v13089_v22, 2  ;;  %v7335_v22 = vrot.slane %v14470_v4, 3 }
 0x4c5   : > { %10183 = vmatmul.mubr.msk.bf16.gmra.mrb[224].mxu1 %vm2538_vm2, %v13092_v41  ;;  %v7030_v10 = vsel %vm7011_vm13, %v13105_v8, %v7029_v0 }
 0x4c6   : > { %10186 = vmatprep.mubr.msk.bf16.mxu1 %vm10596_vm1, %v14466_v42 }
 0x4c8   : > { %v6627_v47 = vpop.f32.mrb[120].mxu1 }
 0x4c9   : > { %v13378_v5 = vadd.f32 %v6627_v47, %v13263_v27  ;;  %v10074_v32 = vpop.f32.mrb[121].mxu1 }
 0x4ca   : > { %v6630_v57 = vpop.f32.mrb[122].mxu1 }
 0x4cb   : > { %v13381_v61 = vadd.f32 %v6630_v57, %v13268_v38  ;;  %v10075_v20 = vpop.f32.mrb[123].mxu1  ;;  %v14468_v38 = vld [vmem:[#allocation19_spill] sm:$0xff] }
 0x4cc   : > { %v7331_v21 = vrot.slane %v14468_v38, 2  ;;  %v7346_v38 = vrot.slane %v12821_v31, 2 }
 0x4cd   : > { %10187 = vmatmul.mubr.msk.bf16.gmra.mrb[228].mxu1 %vm2538_vm2, %v13114_v34  ;;  %v7334_v34 = vrot.slane %v12779_v35, 2 }
 0x4ce   : > { %10190 = vmatprep.mubr.msk.bf16.mxu1 %vm10596_vm1, %v14466_v42 }
 0x4cf   : > { %v7336_v8 = vor.u32 %v7335_v22, %v7334_v34 }
 0x4d0   : > { %v6635_v41 = vpop.f32.mrb[124].mxu1 }
 0x4d1   : > { %v13389_v13 = vadd.f32 %v6635_v41, %v13278_v14  ;;  %v10078_v27 = vpop.f32.mrb[125].mxu1  ;;  %v7333_v14 = vor.u32 %v7332_v45, %v7331_v21  ;;  %v7347_v21 = vrot.slane %v12810_v50, 3 }
 0x4d2   : > { %v6638_v46 = vpop.f32.mrb[126].mxu1 }
 0x4d3   : > { %v13398_v53 = vadd.f32 %v6638_v46, %v13283_v24  ;;  %v10079_v17 = vpop.f32.mrb[127].mxu1  ;;  %v7337_v6 = vsel %vm7330_vm14, %v7333_v14, %v7336_v8  ;;  %v7338_v24 = vrot.slane %v12793_v48, 2 }
 0x4d5   : > { %10191 = vmatmul.mubr.msk.bf16.gmra.mrb[232].mxu1 %vm2538_vm2, %v7030_v10  ;;  %v7340_v1 = vor.u32 %v7339_v54, %v7338_v24 }
 0x4d6   : > { %10234 = vmatprep.mubr.msk.bf16.mxu1 %vm10596_vm1, %v14466_v42 }
 0x4d7   : > { %v7341_v48 = vsel %vm7330_vm14, %v7336_v8, %v7340_v1 }
 0x4d8   : > { %v6715_v15 = vpop.f32.mrb[128].mxu1 }
 0x4d9   : > { %v13404_v63 = vadd.f32 %v6715_v15, %v13297_v29  ;;  %v10084_v36 = vpop.f32.mrb[129].mxu1  ;;  %v7350_v15 = vrot.slane %v12835_v25, 2 }
 0x4da   : > { %v6718_v35 = vpop.f32.mrb[130].mxu1  ;;  %v7351_v36 = vrot.slane %v12824_v16, 3 }
 0x4db   : > { %v13410_v26 = vadd.f32 %v6718_v35, %v13304_v7  ;;  %v10085_v51 = vpop.f32.mrb[131].mxu1  ;;  %v7343_v7 = vrot.slane %v12796_v39, 3 }
 0x4dd   : > { %10235 = vmatmul.mubr.msk.bf16.vlgmr.msra.gmra.mrb[236].mxu1 %vm2538_vm2, %v7337_v6  ;;  %v7344_v0 = vor.u32 %v7343_v7, %v7342_v2 }
 0x4de   : > { %10238 = vmatprep.mubr.msk.bf16.mxu1 %vm10596_vm1, %v14466_v42 }
 0x4e0   : > { %v6723_v29 = vpop.f32.mrb[132].mxu1 }
 0x4e1   : > { %v13416_v37 = vadd.f32 %v6723_v29, %v13315_v49  ;;  %v10088_v47 = vpop.f32.mrb[133].mxu1  ;;  %v13427_v49 = vpop.f32.mrb[52].mxu0 }
 0x4e2   : > { %v6726_v32 = vpop.f32.mrb[134].mxu1  ;;  %v10198_v27 = vpop.f32.mrb[53].mxu0 }
 0x4e3   : > { %v13422_v57 = vadd.f32 %v6726_v32, %v13319_v40  ;;  %v10089_v20 = vpop.f32.mrb[135].mxu1  ;;  %v13432_v46 = vpop.f32.mrb[54].mxu0  ;;  %v7345_v40 = vsel %vm7330_vm14, %v7340_v1, %v7344_v0  ;;  %v7354_v32 = vrot.slane %v12853_v28, 2 }
 0x4e4   : > { %v10199_v23 = vpop.f32.mrb[55].mxu0 }
 0x4e5   : > { %10239 = vmatmul.mubr.msk.bf16.gmra.mrb[240].mxu1 %vm2538_vm2, %v7341_v48  ;;  %v7355_v48 = vrot.slane %v12838_v18, 3 }
 0x4e6   : > { %10242 = vmatprep.mubr.msk.bf16.mxu1 %vm10596_vm1, %v14466_v42 }
 0x4e8   : > { %v6731_v41 = vpop.f32.mrb[136].mxu1 }
 0x4e9   : > { %v13430_v10 = vadd.f32 %v6731_v41, %v13328_v59  ;;  %v10092_v56 = vpop.f32.mrb[137].mxu1  ;;  %v7348_v59 = vor.u32 %v7347_v21, %v7346_v38  ;;  %v13443_v4 = vpop.f32.mrb[56].mxu0  ;;  %v7359_v38 = vrot.slane %v6842_v58, 3 }
 0x4ea   : > { %v6734_v39 = vpop.f32.mrb[138].mxu1  ;;  %v10202_v17 = vpop.f32.mrb[57].mxu0 }
 0x4eb   : > { %v13438_v45 = vadd.f32 %v6734_v39, %v13331_v55  ;;  %v10093_v34 = vpop.f32.mrb[139].mxu1  ;;  %v13448_v50 = vpop.f32.mrb[58].mxu0  ;;  %v7349_v55 = vsel %vm7330_vm14, %v7344_v0, %v7348_v59 }
 0x4ec   : > { %v10203_v35 = vpop.f32.mrb[59].mxu0 }
 0x4ed   : > { %10243 = vmatmul.mubr.msk.bf16.gmra.mrb[244].mxu1 %vm2538_vm2, %v7345_v40  ;;  %v7358_v40 = vrot.slane %v6839_v43, 2 }
 0x4ee   : > { %10246 = vmatprep.mubr.msk.bf16.mxu1 %vm10596_vm1, %v14466_v42 }
 0x4f0   : > { %v6739_v22 = vpop.f32.mrb[140].mxu1 }
 0x4f1   : > { %v13446_v14 = vadd.f32 %v6739_v22, %v13338_v12  ;;  %v10096_v31 = vpop.f32.mrb[141].mxu1  ;;  %v7352_v12 = vor.u32 %v7351_v36, %v7350_v15  ;;  %v13459_v54 = vpop.f32.mrb[60].mxu0  ;;  %v7366_v22 = vshll.u32 %v13123_v30, 16 }
 0x4f2   : > { %v6742_v8 = vpop.f32.mrb[142].mxu1  ;;  %v10206_v1 = vpop.f32.mrb[61].mxu0 }
 0x4f3   : > { %v13454_v6 = vadd.f32 %v6742_v8, %v13341_v52  ;;  %v10097_v24 = vpop.f32.mrb[143].mxu1  ;;  %v13464_v16 = vpop.f32.mrb[62].mxu0  ;;  %v7353_v52 = vsel %vm7330_vm14, %v7348_v59, %v7352_v12  ;;  %v7363_v59 = vshrl.u32 %v13123_v30, 16  ;;  %v7368_v36 = vrot.slane %v7366_v22, 3 }
 0x4f4   : > { %v10207_v2 = vpop.f32.mrb[63].mxu0 }
 0x4f5   : > { %10247 = vmatmul.mubr.msk.bf16.gmra.mrb[248].mxu1 %vm2538_vm2, %v7349_v55  ;;  %v7365_v15 = vrot.slane %v7363_v59, 2 }
 0x4f6   : > { %10250 = vmatprep.mubr.msk.bf16.mxu1 %vm10596_vm1, %v14466_v42 }
 0x4f8   : > { %v6747_v51 = vpop.f32.mrb[144].mxu1 }
 0x4f9   : > { %v13462_v29 = vadd.f32 %v6747_v51, %v13348_v44  ;;  %v10100_v25 = vpop.f32.mrb[145].mxu1  ;;  %v7356_v44 = vor.u32 %v7355_v48, %v7354_v32  ;;  %v13475_v0 = vpop.f32.mrb[64].mxu0  ;;  %v7375_v51 = vshll.u32 %v13151_v62, 16 }
 0x4fa   : > { %v6750_v47 = vpop.f32.mrb[146].mxu1  ;;  %v10210_v27 = vpop.f32.mrb[65].mxu0 }
 0x4fb   : > { %v13470_v7 = vadd.f32 %v6750_v47, %v13351_v11  ;;  %v10101_v20 = vpop.f32.mrb[147].mxu1  ;;  %v13480_v18 = vpop.f32.mrb[66].mxu0  ;;  %v7357_v11 = vsel %vm7330_vm14, %v7352_v12, %v7356_v44  ;;  %v7372_v12 = vshrl.u32 %v13151_v62, 16 }
 0x4fc   : > { %v10211_v21 = vpop.f32.mrb[67].mxu0 }
 0x4fd   : > { %10251 = vmatmul.mubr.msk.bf16.gmra.mrb[252].mxu1 %vm2538_vm2, %v7353_v52  ;;  %v7374_v20 = vrot.slane %v7372_v12, 2 }
 0x4fe   : > { %10254 = vmatprep.mubr.msk.bf16.mxu1 %vm10596_vm1, %v14466_v42 }
 0x500   : > { %v6755_v41 = vpop.f32.mrb[148].mxu1 }
 0x501   : > { %v13478_v56 = vadd.f32 %v6755_v41, %v13358_v19  ;;  %v10104_v28 = vpop.f32.mrb[149].mxu1  ;;  %v7360_v19 = vor.u32 %v7359_v38, %v7358_v40  ;;  %v13495_v17 = vpop.f32.mrb[68].mxu0 }
 0x502   : > { %v6758_v39 = vpop.f32.mrb[150].mxu1  ;;  %v10214_v60 = vpop.f32.mrb[69].mxu0 }
 0x503   : > { %v13488_v23 = vadd.f32 %v6758_v39, %v13361_v33  ;;  %v10105_v34 = vpop.f32.mrb[151].mxu1  ;;  %v13500_v31 = vpop.f32.mrb[70].mxu0  ;;  %v7361_v55 = vsel %vm7330_vm14, %v7356_v44, %v7360_v19  ;;  %v7377_v44 = vrot.slane %v7375_v51, 3 }
 0x504   : > { %v10215_v35 = vpop.f32.mrb[71].mxu0 }
 0x505   : > { %10255 = vmatmul.mubr.msk.bf16.gmra.mrb[16].mxu1 %vm2538_vm2, %v7357_v11 }
 0x506   : > { %10258 = vmatprep.mubr.msk.bf16.mxu1 %vm10596_vm1, %v14466_v42 }
 0x508   : > { %v6763_v43 = vpop.f32.mrb[152].mxu1 }
 0x509   : > { %v13498_v58 = vadd.f32 %v6763_v43, %v13368_v3  ;;  %v10108_v33 = vpop.f32.mrb[153].mxu1  ;;  %v7369_v3 = vor.u32 %v7368_v36, %v7365_v15  ;;  %v13511_v1 = vpop.f32.mrb[72].mxu0 }
 0x50a   : > { %v6766_v8 = vpop.f32.mrb[154].mxu1  ;;  %v10218_v47 = vpop.f32.mrb[73].mxu0 }
 0x50b   : > { %v13504_v24 = vadd.f32 %v6766_v8, %v13371_v9  ;;  %v10109_v30 = vpop.f32.mrb[155].mxu1  ;;  %v13516_v32 = vpop.f32.mrb[74].mxu0  ;;  %v7370_v2 = vsel %vm7330_vm14, %v7360_v19, %v7369_v3 }
 0x50c   : > { %v10219_v41 = vpop.f32.mrb[75].mxu0 }
 0x50d   : > { %10259 = vmatmul.mubr.msk.bf16.gmra.mrb[0].mxu1 %vm2538_vm2, %v7361_v55 }
 0x50e   : > { %10262 = vmatprep.mubr.msk.bf16.mxu1 %vm10596_vm1, %v14466_v42 }
 0x510   : > { %v6771_v25 = vpop.f32.mrb[156].mxu1 }
 0x511   : > { %v13514_v52 = vadd.f32 %v6771_v25, %v13378_v5  ;;  %v10112_v9 = vpop.f32.mrb[157].mxu1  ;;  %v7378_v5 = vor.u32 %v7377_v44, %v7374_v20  ;;  %v13525_v28 = vpop.f32.mrb[76].mxu0 }
 0x512   : > { %v6774_v48 = vpop.f32.mrb[158].mxu1  ;;  %v10222_v11 = vpop.f32.mrb[77].mxu0 }
 0x513   : > { %v13520_v27 = vadd.f32 %v6774_v48, %v13381_v61  ;;  %v10113_v62 = vpop.f32.mrb[159].mxu1  ;;  %v13530_v21 = vpop.f32.mrb[78].mxu0  ;;  %v7379_v61 = vsel %vm7330_vm14, %v7369_v3, %v7378_v5 }
 0x514   : > { %v10223_v19 = vpop.f32.mrb[79].mxu0 }
 0x515   : > { %10263 = vmatmul.mubr.msk.bf16.gmra.mrb[4].mxu1 %vm2538_vm2, %v7370_v2 }
 0x516   : > { %10266 = vmatprep.mubr.msk.bf16.mxu1 %vm10596_vm1, %v14466_v42 }
 0x518   : > { %v6779_v39 = vpop.f32.mrb[160].mxu1 }
 0x519   : > { %v13528_v40 = vadd.f32 %v6779_v39, %v13389_v13  ;;  %v10116_v38 = vpop.f32.mrb[161].mxu1 }
 0x51a   : > { %v6782_v34 = vpop.f32.mrb[162].mxu1 }
 0x51b   : > { %v13534_v59 = vadd.f32 %v6782_v34, %v13398_v53  ;;  %v10117_v22 = vpop.f32.mrb[163].mxu1 }
 0x51d   : > { %10267 = vmatmul.mubr.msk.bf16.gmra.mrb[8].mxu1 %vm2538_vm2, %v7379_v61  ;;  %v13537_v42 = vpop.f32.mrb[80].mxu0 }
 0x51e   : > { %v10226_v60 = vpop.f32.mrb[81].mxu0 }
 0x51f   : > { %v13542_v8 = vpop.f32.mrb[82].mxu0 }
 0x520   : > { %v6920_v43 = vpop.f32.mrb[164].mxu1  ;;  %v10227_v15 = vpop.f32.mrb[83].mxu0 }
 0x521   : > { %v13540_v13 = vadd.f32 %v6920_v43, %v13404_v63  ;;  %v10122_v33 = vpop.f32.mrb[165].mxu1 }
 0x522   : > { %v6923_v55 = vpop.f32.mrb[166].mxu1 }
 0x523   : > { %v13545_v36 = vadd.f32 %v6923_v55, %v13410_v26  ;;  %v10123_v53 = vpop.f32.mrb[167].mxu1 }
 0x525   : > { %v13547_v35 = vpop.f32.mrb[84].mxu0 }
 0x526   : > { %v10230_v3 = vpop.f32.mrb[85].mxu0 }
 0x527   : > { %v13552_v25 = vpop.f32.mrb[86].mxu0 }
 0x528   : > { %v6928_v30 = vpop.f32.mrb[168].mxu1  ;;  %v10231_v47 = vpop.f32.mrb[87].mxu0 }
 0x529   : > { %v13550_v12 = vadd.f32 %v6928_v30, %v13416_v37  ;;  %v10126_v51 = vpop.f32.mrb[169].mxu1 }
 0x52a   : > { %v6931_v63 = vpop.f32.mrb[170].mxu1 }
 0x52b   : > { %v13555_v9 = vadd.f32 %v6931_v63, %v13422_v57  ;;  %v10127_v48 = vpop.f32.mrb[171].mxu1 }
 0x52d   : > { %v13557_v2 = vpop.f32.mrb[88].mxu0 }
 0x52e   : > { %v10274_v20 = vpop.f32.mrb[89].mxu0 }
 0x52f   : > { %v13562_v62 = vpop.f32.mrb[90].mxu0 }
 0x530   : > { %v6936_v26 = vpop.f32.mrb[172].mxu1  ;;  %v10275_v5 = vpop.f32.mrb[91].mxu0 }
 0x531   : > { %v13560_v44 = vadd.f32 %v6936_v26, %v13430_v10  ;;  %v10130_v41 = vpop.f32.mrb[173].mxu1 }
 0x532   : > { %v6939_v37 = vpop.f32.mrb[174].mxu1 }
 0x533   : > { %v13565_v39 = vadd.f32 %v6939_v37, %v13438_v45  ;;  %v10131_v11 = vpop.f32.mrb[175].mxu1 }
 0x535   : > { %v13567_v57 = vpop.f32.mrb[92].mxu0 }
 0x536   : > { %v10278_v19 = vpop.f32.mrb[93].mxu0 }
 0x537   : > { %v13575_v60 = vpop.f32.mrb[94].mxu0 }
 0x538   : > { %v6944_v38 = vpop.f32.mrb[176].mxu1  ;;  %v10279_v33 = vpop.f32.mrb[95].mxu0 }
 0x539   : > { %v13570_v34 = vadd.f32 %v6944_v38, %v13446_v14  ;;  %v10134_v61 = vpop.f32.mrb[177].mxu1 }
 0x53a   : > { %v6947_v22 = vpop.f32.mrb[178].mxu1 }
 0x53b   : > { %v13573_v10 = vadd.f32 %v6947_v22, %v13454_v6  ;;  %v10135_v43 = vpop.f32.mrb[179].mxu1 }
 0x53d   : > { %v13583_v3 = vpop.f32.mrb[96].mxu0 }
 0x53e   : > { %v10282_v51 = vpop.f32.mrb[97].mxu0 }
 0x53f   : > { %v13585_v63 = vpop.f32.mrb[98].mxu0 }
 0x540   : > { %v6952_v55 = vpop.f32.mrb[180].mxu1  ;;  %v10283_v6 = vpop.f32.mrb[99].mxu0 }
 0x541   : > { %v13578_v45 = vadd.f32 %v6952_v55, %v13462_v29  ;;  %v10138_v15 = vpop.f32.mrb[181].mxu1 }
 0x542   : > { %v6955_v53 = vpop.f32.mrb[182].mxu1 }
 0x543   : > { %v13581_v30 = vadd.f32 %v6955_v53, %v13470_v7  ;;  %v10139_v14 = vpop.f32.mrb[183].mxu1 }
 0x545   : > { %v13593_v37 = vpop.f32.mrb[100].mxu0 }
 0x546   : > { %v10286_v7 = vpop.f32.mrb[101].mxu0 }
 0x547   : > { %v13595_v5 = vpop.f32.mrb[102].mxu0 }
 0x548   : > { %v6960_v47 = vpop.f32.mrb[184].mxu1  ;;  %v10287_v11 = vpop.f32.mrb[103].mxu0 }
 0x549   : > { %v13588_v48 = vadd.f32 %v6960_v47, %v13478_v56  ;;  %v10142_v26 = vpop.f32.mrb[185].mxu1 }
 0x54a   : > { %v6963_v20 = vpop.f32.mrb[186].mxu1 }
 0x54b   : > { %v13591_v29 = vadd.f32 %v6963_v20, %v13488_v23  ;;  %v10143_v41 = vpop.f32.mrb[187].mxu1 }
 0x54d   : > { %v13603_v33 = vpop.f32.mrb[104].mxu0 }
 0x54e   : > { %v10290_v23 = vpop.f32.mrb[105].mxu0 }
 0x54f   : > { %v13611_v6 = vpop.f32.mrb[106].mxu0 }
 0x550   : > { %v6968_v38 = vpop.f32.mrb[188].mxu1  ;;  %v10291_v47 = vpop.f32.mrb[107].mxu0 }
 0x551   : > { %v13598_v61 = vadd.f32 %v6968_v38, %v13498_v58  ;;  %v10146_v19 = vpop.f32.mrb[189].mxu1 }
 0x552   : > { %v6971_v22 = vpop.f32.mrb[190].mxu1 }
 0x553   : > { %v13601_v56 = vadd.f32 %v6971_v22, %v13504_v24  ;;  %v10147_v43 = vpop.f32.mrb[191].mxu1 }
 0x555   : > { %v13616_v7 = vpop.f32.mrb[108].mxu0 }
 0x556   : > { %v10294_v38 = vpop.f32.mrb[109].mxu0 }
 0x557   : > { %v13621_v19 = vpop.f32.mrb[110].mxu0 }
 0x558   : > { %v6976_v55 = vpop.f32.mrb[192].mxu1 }
 0x559   : > { %v13606_v15 = vadd.f32 %v6976_v55, %v13514_v52  ;;  %v10150_v53 = vpop.f32.mrb[193].mxu1 }
 0x55a   : > { %v6979_v14 = vpop.f32.mrb[194].mxu1 }
 0x55b   : > { %v13609_v51 = vadd.f32 %v6979_v14, %v13520_v27  ;;  %v10151_v58 = vpop.f32.mrb[195].mxu1  ;;  %v10295_v27 = vpop.f32.mrb[111].mxu0 }
 0x55d   : > { %v13628_v58 = vpop.f32.mrb[112].mxu0 }
 0x55e   : > { %14471 = vst [vmem:[#allocation21_spill] sm:$0xff] %v13628_v58  ;;  %v13882_v58 = vld [vmem:[%s13686_s28 + $0x78] sm:$0xff] }
 0x560   : > { %v6984_v26 = vpop.f32.mrb[196].mxu1 }
 0x561   : > { %v13614_v24 = vadd.f32 %v6984_v26, %v13528_v40  ;;  %v10154_v20 = vpop.f32.mrb[197].mxu1 }
 0x562   : > { %v6987_v41 = vpop.f32.mrb[198].mxu1 }
 0x563   : > { %v13619_v52 = vadd.f32 %v6987_v41, %v13534_v59  ;;  %v10155_v11 = vpop.f32.mrb[199].mxu1  ;;  %v10298_v59 = vpop.f32.mrb[113].mxu0 }
 0x564   : > { %v13633_v26 = vpop.f32.mrb[114].mxu0 }
 0x565   : > { %14472 = vst [vmem:[#allocation24_spill] sm:$0xff] %v13633_v26  ;;  %v10299_v20 = vpop.f32.mrb[115].mxu0 }
 0x568   : > { %v7095_v22 = vpop.f32.mrb[200].mxu1 }
 0x569   : > { %v7166_v43 = vadd.f32 %v7095_v22, %v13540_v13  ;;  %v10160_v23 = vpop.f32.mrb[201].mxu1  ;;  %v13640_v22 = vpop.f32.mrb[116].mxu0 }
 0x56a   : > { %v7098_v55 = vpop.f32.mrb[202].mxu1  ;;  %14473 = vst [vmem:[#allocation23_spill] sm:$0xff] %v13640_v22 }
 0x56b   : > { %v7167_v40 = vadd.f32 %v7098_v55, %v13545_v36  ;;  %v10161_v53 = vpop.f32.mrb[203].mxu1  ;;  %v13626_v14 = vadd.f32 %v13427_v49, %v7166_v43  ;;  %v10302_v43 = vpop.f32.mrb[117].mxu0 }
 0x56c   : > { %v13645_v23 = vpop.f32.mrb[118].mxu0 }
 0x56d   : > { %v13631_v47 = vadd.f32 %v13432_v46, %v7167_v40  ;;  %14474 = vst [vmem:[#allocation26_spill] sm:$0xff] %v13645_v23  ;;  %v10303_v55 = vpop.f32.mrb[119].mxu0 }
 0x570   : > { %v7103_v41 = vpop.f32.mrb[204].mxu1 }
 0x571   : > { %v7168_v13 = vadd.f32 %v7103_v41, %v13550_v12  ;;  %v10164_v11 = vpop.f32.mrb[205].mxu1 }
 0x572   : > { %v7106_v38 = vpop.f32.mrb[206].mxu1 }
 0x573   : > { %v7169_v36 = vadd.f32 %v7106_v38, %v13555_v9  ;;  %v10165_v27 = vpop.f32.mrb[207].mxu1  ;;  %v13638_v49 = vadd.f32 %v13443_v4, %v7168_v13 }
 0x575   : > { %v13643_v46 = vadd.f32 %v13448_v50, %v7169_v36  ;;  %v13656_v36 = vpop.f32.mrb[120].mxu0 }
 0x576   : > { %14475 = vst [vmem:[#allocation25_spill] sm:$0xff] %v13656_v36 }
 0x578   : > { %v7111_v40 = vpop.f32.mrb[208].mxu1 }
 0x579   : > { %v7170_v12 = vadd.f32 %v7111_v40, %v13560_v44  ;;  %v10168_v53 = vpop.f32.mrb[209].mxu1 }
 0x57a   : > { %v7114_v59 = vpop.f32.mrb[210].mxu1 }
 0x57b   : > { %v7171_v9 = vadd.f32 %v7114_v59, %v13565_v39  ;;  %v10169_v20 = vpop.f32.mrb[211].mxu1  ;;  %v13650_v4 = vadd.f32 %v13459_v54, %v7170_v12  ;;  %v10306_v39 = vpop.f32.mrb[121].mxu0 }
 0x57c   : > { %v13662_v55 = vpop.f32.mrb[122].mxu0 }
 0x57d   : > { %v13653_v41 = vadd.f32 %v13464_v16, %v7171_v9  ;;  %14476 = vst [vmem:[#allocation28_spill] sm:$0xff] %v13662_v55  ;;  %v10307_v16 = vpop.f32.mrb[123].mxu0 }
 0x580   : > { %v7119_v13 = vpop.f32.mrb[212].mxu1 }
 0x581   : > { %v7172_v50 = vadd.f32 %v7119_v13, %v13570_v34  ;;  %v10172_v11 = vpop.f32.mrb[213].mxu1 }
 0x582   : > { %v7122_v38 = vpop.f32.mrb[214].mxu1 }
 0x583   : > { %v7173_v44 = vadd.f32 %v7122_v38, %v13573_v10  ;;  %v10173_v27 = vpop.f32.mrb[215].mxu1  ;;  %v13660_v43 = vadd.f32 %v13475_v0, %v7172_v50 }
 0x585   : > { %v13665_v54 = vadd.f32 %v13480_v18, %v7173_v44 }
 0x588   : > { %v7127_v40 = vpop.f32.mrb[216].mxu1 }
 0x589   : > { %v7174_v34 = vadd.f32 %v7127_v40, %v13578_v45  ;;  %v10176_v12 = vpop.f32.mrb[217].mxu1  ;;  %v8120_v40 = vld [vmem:[%s13686_s28] sm:$0xff] }
 0x58a   : > { %v7130_v53 = vpop.f32.mrb[218].mxu1 }
 0x58b   : > { %v7175_v59 = vadd.f32 %v7130_v53, %v13581_v30  ;;  %v10177_v10 = vpop.f32.mrb[219].mxu1  ;;  %v13670_v9 = vadd.f32 %v13495_v17, %v7174_v34  ;;  %v10597_v17 = vmov 1983009808   ;;  %v8121_v34 = vld [vmem:[%s13686_s28 + $0x8] sm:$0xff] }
 0x58c   : > { %v7753_v44 = vunpack.c.l.s4 %v10597_v17  ;;  %v8122_v10 = vld [vmem:[%s13686_s28 + $0x10] sm:$0xff] }
 0x58d   : > { %v13673_v0 = vadd.f32 %v13500_v31, %v7175_v59  ;;  %v8152_v59 = vcombine.high %v8120_v40, %v8120_v40 }
 0x590   : > { %v7135_v20 = vpop.f32.mrb[220].mxu1 }
 0x591   : > { %v7176_v18 = vadd.f32 %v7135_v20, %v13588_v48  ;;  %v10180_v13 = vpop.f32.mrb[221].mxu1 }
 0x592   : > { %v7138_v50 = vpop.f32.mrb[222].mxu1 }
 0x593   : > { %v7177_v45 = vadd.f32 %v7138_v50, %v13591_v29  ;;  %v10181_v11 = vpop.f32.mrb[223].mxu1  ;;  %v13678_v38 = vadd.f32 %v13511_v1, %v7176_v18  ;;  %v7754_v29 = vunpack.c.0.s8 %v7753_v44  ;;  %v8169_v18 = vcombine.high %v8121_v34, %v8121_v34 }
 0x595   : > { %v13681_v30 = vadd.f32 %v13516_v32, %v7177_v45  ;;  %v8186_v45 = vcombine.high %v8122_v10, %v8122_v10 }
 0x598   : > { %v7143_v27 = vpop.f32.mrb[224].mxu1 }
 0x599   : > { %v7178_v31 = vadd.f32 %v7143_v27, %v13598_v61  ;;  %v10184_v39 = vpop.f32.mrb[225].mxu1  ;;  %v14478_v61 = vld [vmem:[#allocation4_spill] sm:$0xff]  ;;  %v8123_v27 = vld [vmem:[%s13686_s28 + $0x18] sm:$0xff] }
 0x59a   : > { %v7146_v48 = vpop.f32.mrb[226].mxu1  ;;  %v13698_v53 = vsub.s32 %v7754_v29, %v14478_v61 }
 0x59b   : > { %v7179_v1 = vadd.f32 %v7146_v48, %v13601_v56  ;;  %v10185_v16 = vpop.f32.mrb[227].mxu1  ;;  %v13690_v32 = vadd.f32 %v13525_v28, %v7178_v31  ;;  %v8124_v31 = vld [vmem:[%s13686_s28 + $0x20] sm:$0xff]  ;;  %v8203_v48 = vcombine.high %v8123_v27, %v8123_v27 }
 0x59c   : > { %v13703_v50 = vrot.slane %v8120_v40, %v13698_v53  ;;  %v13707_v17 = vrot.slane %v8152_v59, %v13698_v53  ;;  %v13710_v44 = vrot.slane %v8121_v34, %v13698_v53  ;;  %v13718_v39 = vrot.slane %v8169_v18, %v13698_v53 }
 0x59d   : > { %v13695_v12 = vadd.f32 %v13530_v21, %v7179_v1  ;;  %v13721_v29 = vrot.slane %v8122_v10, %v13698_v53  ;;  %v8126_v1 = vld [vmem:[%s13686_s28 + $0x30] sm:$0xff]  ;;  %v13729_v40 = vrot.slane %v8186_v45, %v13698_v53  ;;  %v8220_v34 = vcombine.high %v8124_v31, %v8124_v31  ;;  %v8128_v45 = vld [vmem:[%s13686_s28 + $0x40] sm:$0xff] }
 0x59e   : > { %v13751_v10 = vrot.slane %v8124_v31, %v13698_v53  ;;  %v8288_v36 = vcombine.high %v8128_v45, %v8128_v45 }
 0x59f   : > { %14477 = vst [vmem:[#allocation27_spill] sm:$0xff] %v13695_v12 }
 0x5a0   : > { %v7151_v20 = vpop.f32.mrb[228].mxu1 }
 0x5a1   : > { %v7180_v56 = vadd.f32 %v7151_v20, %v13606_v15  ;;  %v10188_v28 = vpop.f32.mrb[229].mxu1  ;;  %v13767_v20 = vrot.slane %v8126_v1, %v13698_v53 }
 0x5a2   : > { %v7154_v13 = vpop.f32.mrb[230].mxu1  ;;  %v13744_v28 = vrot.slane %v8203_v48, %v13698_v53  ;;  %v13756_v48 = vrot.slane %v8220_v34, %v13698_v53  ;;  %v13798_v34 = vrot.slane %v8128_v45, %v13698_v53 }
 0x5a3   : > { %v7181_v21 = vadd.f32 %v7154_v13, %v13609_v51  ;;  %v10189_v11 = vpop.f32.mrb[231].mxu1  ;;  %v13715_v15 = vadd.f32 %v13537_v42, %v7180_v56  ;;  %v8125_v51 = vld [vmem:[%s13686_s28 + $0x28] sm:$0xff]  ;;  %v8127_v42 = vld [vmem:[%s13686_s28 + $0x38] sm:$0xff]  ;;  %v13741_v56 = vrot.slane %v8123_v27, %v13698_v53  ;;  %v8254_v13 = vcombine.high %v8126_v1, %v8126_v1 }
 0x5a4   : > { %v8237_v61 = vcombine.high %v8125_v51, %v8125_v51  ;;  %v8271_v59 = vcombine.high %v8127_v42, %v8127_v42  ;;  %v13759_v55 = vrot.slane %v8125_v51, %v13698_v53  ;;  %v13780_v23 = vrot.slane %v8127_v42, %v13698_v53 }
 0x5a5   : > { %14479 = vst [vmem:[#allocation30_spill] sm:$0xff] %v13715_v15  ;;  %v13726_v16 = vadd.f32 %v13542_v8, %v7181_v21 }
 0x5a7   : > { %14480 = vst [vmem:[#allocation29_spill] sm:$0xff] %v13726_v16  ;;  %v13805_v16 = vrot.slane %v8288_v36, %v13698_v53 }
 0x5a8   : > { %v7159_v18 = vpop.f32.mrb[232].mxu1 }
 0x5a9   : > { %v7182_v21 = vadd.f32 %v7159_v18, %v13614_v24  ;;  %v10192_v11 = vpop.f32.mrb[233].mxu1  ;;  %v13762_v24 = vrot.slane %v8237_v61, %v13698_v53  ;;  %v8129_v18 = vld [vmem:[%s13686_s28 + $0x48] sm:$0xff]  ;;  %v13777_v61 = vrot.slane %v8254_v13, %v13698_v53  ;;  %v13824_v13 = vld [vmem:[%s14195_s4] ss:$0 sm:$0xff] }
 0x5aa   : > { %v7162_v8 = vpop.f32.mrb[234].mxu1  ;;  %v13816_v36 = vrot.slane %v8129_v18, %v13698_v53 }
 0x5ab   : > { %v7183_v31 = vadd.f32 %v7162_v8, %v13619_v52  ;;  %v10193_v11 = vpop.f32.mrb[235].mxu1  ;;  %v13770_v27 = vadd.f32 %v13547_v35, %v7182_v21  ;;  %v8131_v52 = vld [vmem:[%s13686_s28 + $0x58] sm:$0xff]  ;;  %v13786_v35 = vrot.slane %v8271_v59, %v13698_v53  ;;  %v8305_v8 = vcombine.high %v8129_v18, %v8129_v18  ;;  %v8130_v21 = vld [vmem:[%s13686_s28 + $0x50] sm:$0xff] }
 0x5ac   : > { %v8133_v11 = vld [vmem:[%s13686_s28 + $0x68] sm:$0xff]  ;;  %v13835_v18 = vrot.slane %v8131_v52, %v13698_v53 }
 0x5ad   : > { %14481 = vst [vmem:[#allocation34_spill] sm:$0xff] %v13770_v27  ;;  %14482 = vst [vmem:[#allocation31_spill] sm:$0xff] %v13786_v35  ;;  %v13791_v51 = vadd.f32 %v13552_v25, %v7183_v31  ;;  %v8322_v27 = vcombine.high %v8130_v21, %v8130_v21  ;;  %v8339_v25 = vcombine.high %v8131_v52, %v8131_v52  ;;  %v8132_v31 = vld [vmem:[%s13686_s28 + $0x60] sm:$0xff] }
 0x5ae   : > { %v8356_v42 = vcombine.high %v8132_v31, %v8132_v31  ;;  %v8373_v22 = vcombine.high %v8133_v11, %v8133_v11  ;;  %v13819_v26 = vrot.slane %v8305_v8, %v13698_v53  ;;  %14485 = vst [vmem:[#allocation41_spill] sm:$0xff] %v13835_v18  ;;  %v13852_v52 = vrot.slane %v8133_v11, %v13698_v53 }
 0x5af   : > { %14483 = vst [vmem:[#allocation37_spill] sm:$0xff] %v13791_v51  ;;  %v13842_v35 = vrot.slane %v8339_v25, %v13698_v53 }
 0x5b0   : > { %v7444_v51 = vpop.f32.mrb[236].mxu1  ;;  %14489 = vst [vmem:[#allocation49_spill] sm:$0xff] %v13852_v52 }
 0x5b1   : > { %v7515_v15 = vadd.f32 %v7444_v51, %v13626_v14  ;;  %v10236_v59 = vpop.f32.mrb[237].mxu1  ;;  %v13829_v51 = vrot.slane %v8130_v21, %v13698_v53  ;;  %14486 = vst [vmem:[#allocation39_spill] sm:$0xff] %v13842_v35  ;;  %v8134_v14 = vld [vmem:[%s13686_s28 + $0x70] sm:$0xff]  ;;  %v13846_v21 = vrot.slane %v8132_v31, %v13698_v53 }
 0x5b2   : > { %v7447_v45 = vpop.f32.mrb[238].mxu1  ;;  %v13832_v59 = vrot.slane %v8322_v27, %v13698_v53  ;;  %v13849_v27 = vrot.slane %v8356_v42, %v13698_v53  ;;  %v8390_v31 = vcombine.high %v8134_v14, %v8134_v14 }
 0x5b3   : > { %v7690_v8 = vadd.f32 %v13557_v2, %v7515_v15  ;;  %v7516_v1 = vadd.f32 %v7447_v45, %v13631_v47  ;;  %v10237_v12 = vpop.f32.mrb[239].mxu1  ;;  %14487 = vst [vmem:[#allocation45_spill] sm:$0xff] %v13846_v21  ;;  %v13855_v2 = vrot.slane %v8373_v22, %v13698_v53 }
 0x5b4   : > { %14484 = vst [vmem:[#allocation35_spill] sm:$0xff] %v13832_v59  ;;  %14488 = vst [vmem:[#allocation42_spill] sm:$0xff] %v13849_v27  ;;  %v13889_v27 = vrot.slane %v8134_v14, %v13698_v53  ;;  %v13892_v11 = vrot.slane %v8390_v31, %v13698_v53  ;;  %v14494_v31 = vcombine.high %v13707_v17, %v13707_v17 }
 0x5b5   : > { %14490 = vst [vmem:[#allocation46_spill] sm:$0xff] %v13855_v2  ;;  %v7715_v47 = vadd.f32 %v13824_v13, %v7690_v8  ;;  %v7691_v12 = vadd.f32 %v13562_v62, %v7516_v1 }
 0x5b6   : > { %14491 = vst [vmem:[#allocation51_spill] sm:$0xff] %v13889_v27  ;;  %14492 = vst [vmem:[#allocation50_spill] sm:$0xff] %v13892_v11 }
 0x5b7   : > { %v7751_v45 = vcombine.high %v7715_v47, %v7715_v47  ;;  %v7758_v62 = vrot.slane %v7715_v47, %v13698_v53  ;;  %v7716_v1 = vadd.f32 %v13824_v13, %v7691_v12 }
 0x5b8   : > { %v7452_v15 = vpop.f32.mrb[240].mxu1 }
 0x5b9   : > { %v7765_v47 = vrot.slane %v7751_v45, %v13698_v53  ;;  %v7766_v12 = vcombine.high %v7758_v62, %v7758_v62  ;;  %v8488_v8 = vadd.f32 %v13703_v50, %v7758_v62  ;;  %v7768_v35 = vcombine.high %v7716_v1, %v7716_v1  ;;  %v10240_v18 = vpop.f32.mrb[241].mxu1 }
 0x5ba   : > { %v7775_v25 = vrot.slane %v7716_v1, %v13698_v53  ;;  %v7517_v21 = vadd.f32 %v7452_v15, %v13638_v49  ;;  %v7455_v42 = vpop.f32.mrb[242].mxu1  ;;  %v14493_v45 = vcombine.high %v13703_v50, %v13703_v50 }
 0x5bb   : > { %v7767_v22 = vcombine.high %v7765_v47, %v7765_v47  ;;  %v8490_v62 = vadd.f32 %v13707_v17, %v7765_v47  ;;  %v10241_v52 = vpop.f32.mrb[243].mxu1  ;;  %v7782_v49 = vrot.slane %v7768_v35, %v13698_v53  ;;  %v8552_v27 = vmax.f32 %v8488_v8, 0.0 }
 0x5bc   : > { %v8489_v2 = vadd.f32 %v14493_v45, %v7766_v12  ;;  %v7783_v15 = vcombine.high %v7775_v25, %v7775_v25  ;;  %v8492_v14 = vadd.f32 %v13710_v44, %v7775_v25  ;;  %v7692_v1 = vadd.f32 %v13567_v57, %v7517_v21 }
 0x5bd   : > { %v8491_v11 = vadd.f32 %v14494_v31, %v7767_v22  ;;  %v7518_v12 = vadd.f32 %v7455_v42, %v13643_v46  ;;  %v8554_v47 = vmax.f32 %v8490_v62, 0.0  ;;  %v7784_v52 = vcombine.high %v7782_v49, %v7782_v49 }
 0x5be   : > { %v8553_v50 = vmax.f32 %v8489_v2, 0.0  ;;  %v14495_v45 = vcombine.high %v13710_v44, %v13710_v44  ;;  %v8494_v35 = vadd.f32 %v13718_v39, %v7782_v49  ;;  %v7717_v57 = vadd.f32 %v13824_v13, %v7692_v1 }
 0x5bf   : > { %v8555_v59 = vmax.f32 %v8491_v11, 0.0  ;;  %v7693_v21 = vadd.f32 %v13575_v60, %v7518_v12  ;;  %v14496_v17 = vcombine.high %v13718_v39, %v13718_v39  ;;  %v8556_v22 = vmax.f32 %v8492_v14, 0.0 }
 0x5c0   : > { %v8493_v18 = vadd.f32 %v14495_v45, %v7783_v15  ;;  %v8680_v25 = vcombine.low %v8552_v27, %v8553_v50  ;;  %v8558_v42 = vmax.f32 %v8494_v35, 0.0  ;;  %v7460_v8 = vpop.f32.mrb[244].mxu1  ;;  %v7785_v15 = vcombine.high %v7717_v57, %v7717_v57 }
 0x5c1   : > { %v8495_v2 = vadd.f32 %v14496_v17, %v7784_v52  ;;  %v8681_v62 = vcombine.low %v8554_v47, %v8555_v59  ;;  %v7792_v49 = vrot.slane %v7717_v57, %v13698_v53  ;;  %v10244_v11 = vpop.f32.mrb[245].mxu1  ;;  %v7718_v1 = vadd.f32 %v13824_v13, %v7693_v21 }
 0x5c2   : > { %v8557_v46 = vmax.f32 %v8493_v18, 0.0  ;;  %v8688_v44 = vrot.slane %v8680_v25, %v13698_v53  ;;  %v7519_v60 = vadd.f32 %v7460_v8, %v13650_v4  ;;  %v7463_v50 = vpop.f32.mrb[246].mxu1  ;;  %v7799_v18 = vrot.slane %v7785_v15, %v13698_v53 }
 0x5c3   : > { %v8559_v27 = vmax.f32 %v8495_v2, 0.0  ;;  %v8695_v39 = vrot.slane %v8681_v62, %v13698_v53  ;;  %v7800_v14 = vcombine.high %v7792_v49, %v7792_v49  ;;  %v7520_v59 = vadd.f32 %v7463_v50, %v13653_v41  ;;  %v10245_v12 = vpop.f32.mrb[247].mxu1 }
 0x5c4   : > { %v8697_v31 = vcombine.low %v8556_v22, %v8557_v46  ;;  %v7802_v45 = vcombine.high %v7718_v1, %v7718_v1  ;;  %v7809_v35 = vrot.slane %v7718_v1, %v13698_v53  ;;  %v7801_v57 = vcombine.high %v7799_v18, %v7799_v18 }
 0x5c5   : > { %v8698_v47 = vcombine.low %v8558_v42, %v8559_v27  ;;  %v8696_v25 = vcombine.low %v8688_v44, %v8695_v39  ;;  %v8496_v4 = vadd.f32 %v13721_v29, %v7800_v14  ;;  %v14497_v21 = vcombine.high %v13721_v29, %v13721_v29 }
 0x5c6   : > { %v8705_v52 = vrot.slane %v8697_v31, %v13698_v53  ;;  %v7816_v22 = vrot.slane %v7802_v45, %v13698_v53  ;;  %v7817_v41 = vcombine.high %v7809_v35, %v7809_v35  ;;  %v14498_v46 = vcombine.high %v13729_v40, %v13729_v40 }
 0x5c7   : > { %v8497_v17 = vadd.f32 %v14497_v21, %v7799_v18  ;;  %v8712_v2 = vrot.slane %v8698_v47, %v13698_v53  ;;  %8968 = vst.msk [vmem:[%s10764_s16] sm:$0xff] %vm2538_vm2, %v8696_v25  ;;  %v8498_v8 = vadd.f32 %v13729_v40, %v7801_v57  ;;  %v8560_v62 = vmax.f32 %v8496_v4, 0.0 }
 0x5c8   : > { %v8499_v42 = vadd.f32 %v14498_v46, %v7809_v35  ;;  %v7694_v15 = vadd.f32 %v13583_v3, %v7519_v60  ;;  %v7818_v49 = vcombine.high %v7816_v22, %v7816_v22  ;;  %v8500_v11 = vadd.f32 %v13741_v56, %v7817_v41  ;;  %v7468_v1 = vpop.f32.mrb[248].mxu1 }
 0x5c9   : > { %v8561_v44 = vmax.f32 %v8497_v17, 0.0  ;;  %v8713_v29 = vcombine.low %v8705_v52, %v8712_v2  ;;  %v14499_v27 = vcombine.high %v13741_v56, %v13741_v56  ;;  %v8562_v39 = vmax.f32 %v8498_v8, 0.0  ;;  %v10248_v12 = vpop.f32.mrb[249].mxu1 }
 0x5ca   : > { %v8563_v18 = vmax.f32 %v8499_v42, 0.0  ;;  %v7719_v14 = vadd.f32 %v13824_v13, %v7694_v15  ;;  %v8502_v40 = vadd.f32 %v13744_v28, %v7818_v49  ;;  %v8564_v3 = vmax.f32 %v8500_v11, 0.0  ;;  %v7471_v52 = vpop.f32.mrb[250].mxu1 }
 0x5cb   : > { %v8501_v31 = vadd.f32 %v14499_v27, %v7816_v22  ;;  %v8714_v50 = vcombine.low %v8560_v62, %v8561_v44  ;;  %8969 = vst.msk [vmem:[%s10764_s16 + $0x8] sm:$0xff] %vm2538_vm2, %v8713_v29  ;;  %v7695_v47 = vadd.f32 %v13585_v63, %v7520_v59  ;;  %v10249_v57 = vpop.f32.mrb[251].mxu1  ;;  %v7521_v2 = vadd.f32 %v7468_v1, %v13660_v43 }
 0x5cc   : > { %v8715_v56 = vcombine.low %v8562_v39, %v8563_v18  ;;  %v7819_v35 = vcombine.high %v7719_v14, %v7719_v14  ;;  %v7826_v25 = vrot.slane %v7719_v14, %v13698_v53  ;;  %v8566_v21 = vmax.f32 %v8502_v40, 0.0 }
 0x5cd   : > { %v8565_v60 = vmax.f32 %v8501_v31, 0.0  ;;  %v8722_v45 = vrot.slane %v8714_v50, %v13698_v53  ;;  %v7720_v17 = vadd.f32 %v13824_v13, %v7695_v47  ;;  %v14500_v63 = vcombine.high %v13744_v28, %v13744_v28 }
 0x5ce   : > { %v8729_v22 = vrot.slane %v8715_v56, %v13698_v53  ;;  %v7833_v41 = vrot.slane %v7819_v35, %v13698_v53  ;;  %v7522_v46 = vadd.f32 %v7471_v52, %v13665_v54  ;;  %v7696_v44 = vadd.f32 %v13593_v37, %v7521_v2 }
 0x5cf   : > { %v8731_v4 = vcombine.low %v8564_v3, %v8565_v60  ;;  %v8503_v59 = vadd.f32 %v14500_v63, %v7826_v25  ;;  %v7835_v8 = vcombine.high %v7720_v17, %v7720_v17  ;;  %v7842_v62 = vrot.slane %v7720_v17, %v13698_v53 }
 0x5d0   : > { %v8730_v15 = vcombine.low %v8722_v45, %v8729_v22  ;;  %v7834_v43 = vcombine.high %v7833_v41, %v7833_v41  ;;  %v8504_v29 = vadd.f32 %v13751_v10, %v7833_v41  ;;  %v7721_v31 = vadd.f32 %v13824_v13, %v7696_v44  ;;  %v7476_v54 = vpop.f32.mrb[252].mxu1 }
 0x5d1   : > { %v8739_v42 = vrot.slane %v8731_v4, %v13698_v53  ;;  %v8567_v49 = vmax.f32 %v8503_v59, 0.0  ;;  %v7849_v11 = vrot.slane %v7835_v8, %v13698_v53  ;;  %v7850_v27 = vcombine.high %v7842_v62, %v7842_v62  ;;  %v10252_v14 = vpop.f32.mrb[253].mxu1 }
 0x5d2   : > { %v8506_v28 = vadd.f32 %v13756_v48, %v7842_v62  ;;  %8970 = vst.msk [vmem:[%s10764_s16 + $0x10] sm:$0xff] %vm2538_vm2, %v8730_v15  ;;  %v14501_v1 = vcombine.high %v13751_v10, %v13751_v10  ;;  %v8568_v37 = vmax.f32 %v8504_v29, 0.0  ;;  %v7697_v18 = vadd.f32 %v13595_v5, %v7522_v46  ;;  %v7479_v52 = vpop.f32.mrb[254].mxu1 }
 0x5d3   : > { %v8732_v39 = vcombine.low %v8566_v21, %v8567_v49  ;;  %v7851_v12 = vcombine.high %v7849_v11, %v7849_v11  ;;  %v14502_v40 = vcombine.high %v13756_v48, %v13756_v48  ;;  %v8508_v60 = vadd.f32 %v13759_v55, %v7849_v11  ;;  %v10253_v25 = vpop.f32.mrb[255].mxu1 }
 0x5d4   : > { %v8505_v50 = vadd.f32 %v14501_v1, %v7834_v43  ;;  %v8570_v47 = vmax.f32 %v8506_v28, 0.0  ;;  %v7852_v35 = vcombine.high %v7721_v31, %v7721_v31  ;;  %v7859_v10 = vrot.slane %v7721_v31, %v13698_v53 }
 0x5d5   : > { %v8507_v3 = vadd.f32 %v14502_v40, %v7850_v27  ;;  %v8746_v56 = vrot.slane %v8732_v39, %v13698_v53  ;;  %v14503_v5 = vcombine.high %v13759_v55, %v13759_v55  ;;  %v8572_v21 = vmax.f32 %v8508_v60, 0.0 }
 0x5d6   : > { %v8569_v45 = vmax.f32 %v8505_v50, 0.0  ;;  %v7722_v48 = vadd.f32 %v13824_v13, %v7697_v18  ;;  %v7866_v22 = vrot.slane %v7852_v35, %v13698_v53  ;;  %v7867_v41 = vcombine.high %v7859_v10, %v7859_v10 }
 0x5d7   : > { %v8509_v57 = vadd.f32 %v14503_v5, %v7851_v12  ;;  %v8571_v4 = vmax.f32 %v8507_v3, 0.0  ;;  %v8747_v17 = vcombine.low %v8739_v42, %v8746_v56  ;;  %v8510_v46 = vadd.f32 %v13762_v24, %v7859_v10 }
 0x5d8   : > { %v8748_v2 = vcombine.low %v8568_v37, %v8569_v45  ;;  %v7869_v8 = vcombine.high %v7722_v48, %v7722_v48  ;;  %v7868_v55 = vcombine.high %v7866_v22, %v7866_v22  ;;  %v14504_v44 = vcombine.high %v13762_v24, %v13762_v24  ;;  %v7484_v27 = vpop.f32.mrb[16].mxu1 }
 0x5d9   : > { %v8573_v63 = vmax.f32 %v8509_v57, 0.0  ;;  %v8749_v59 = vcombine.low %v8570_v47, %v8571_v4  ;;  %8971 = vst.msk [vmem:[%s10764_s16 + $0x18] sm:$0xff] %vm2538_vm2, %v8747_v17  ;;  %v7876_v42 = vrot.slane %v7722_v48, %v13698_v53  ;;  %v8574_v49 = vmax.f32 %v8510_v46, 0.0  ;;  %v10256_v24 = vpop.f32.mrb[17].mxu1 }
 0x5da   : > { %v8756_v62 = vrot.slane %v8748_v2, %v13698_v53  ;;  %v8511_v15 = vadd.f32 %v14504_v44, %v7867_v41  ;;  %v7883_v11 = vrot.slane %v7869_v8, %v13698_v53  ;;  %v8512_v28 = vadd.f32 %v13767_v20, %v7868_v55  ;;  %v7487_v3 = vpop.f32.mrb[18].mxu1 }
 0x5db   : > { %v8763_v43 = vrot.slane %v8749_v59, %v13698_v53  ;;  %v8765_v29 = vcombine.low %v8572_v21, %v8573_v63  ;;  %v7884_v1 = vcombine.high %v7876_v42, %v7876_v42  ;;  %v14505_v50 = vcombine.high %v13767_v20, %v13767_v20  ;;  %v10257_v35 = vpop.f32.mrb[19].mxu1 }
 0x5dc   : > { %v8575_v31 = vmax.f32 %v8511_v15, 0.0  ;;  %v7885_v14 = vcombine.high %v7883_v11, %v7883_v11  ;;  %v14506_v12 = vcombine.high %v13777_v61, %v13777_v61  ;;  %v8576_v60 = vmax.f32 %v8512_v28, 0.0 }
 0x5dd   : > { %v8513_v37 = vadd.f32 %v14505_v50, %v7876_v42  ;;  %v8764_v39 = vcombine.low %v8756_v62, %v8763_v43  ;;  %v8773_v18 = vrot.slane %v8765_v29, %v13698_v53  ;;  %v8514_v45 = vadd.f32 %v13777_v61, %v7884_v1 }
 0x5de   : > { %v8515_v40 = vadd.f32 %v14506_v12, %v7883_v11  ;;  %v8766_v47 = vcombine.low %v8574_v49, %v8575_v31  ;;  %v8516_v20 = vadd.f32 %v13780_v23, %v7885_v14  ;;  %v7523_v25 = vadd.f32 %v7476_v54, %v13670_v9 }
 0x5df   : > { %v8577_v56 = vmax.f32 %v8513_v37, 0.0  ;;  %8972 = vst.msk [vmem:[%s10764_s16 + $0x20] sm:$0xff] %vm2538_vm2, %v8764_v39  ;;  %v7524_v5 = vadd.f32 %v7479_v52, %v13673_v0  ;;  %v8578_v4 = vmax.f32 %v8514_v45, 0.0  ;;  %v7525_v48 = vadd.f32 %v7484_v27, %v13678_v38 }
 0x5e0   : > { %v8579_v10 = vmax.f32 %v8515_v40, 0.0  ;;  %v8780_v57 = vrot.slane %v8766_v47, %v13698_v53  ;;  %v7698_v61 = vadd.f32 %v13603_v33, %v7523_v25  ;;  %v7526_v2 = vadd.f32 %v7487_v3, %v13681_v30  ;;  %v7492_v63 = vpop.f32.mrb[0].mxu1 }
 0x5e1   : > { %v8782_v21 = vcombine.low %v8576_v60, %v8577_v56  ;;  %v7699_v17 = vadd.f32 %v13611_v6, %v7524_v5  ;;  %v14012_v22 = vrot.slane %v13882_v58, %v13698_v53  ;;  %v7700_v52 = vadd.f32 %v13616_v7, %v7525_v48  ;;  %v10260_v62 = vpop.f32.mrb[1].mxu1 }
 0x5e2   : > { %v8781_v9 = vcombine.low %v8773_v18, %v8780_v57  ;;  %v8783_v54 = vcombine.low %v8578_v4, %v8579_v10  ;;  %v7723_v41 = vadd.f32 %v13824_v13, %v7698_v61  ;;  %v7701_v33 = vadd.f32 %v13621_v19, %v7526_v2  ;;  %v14509_v18 = vld [vmem:[#allocation31_spill] sm:$0xff] }
 0x5e3   : > { %v8790_v0 = vrot.slane %v8782_v21, %v13698_v53  ;;  %v7724_v38 = vadd.f32 %v13824_v13, %v7699_v17  ;;  %v14507_v6 = vcombine.high %v13882_v58, %v13882_v58  ;;  %v8580_v46 = vmax.f32 %v8516_v20, 0.0  ;;  %v7495_v58 = vpop.f32.mrb[2].mxu1 }
 0x5e4   : > { %8973 = vst.msk [vmem:[%s10764_s16 + $0x28] sm:$0xff] %vm2538_vm2, %v8781_v9  ;;  %v8797_v59 = vrot.slane %v8783_v54, %v13698_v53  ;;  %v7725_v7 = vadd.f32 %v13824_v13, %v7700_v52  ;;  %v7527_v8 = vadd.f32 %v7492_v63, %v13690_v32  ;;  %v7886_v55 = vcombine.high %v7723_v41, %v7723_v41  ;;  %v10261_v11 = vpop.f32.mrb[3].mxu1 }
 0x5e5   : > { %v14023_v30 = vrot.slane %v14507_v6, %v13698_v53  ;;  %v7893_v19 = vrot.slane %v7723_v41, %v13698_v53  ;;  %v7902_v44 = vcombine.high %v7724_v38, %v7724_v38  ;;  %v7909_v15 = vrot.slane %v7724_v38, %v13698_v53 }
 0x5e6   : > { %v8798_v42 = vcombine.low %v8790_v0, %v8797_v59  ;;  %v7919_v43 = vcombine.high %v7725_v7, %v7725_v7  ;;  %v7926_v29 = vrot.slane %v7725_v7, %v13698_v53  ;;  %v7726_v49 = vadd.f32 %v13824_v13, %v7701_v33 }
 0x5e7   : > { %v7900_v27 = vrot.slane %v7886_v55, %v13698_v53  ;;  %v7901_v28 = vcombine.high %v7893_v19, %v7893_v19  ;;  %v14508_v32 = vcombine.high %v13780_v23, %v13780_v23  ;;  %v7916_v1 = vrot.slane %v7902_v44, %v13698_v53 }
 0x5e8   : > { %8974 = vst.msk [vmem:[%s10764_s16 + $0x30] sm:$0xff] %vm2538_vm2, %v8798_v42  ;;  %v7917_v50 = vcombine.high %v7909_v15, %v7909_v15  ;;  %v8520_v37 = vadd.f32 %v13798_v34, %v7909_v15  ;;  %v7933_v24 = vrot.slane %v7919_v43, %v13698_v53  ;;  %v7934_v39 = vcombine.high %v7926_v29, %v7926_v29  ;;  %v7500_v4 = vpop.f32.mrb[4].mxu1 }
 0x5e9   : > { %v8517_v31 = vadd.f32 %v14508_v32, %v7893_v19  ;;  %v8518_v14 = vadd.f32 %v14509_v18, %v7901_v28  ;;  %v14510_v12 = vcombine.high %v14509_v18, %v14509_v18  ;;  %v7918_v60 = vcombine.high %v7916_v1, %v7916_v1  ;;  %v10264_v2 = vpop.f32.mrb[5].mxu1 }
 0x5ea   : > { %v14511_v23 = vcombine.high %v13798_v34, %v13798_v34  ;;  %v8522_v45 = vadd.f32 %v13805_v16, %v7916_v1  ;;  %v8584_v56 = vmax.f32 %v8520_v37, 0.0  ;;  %v7935_v35 = vcombine.high %v7933_v24, %v7933_v24  ;;  %v14060_v41 = vpop.f32.mrb[6].mxu1 }
 0x5eb   : > { %v8519_v40 = vadd.f32 %v14510_v12, %v7900_v27  ;;  %v8581_v3 = vmax.f32 %v8517_v31, 0.0  ;;  %v8582_v20 = vmax.f32 %v8518_v14, 0.0  ;;  %v14512_v5 = vcombine.high %v13805_v16, %v13805_v16  ;;  %v10265_v59 = vpop.f32.mrb[7].mxu1  ;;  %v14516_v31 = vld [vmem:[#allocation27_spill] sm:$0xff]  ;;  %v14518_v12 = vld [vmem:[#allocation24_spill] sm:$0xff] }
 0x5ec   : > { %v8521_v47 = vadd.f32 %v14511_v23, %v7917_v50  ;;  %v8586_v48 = vmax.f32 %v8522_v45, 0.0  ;;  %v8524_v61 = vadd.f32 %v13816_v36, %v7926_v29  ;;  %v14513_v34 = vcombine.high %v13816_v36, %v13816_v36  ;;  %v14515_v29 = vld [vmem:[#allocation21_spill] sm:$0xff]  ;;  %v14520_v23 = vld [vmem:[#allocation35_spill] sm:$0xff] }
 0x5ed   : > { %v8583_v10 = vmax.f32 %v8519_v40, 0.0  ;;  %v8799_v25 = vcombine.low %v8580_v46, %v8581_v3  ;;  %v8523_v57 = vadd.f32 %v14512_v5, %v7918_v60  ;;  %v8526_v52 = vadd.f32 %v13819_v26, %v7933_v24  ;;  %v14519_v3 = vld [vmem:[#allocation30_spill] sm:$0xff] }
 0x5ee   : > { %v8585_v21 = vmax.f32 %v8521_v47, 0.0  ;;  %v8525_v17 = vadd.f32 %v14513_v34, %v7934_v39  ;;  %v14514_v38 = vcombine.high %v13819_v26, %v13819_v26  ;;  %v8588_v63 = vmax.f32 %v8524_v61, 0.0 }
 0x5ef   : > { %v8800_v9 = vcombine.low %v8582_v20, %v8583_v10  ;;  %v8807_v54 = vrot.slane %v8799_v25, %v13698_v53  ;;  %v8587_v0 = vmax.f32 %v8523_v57, 0.0  ;;  %v8590_v7 = vmax.f32 %v8526_v52, 0.0 }
 0x5f0   : > { %v8816_v16 = vcombine.low %v8584_v56, %v8585_v21  ;;  %v8527_v33 = vadd.f32 %v14514_v38, %v7935_v35  ;;  %v8589_v6 = vmax.f32 %v8525_v17, 0.0  ;;  %v7936_v62 = vcombine.high %v7726_v49, %v7726_v49  ;;  %v7508_v18 = vpop.f32.mrb[8].mxu1 }
 0x5f1   : > { %v8814_v36 = vrot.slane %v8800_v9, %v13698_v53  ;;  %v8817_v46 = vcombine.low %v8586_v48, %v8587_v0  ;;  %v7943_v15 = vrot.slane %v7726_v49, %v13698_v53  ;;  %v7702_v11 = vadd.f32 %v14515_v29, %v7527_v8 }
 0x5f2   : > { %v8824_v55 = vrot.slane %v8816_v16, %v13698_v53  ;;  %v8591_v19 = vmax.f32 %v8527_v33, 0.0  ;;  %v8833_v44 = vcombine.low %v8588_v63, %v8589_v6  ;;  %v7950_v26 = vrot.slane %v7936_v62, %v13698_v53  ;;  %v14523_v16 = vld [vmem:[#allocation41_spill] sm:$0xff] }
 0x5f3   : > { %v8815_v42 = vcombine.low %v8807_v54, %v8814_v36  ;;  %v8831_v43 = vrot.slane %v8817_v46, %v13698_v53  ;;  %v7951_v32 = vcombine.high %v7943_v15, %v7943_v15  ;;  %v7528_v1 = vadd.f32 %v7495_v58, %v14516_v31  ;;  %v10268_v58 = vpop.f32.mrb[9].mxu1  ;;  %v14525_v46 = vld [vmem:[#allocation39_spill] sm:$0xff] }
 0x5f4   : > { %v8834_v27 = vcombine.low %v8590_v7, %v8591_v19  ;;  %v8841_v28 = vrot.slane %v8833_v44, %v13698_v53  ;;  %v7952_v37 = vcombine.high %v7950_v26, %v7950_v26  ;;  %v14517_v49 = vcombine.high %v13829_v51, %v13829_v51  ;;  %v7511_v20 = vpop.f32.mrb[10].mxu1 }
 0x5f5   : > { %8975 = vst.msk [vmem:[%s10764_s16 + $0x38] sm:$0xff] %vm2538_vm2, %v8815_v42  ;;  %v8832_v50 = vcombine.low %v8824_v55, %v8831_v43  ;;  %v7727_v39 = vadd.f32 %v13824_v13, %v7702_v11  ;;  %v8528_v14 = vadd.f32 %v13829_v51, %v7951_v32  ;;  %v7703_v40 = vadd.f32 %v14518_v12, %v7528_v1  ;;  %v14521_v51 = vld [vmem:[#allocation23_spill] sm:$0xff]  ;;  %v10269_v21 = vpop.f32.mrb[11].mxu1 }
 0x5f6   : > { %v8529_v24 = vadd.f32 %v14517_v49, %v7950_v26  ;;  %v8848_v8 = vrot.slane %v8834_v27, %v13698_v53  ;;  %v7529_v60 = vadd.f32 %v7500_v4, %v14519_v3  ;;  %v8530_v47 = vadd.f32 %v14520_v23, %v7952_v37  ;;  %v14527_v26 = vld [vmem:[#allocation45_spill] sm:$0xff] }
 0x5f7   : > { %8976 = vst.msk [vmem:[%s10764_s16 + $0x40] sm:$0xff] %vm2538_vm2, %v8832_v50  ;;  %v7953_v56 = vcombine.high %v7727_v39, %v7727_v39  ;;  %v7960_v35 = vrot.slane %v7727_v39, %v13698_v53  ;;  %v8592_v25 = vmax.f32 %v8528_v14, 0.0  ;;  %v7728_v5 = vadd.f32 %v13824_v13, %v7703_v40  ;;  %v14529_v39 = vld [vmem:[#allocation42_spill] sm:$0xff] }
 0x5f8   : > { %v8593_v45 = vmax.f32 %v8529_v24, 0.0  ;;  %v8849_v10 = vcombine.low %v8841_v28, %v8848_v8  ;;  %v7704_v57 = vadd.f32 %v14521_v51, %v7529_v60  ;;  %v14522_v61 = vcombine.high %v14520_v23, %v14520_v23 }
 0x5f9   : > { %v7967_v4 = vrot.slane %v7953_v56, %v13698_v53  ;;  %v7968_v48 = vcombine.high %v7960_v35, %v7960_v35  ;;  %v8594_v17 = vmax.f32 %v8530_v47, 0.0  ;;  %v7970_v9 = vcombine.high %v7728_v5, %v7728_v5  ;;  %v14531_v47 = vld [vmem:[#allocation49_spill] sm:$0xff] }
 0x5fa   : > { %v8531_v34 = vadd.f32 %v14522_v61, %v7960_v35  ;;  %8977 = vst.msk [vmem:[%s10764_s16 + $0x48] sm:$0xff] %vm2538_vm2, %v8849_v10  ;;  %v8850_v2 = vcombine.low %v8592_v25, %v8593_v45  ;;  %v7977_v54 = vrot.slane %v7728_v5, %v13698_v53  ;;  %v7729_v0 = vadd.f32 %v13824_v13, %v7704_v57  ;;  %v14533_v5 = vld [vmem:[#allocation29_spill] sm:$0xff]  ;;  %v14534_v57 = vld [vmem:[#allocation34_spill] sm:$0xff] }
 0x5fb   : > { %v7969_v52 = vcombine.high %v7967_v4, %v7967_v4  ;;  %v8532_v38 = vadd.f32 %v14523_v16, %v7968_v48  ;;  %v14524_v33 = vcombine.high %v14523_v16, %v14523_v16  ;;  %v7984_v36 = vrot.slane %v7970_v9, %v13698_v53 }
 0x5fc   : > { %v8595_v6 = vmax.f32 %v8531_v34, 0.0  ;;  %v8858_v59 = vrot.slane %v8850_v2, %v13698_v53  ;;  %v14526_v7 = vcombine.high %v14525_v46, %v14525_v46  ;;  %v7986_v55 = vcombine.high %v7729_v0, %v7729_v0  ;;  %v14535_v34 = vld [vmem:[#allocation37_spill] sm:$0xff] }
 0x5fd   : > { %v8533_v63 = vadd.f32 %v14524_v33, %v7967_v4  ;;  %v8534_v19 = vadd.f32 %v14525_v46, %v7969_v52  ;;  %v8596_v44 = vmax.f32 %v8532_v38, 0.0  ;;  %v7985_v43 = vcombine.high %v7984_v36, %v7984_v36  ;;  %v14537_v52 = vld [vmem:[#allocation25_spill] sm:$0xff]  ;;  %v14538_v33 = vld [vmem:[#allocation51_spill] sm:$0xff] }
 0x5fe   : > { %v8535_v62 = vadd.f32 %v14526_v7, %v7977_v54  ;;  %v8851_v42 = vcombine.low %v8594_v17, %v8595_v6  ;;  %v8536_v29 = vadd.f32 %v14527_v26, %v7984_v36  ;;  %v7993_v27 = vrot.slane %v7729_v0, %v13698_v53  ;;  %v14536_v54 = vld [vmem:[#allocation26_spill] sm:$0xff] }
 0x5ff   : > { %v8597_v15 = vmax.f32 %v8533_v63, 0.0  ;;  %v8598_v31 = vmax.f32 %v8534_v19, 0.0  ;;  %v8000_v1 = vrot.slane %v7986_v55, %v13698_v53  ;;  %v14528_v50 = vcombine.high %v14527_v26, %v14527_v26  ;;  %v14539_v6 = vld [vmem:[#allocation50_spill] sm:$0xff] }
 0x600   : > { %v8599_v11 = vmax.f32 %v8535_v62, 0.0  ;;  %v8865_v28 = vrot.slane %v8851_v42, %v13698_v53  ;;  %v8600_v49 = vmax.f32 %v8536_v29, 0.0  ;;  %v8001_v24 = vcombine.high %v7993_v27, %v7993_v27 }
 0x601   : > { %v8867_v32 = vcombine.low %v8596_v44, %v8597_v15  ;;  %v8537_v37 = vadd.f32 %v14528_v50, %v7985_v43  ;;  %v8538_v8 = vadd.f32 %v14529_v39, %v7993_v27  ;;  %v8002_v3 = vcombine.high %v8000_v1, %v8000_v1 }
 0x602   : > { %v8866_v14 = vcombine.low %v8858_v59, %v8865_v28  ;;  %v8868_v40 = vcombine.low %v8598_v31, %v8599_v11  ;;  %v14530_v58 = vcombine.high %v14529_v39, %v14529_v39  ;;  %v8540_v45 = vadd.f32 %v14531_v47, %v8000_v1  ;;  %v14540_v59 = vld [vmem:[#allocation28_spill] sm:$0xff]  ;;  %v14541_v1 = vld [vmem:[#allocation46_spill] sm:$0xff] }
 0x603   : > { %v8875_v12 = vrot.slane %v8867_v32, %v13698_v53  ;;  %v8601_v60 = vmax.f32 %v8537_v37, 0.0  ;;  %v8602_v56 = vmax.f32 %v8538_v8, 0.0  ;;  %v14532_v10 = vcombine.high %v14531_v47, %v14531_v47 }
 0x604   : > { %v8539_v23 = vadd.f32 %v14530_v58, %v8001_v24  ;;  %8978 = vst.msk [vmem:[%s10764_s16 + $0x50] sm:$0xff] %vm2538_vm2, %v8866_v14  ;;  %v8882_v35 = vrot.slane %v8868_v40, %v13698_v53  ;;  %v7530_v51 = vadd.f32 %v14060_v41, %v14533_v5  ;;  %v7531_v21 = vadd.f32 %v7508_v18, %v14534_v57 }
 0x605   : > { %v8541_v25 = vadd.f32 %v14532_v10, %v8002_v3  ;;  %v8884_v4 = vcombine.low %v8600_v49, %v8601_v60  ;;  %v8604_v61 = vmax.f32 %v8540_v45, 0.0  ;;  %v7532_v17 = vadd.f32 %v7511_v20, %v14535_v34 }
 0x606   : > { %v8603_v48 = vmax.f32 %v8539_v23, 0.0  ;;  %v8883_v2 = vcombine.low %v8875_v12, %v8882_v35  ;;  %v7705_v0 = vadd.f32 %v14536_v54, %v7530_v51  ;;  %v7706_v16 = vadd.f32 %v14537_v52, %v7531_v21 }
 0x607   : > { %v8605_v9 = vmax.f32 %v8541_v25, 0.0  ;;  %v8405_v63 = vcombine.high %v14538_v33, %v14538_v33  ;;  %v8406_v41 = vcombine.high %v14539_v6, %v14539_v6  ;;  %v7707_v18 = vadd.f32 %v14540_v59, %v7532_v17 }
 0x608   : > { %v8885_v38 = vcombine.low %v8602_v56, %v8603_v48  ;;  %8979 = vst.msk [vmem:[%s10764_s16 + $0x58] sm:$0xff] %vm2538_vm2, %v8883_v2  ;;  %v7730_v20 = vadd.f32 %v13824_v13, %v7705_v0  ;;  %v7731_v46 = vadd.f32 %v13824_v13, %v7706_v16  ;;  %v8422_v7 = vcombine.high %v14012_v22, %v14012_v22 }
 0x609   : > { %v8901_v36 = vcombine.low %v8604_v61, %v8605_v9  ;;  %v8892_v62 = vrot.slane %v8884_v4, %v13698_v53  ;;  %v7732_v19 = vadd.f32 %v13824_v13, %v7707_v18  ;;  %v8423_v44 = vcombine.high %v14023_v30, %v14023_v30 }
 0x60a   : > { %v8899_v55 = vrot.slane %v8885_v38, %v13698_v53  ;;  %v8003_v42 = vcombine.high %v7730_v20, %v7730_v20  ;;  %v8010_v43 = vrot.slane %v7730_v20, %v13698_v53  ;;  %v8020_v26 = vcombine.high %v7731_v46, %v7731_v46 }
 0x60b   : > { %v8909_v15 = vrot.slane %v8901_v36, %v13698_v53  ;;  %v8027_v11 = vrot.slane %v7731_v46, %v13698_v53  ;;  %v8037_v27 = vcombine.high %v7732_v19, %v7732_v19  ;;  %v8044_v28 = vrot.slane %v7732_v19, %v13698_v53 }
 0x60c   : > { %v8900_v29 = vcombine.low %v8892_v62, %v8899_v55  ;;  %v8017_v32 = vrot.slane %v8003_v42, %v13698_v53  ;;  %v8018_v31 = vcombine.high %v8010_v43, %v8010_v43  ;;  %v8542_v13 = vadd.f32 %v14541_v1, %v8010_v43 }
 0x60d   : > { %v8034_v50 = vrot.slane %v8020_v26, %v13698_v53  ;;  %v8035_v37 = vcombine.high %v8027_v11, %v8027_v11  ;;  %v8545_v49 = vadd.f32 %v8405_v63, %v8027_v11  ;;  %v8051_v24 = vrot.slane %v8037_v27, %v13698_v53 }
 0x60e   : > { %8980 = vst.msk [vmem:[%s10764_s16 + $0x60] sm:$0xff] %vm2538_vm2, %v8900_v29  ;;  %v8052_v39 = vcombine.high %v8044_v28, %v8044_v28  ;;  %v8019_v8 = vcombine.high %v8017_v32, %v8017_v32  ;;  %v14542_v14 = vcombine.high %v14541_v1, %v14541_v1  ;;  %v8606_v40 = vmax.f32 %v8542_v13, 0.0 }
 0x60f   : > { %v8036_v3 = vcombine.high %v8034_v50, %v8034_v50  ;;  %v8546_v60 = vadd.f32 %v14539_v6, %v8035_v37  ;;  %v8547_v58 = vadd.f32 %v8406_v41, %v8034_v50  ;;  %v8609_v23 = vmax.f32 %v8545_v49, 0.0 }
 0x610   : > { %v8543_v12 = vadd.f32 %v14542_v14, %v8018_v31  ;;  %v8549_v47 = vadd.f32 %v8422_v7, %v8044_v28  ;;  %v8544_v45 = vadd.f32 %v14538_v33, %v8019_v8  ;;  %v8550_v10 = vadd.f32 %v14023_v30, %v8052_v39 }
 0x611   : > { %v8548_v35 = vadd.f32 %v14012_v22, %v8036_v3  ;;  %v8610_v25 = vmax.f32 %v8546_v60, 0.0  ;;  %v8611_v5 = vmax.f32 %v8547_v58, 0.0  ;;  %v8551_v51 = vadd.f32 %v8423_v44, %v8051_v24 }
 0x612   : > { %v8607_v56 = vmax.f32 %v8543_v12, 0.0  ;;  %v8613_v57 = vmax.f32 %v8549_v47, 0.0  ;;  %v8608_v21 = vmax.f32 %v8544_v45, 0.0  ;;  %v8614_v61 = vmax.f32 %v8550_v10, 0.0 }
 0x613   : > { %v8612_v48 = vmax.f32 %v8548_v35, 0.0  ;;  %v8919_v34 = vcombine.low %v8610_v25, %v8611_v5  ;;  %v8615_v17 = vmax.f32 %v8551_v51, 0.0 }
 0x614   : > { %v8902_v4 = vcombine.low %v8606_v40, %v8607_v56  ;;  %v8918_v9 = vcombine.low %v8608_v21, %v8609_v23 }
 0x615   : > { %v8935_v54 = vcombine.low %v8612_v48, %v8613_v57  ;;  %v8933_v22 = vrot.slane %v8919_v34, %v13698_v53  ;;  %v8936_v30 = vcombine.low %v8614_v61, %v8615_v17 }
 0x616   : > { %v8916_v2 = vrot.slane %v8902_v4, %v13698_v53  ;;  %v8926_v52 = vrot.slane %v8918_v9, %v13698_v53 }
 0x617   : > { %v8943_v16 = vrot.slane %v8935_v54, %v13698_v53  ;;  %v8950_v38 = vrot.slane %v8936_v30, %v13698_v53 }
 0x618   : > { %v8917_v0 = vcombine.low %v8909_v15, %v8916_v2  ;;  %v8934_v33 = vcombine.low %v8926_v52, %v8933_v22 }
 0x619   : > { %v8951_v63 = vcombine.low %v8943_v16, %v8950_v38 }
 0x61a   : > { %8981 = vst.msk [vmem:[%s10764_s16 + $0x68] sm:$0xff] %vm2538_vm2, %v8917_v0  ;;  %8982 = vst.msk [vmem:[%s10764_s16 + $0x70] sm:$0xff] %vm2538_vm2, %v8934_v33 }
 0x61b   : > { %8983 = vst.msk [vmem:[%s10764_s16 + $0x78] sm:$0xff] %vm2538_vm2, %v8951_v63 }
 0x61c PF: > { %s16_s25 = sadd.s32 1, %s10589_s25   ;;  %s14543_s21 = smov %s10581_s23 }
 0x61d   : > { %p13_p9 = scmp.ge.s32.totalorder %s16_s25, 6   ;;  %s14544_s22 = smov %s10585_s24 }
 0x61e   : > { %s14545_s23 = smov %s14548_s26  ;;  %s14546_s24 = smov %s14552_s27 }
 0x61f   :  { %15 = sbr.rel (!%p13_p9) target bundleno = 3 (0x3), region = 109 }

</bundles_post_ra>
